<compile_context>
chip_gen: v7x
topology: tpu7x:2x2x1
jax: 0.10.0
libtpu: 0.0.40
codegen_flags: <defaults>
</compile_context>

<pallas_src>
import math
from functools import partial

import jax
import jax.numpy as jnp
from jax.experimental import pallas as pl
from jax.experimental.pallas import tpu as pltpu


# ----------------------------------------------------------------------------
# Helpers used inside the kernel.
# ----------------------------------------------------------------------------
def _layernorm(x, gamma, beta, eps):
    # Two-pass statistics (avoids E[x^2]-E[x]^2 cancellation; the sine PE adds
    # offsets up to ~2*pi to the mean).
    m = jnp.mean(x, axis=-1, keepdims=True)
    d = x - m
    var = jnp.mean(d * d, axis=-1, keepdims=True)
    return d * jax.lax.rsqrt(var + eps) * gamma + beta


# ----------------------------------------------------------------------------
# Pallas kernel: one ISDHead forward for one (batch, token-tile) grid cell.
# ----------------------------------------------------------------------------
def isd_head_kernel(
    fm_ref, pe_ref, k_ref, vo_ref,
    ln1_ref, wq_ref, bq_ref, bo_ref,
    lnm_ref, w1_ref, b1_ref, w2_ref, b2_ref,
    lnA_ref, wA_ref, bA_ref, lnB_ref, wBt_ref, bBt_ref,
    out_ref,
    *, depth, num_heads, num_queries, eps,
):
    bf16 = jnp.bfloat16

    # Fused: tokens = feature_map_tile + positional_embedding_tile (f32 residual).
    x = fm_ref[0].astype(jnp.float32) + pe_ref[...].astype(jnp.float32)    # (TN, C)
    TN, C = x.shape
    Mp = k_ref.shape[2]
    dh = C // num_heads
    scale = dh ** -0.5

    # Mask for zero-padded query slots; exp(-1e30 - m) underflows to exactly 0.
    if num_queries < Mp:
        key_mask = jax.lax.broadcasted_iota(jnp.int32, (1, Mp), 1) < num_queries
    else:
        key_mask = None

    # TODO(synk): on v5e the few real queries could live on the sublane axis to cut
    # softmax exp count ~16x; kept lane-major here for simplicity/portability.
    for i in range(depth):
        # ---------------- cross-attention (pre-norm, sink_competition=False) --
        ln1 = ln1_ref[i]                                                    # (2, C)
        sink = _layernorm(x, ln1[0:1, :], ln1[1:2, :], eps).astype(bf16)

        # Fused Q projection for all heads, pre-scaled by dh**-0.5.
        q_all = (jnp.dot(sink, wq_ref[i], preferred_element_type=jnp.float32)
                 + bq_ref[i]) * scale                                       # (TN, C)

        k_all = k_ref[0, i]                                                 # (Mp, C) bf16
        attn_heads = []
        for h in range(num_heads):
            q_h = q_all[:, h * dh:(h + 1) * dh].astype(bf16)                # (TN, dh)
            k_h = k_all[:, h * dh:(h + 1) * dh]                             # (Mp, dh)
            sim = jax.lax.dot_general(
                q_h, k_h, (((1,), (1,)), ((), ())),
                preferred_element_type=jnp.float32)                         # (TN, Mp)
            if key_mask is not None:
                sim = jnp.where(key_mask, sim, -1e30)
            m = jnp.max(sim, axis=-1, keepdims=True)
            e = jnp.exp(sim - m)
            attn = e * pl.reciprocal(jnp.sum(e, axis=-1, keepdims=True),
                                     approx=True)                           # softmax
            attn_heads.append(attn)
        # One K = num_heads*Mp contraction against the pre-stacked (V @ Wo):
        # replaces 4 matmuls + 4 RMWs of an f32 (TN, C) accumulator.
        attn_all = jnp.concatenate(attn_heads, axis=-1).astype(bf16)        # (TN, H*Mp)
        update = jnp.dot(attn_all, vo_ref[0, i],
                         preferred_element_type=jnp.float32)                # (TN, C)
        # dropout(p=0.0) is identity.
        x = x + update + bo_ref[i]

        # ---------------- MLP block: LN -> Linear -> SiLU -> Linear -----------
        lnm = lnm_ref[i]                                                    # (2, C)
        h_in = _layernorm(x, lnm[0:1, :], lnm[1:2, :], eps).astype(bf16)
        h1 = jnp.dot(h_in, w1_ref[i], preferred_element_type=jnp.float32) + b1_ref[i]
        h1 = h1 * jax.nn.sigmoid(h1)                                        # SiLU (f32)
        h2 = jnp.dot(h1.astype(bf16), w2_ref[i],
                     preferred_element_type=jnp.float32) + b2_ref[i]
        x = x + h2

    # ---------------- output projection: LN -> Linear -> LN -> Linear ---------
    lnA = lnA_ref[...]
    y = _layernorm(x, lnA[0:1, :], lnA[1:2, :], eps)
    y = jnp.dot(y.astype(bf16), wA_ref[...],
                preferred_element_type=jnp.float32) + bA_ref[...]
    lnB = lnB_ref[...]
    y = _layernorm(y, lnB[0:1, :], lnB[1:2, :], eps)
    # Emit the result already transposed: (out_dim, TN) is lane-dense even for
    # out_dim == 1 (no 1-of-128-lane masked stores).
    out_t = jax.lax.dot_general(
        wBt_ref[...], y.astype(bf16),
        (((1,), (1,)), ((), ())),
        preferred_element_type=jnp.float32) + bBt_ref[...]                  # (out_dim, TN)
    out_ref[0] = out_t.astype(out_ref.dtype)


# ----------------------------------------------------------------------------
# PositionEmbeddingSine (DETR-style, normalize=True), token-major (N, C).
# Pure constants -> constant-folded by XLA when the forward is jitted.
# ----------------------------------------------------------------------------
def position_embedding_sine_tokens(H, W, C, temperature=10000.0):
    npf = C // 2
    scale = 2.0 * math.pi
    eps = 1e-6
    y_embed = jnp.broadcast_to(
        jnp.arange(1, H + 1, dtype=jnp.float32)[:, None], (H, W))
    x_embed = jnp.broadcast_to(
        jnp.arange(1, W + 1, dtype=jnp.float32)[None, :], (H, W))
    y_embed = y_embed / (y_embed[-1:, :] + eps) * scale
    x_embed = x_embed / (x_embed[:, -1:] + eps) * scale
    dim_t = jnp.arange(npf, dtype=jnp.float32)
    dim_t = temperature ** (2.0 * jnp.floor(dim_t / 2.0) / npf)
    pos_x = x_embed[:, :, None] / dim_t                       # (H, W, npf)
    pos_y = y_embed[:, :, None] / dim_t
    pos_x = jnp.stack((jnp.sin(pos_x[:, :, 0::2]),
                       jnp.cos(pos_x[:, :, 1::2])), axis=3).reshape(H, W, npf)
    pos_y = jnp.stack((jnp.sin(pos_y[:, :, 0::2]),
                       jnp.cos(pos_y[:, :, 1::2])), axis=3).reshape(H, W, npf)
    pos = jnp.concatenate((pos_y, pos_x), axis=2)             # (H, W, C)
    return pos.reshape(H * W, C)                              # token index = h*W + w


# ----------------------------------------------------------------------------
# One-time parameter preparation (casts / transposes), done outside jit.
# ----------------------------------------------------------------------------
def prepare_head_params(params, *, num_heads):
    f32, bf16 = jnp.float32, jnp.bfloat16
    C = params["wq"].shape[-1]
    return {
        "ln1": params["ln1"].astype(f32),
        "lnc": params["lnc"].astype(f32),
        "wq": params["wq"].astype(bf16),                   # (depth, C, C), unsplit
        "bq": params["bq"].astype(f32),
        # K/V/Wo stay f32: they are folded per batch in the wrapper in f32 and
        # only the folded K / V@Wo tensors are cast to bf16 for the kernel.
        "wk": params["wkv"][:, :, :C].astype(f32),
        "bk": params["bkv"][:, :, :C].astype(f32),
        "wv": params["wkv"][:, :, C:].astype(f32),
        "bv": params["bkv"][:, :, C:].astype(f32),
        "wo": params["wo"].astype(f32),
        "bo": params["bo"].astype(f32),
        "lnm": params["lnm"].astype(f32),
        "w1": params["w1"].astype(bf16),
        "b1": params["b1"].astype(f32),
        "w2": params["w2"].astype(bf16),
        "b2": params["b2"].astype(f32),
        "lnA": params["lnA"].astype(f32),
        "wA": params["wA"].astype(bf16),
        "bA": params["bA"].astype(f32),
        "lnB": params["lnB"].astype(f32),
        "wBt": jnp.transpose(params["wB"]).astype(bf16),   # (out_dim, C)
        "bBt": jnp.transpose(params["bB"]).astype(f32),    # (out_dim, 1)
    }


def _choose_token_tile(N):
    # Largest divisor tile first (1024 amortizes per-grid-step overhead); pad
    # awkward N to a tile multiple instead of falling back to one huge block.
    for cand in (1024, 512, 256, 128):
        if N % cand == 0:
            return cand, N
    if N <= 128:
        return N, N
    tn = 512 if N >= 4096 else 256
    return tn, ((N + tn - 1) // tn) * tn


# ----------------------------------------------------------------------------
# One ISDHead forward (jittable; Pallas grid over batch x token tiles).
# ----------------------------------------------------------------------------
def isd_head_forward(feature_map, idrs, prep, *, depth, num_heads, eps=1e-6):
    # NOTE: module signature uses eps=1e-6; torch.nn.LayerNorm default would be 1e-5.
    B, C, H, W = feature_map.shape
    M = idrs.shape[1]
    N = H * W
    dh = C // num_heads
    out_dim = prep["wBt"].shape[0]
    f32, bf16 = jnp.float32, jnp.bfloat16

    TN, Np = _choose_token_tile(N)
    n_tiles = Np // TN
    Mp = max(128, ((M + 127) // 128) * 128)      # lane-dense padded query count

    # ---- token-tile-invariant context precompute (per batch & layer, f32) ----
    idrs_f = idrs.astype(f32)
    mu = jnp.mean(idrs_f, axis=-1, keepdims=True)
    d = idrs_f - mu
    var = jnp.mean(d * d, axis=-1, keepdims=True)
    xn = d * jax.lax.rsqrt(var + eps)                                    # (B, M, Cq)
    gamma = prep["lnc"][:, 0][:, None, None, :]                          # (depth,1,1,Cq)
    beta = prep["lnc"][:, 1][:, None, None, :]
    ctx = xn[None] * gamma + beta                                        # (depth,B,M,Cq)

    K = jnp.einsum("dbmq,dqc->dbmc", ctx, prep["wk"]) + prep["bk"][:, None]
    V = jnp.einsum("dbmq,dqc->dbmc", ctx, prep["wv"]) + prep["bv"][:, None]
    Vh = V.reshape(depth, B, M, num_heads, dh)
    Woh = prep["wo"].reshape(depth, num_heads, dh, C)
    VO = jnp.einsum("dbmhk,dhkc->dbhmc", Vh, Woh)                        # (depth,B,H,M,C)

    if Mp > M:
        K = jnp.pad(K, ((0, 0), (0, 0), (0, Mp - M), (0, 0)))
        VO = jnp.pad(VO, ((0, 0), (0, 0), (0, 0), (0, Mp - M), (0, 0)))
    K_b = jnp.transpose(K, (1, 0, 2, 3)).astype(bf16)                    # (B,depth,Mp,C)
    VO_b = jnp.transpose(VO, (1, 0, 2, 3, 4)).reshape(
        B, depth, num_heads * Mp, C).astype(bf16)                        # (B,depth,H*Mp,C)

    # ---- tokenize feature map; PE add is fused in the kernel ------------------
    # TODO(synk): a channels-last producer would remove this transpose copy.
    fm = jnp.transpose(feature_map, (0, 2, 3, 1)).reshape(B, N, C)
    pe = position_embedding_sine_tokens(H, W, C)                         # (N, C)
    if Np > N:   # padded tokens are independent garbage rows, sliced off below
        fm = jnp.pad(fm, ((0, 0), (0, Np - N), (0, 0)))
        pe = jnp.pad(pe, ((0, Np - N), (0, 0)))

    weights = [prep["ln1"], prep["wq"], prep["bq"], prep["bo"],
               prep["lnm"], prep["w1"], prep["b1"], prep["w2"], prep["b2"],
               prep["lnA"], prep["wA"], prep["bA"], prep["lnB"],
               prep["wBt"], prep["bBt"]]

    def _const_spec(arr):
        nd = arr.ndim
        return pl.BlockSpec(arr.shape, lambda b, t, _nd=nd: (0,) * _nd)

    in_specs = [
        pl.BlockSpec((1, TN, C), lambda b, t: (b, t, 0)),                 # fm tokens
        pl.BlockSpec((TN, C), lambda b, t: (t, 0)),                       # positional emb
        pl.BlockSpec((1, depth, Mp, C), lambda b, t: (b, 0, 0, 0)),       # K  (per batch)
        pl.BlockSpec((1, depth, num_heads * Mp, C),
                     lambda b, t: (b, 0, 0, 0)),                          # V@Wo stacked
    ] + [_const_spec(w) for w in weights]

    kernel = partial(isd_head_kernel, depth=depth, num_heads=num_heads,
                     num_queries=M, eps=eps)

    out = pl.pallas_call(
        kernel,
        out_shape=jax.ShapeDtypeStruct((B, out_dim, Np), jnp.float32),
        grid=(B, n_tiles),
        in_specs=in_specs,
        out_specs=pl.BlockSpec((1, out_dim, TN), lambda b, t: (b, 0, t)),
        compiler_params=pltpu.CompilerParams(
            dimension_semantics=("parallel", "parallel"),
            # Real working set is a few MiB; 32 MiB leaves headroom on v7x (64 MiB/TC)
            # and costs nothing on v5e/v6e.
            vmem_limit_bytes=32 * 1024 * 1024),
    )(fm, pe, K_b, VO_b, *weights)

    # (B, out_dim, Np) is channel-major already: slice off token padding, reshape.
    return out[:, :, :N].reshape(B, out_dim, H, W)


# ----------------------------------------------------------------------------
# Deterministic parameter construction (synthetic; mirrors module __init__ shapes).
# ----------------------------------------------------------------------------
def init_head_params(key, depth, pixel_dim, query_dim, expansion, output_dim):
    C, Cq, EC = pixel_dim, query_dim, expansion * pixel_dim
    keys = jax.random.split(key, 8)
    std = 0.02
    p = {}
    # LayerNorm params stacked as (depth, 2, dim): [gamma; beta]
    p["ln1"] = jnp.stack([jnp.ones((depth, C)), jnp.zeros((depth, C))], axis=1)
    p["lnc"] = jnp.stack([jnp.ones((depth, Cq)), jnp.zeros((depth, Cq))], axis=1)
    # Attention projections (to_q / to_kv / to_out; zero bias == bias-free)
    p["wq"] = std * jax.random.normal(keys[0], (depth, C, C), jnp.float32)
    p["bq"] = jnp.zeros((depth, 1, C), jnp.float32)
    p["wkv"] = std * jax.random.normal(keys[1], (depth, Cq, 2 * C), jnp.float32)
    p["bkv"] = jnp.zeros((depth, 1, 2 * C), jnp.float32)
    p["wo"] = std * jax.random.normal(keys[2], (depth, C, C), jnp.float32)
    p["bo"] = jnp.zeros((depth, 1, C), jnp.float32)
    # MLP: LN -> Linear(C, EC) -> SiLU -> Linear(EC, C)
    p["lnm"] = jnp.stack([jnp.ones((depth, C)), jnp.zeros((depth, C))], axis=1)
    p["w1"] = std * jax.random.normal(keys[3], (depth, C, EC), jnp.float32)
    p["b1"] = std * jax.random.normal(keys[4], (depth, 1, EC), jnp.float32)
    p["w2"] = std * jax.random.normal(keys[5], (depth, EC, C), jnp.float32)
    p["b2"] = jnp.zeros((depth, 1, C), jnp.float32)
    # proj_output: LN -> Linear(C, C) -> LN -> Linear(C, output_dim)
    p["lnA"] = jnp.stack([jnp.ones((C,)), jnp.zeros((C,))], axis=0)
    p["wA"] = std * jax.random.normal(keys[6], (C, C), jnp.float32)
    p["bA"] = jnp.zeros((1, C), jnp.float32)
    p["lnB"] = jnp.stack([jnp.ones((C,)), jnp.zeros((C,))], axis=0)
    p["wB"] = std * jax.random.normal(keys[7], (C, output_dim), jnp.float32)
    p["bB"] = jnp.zeros((1, output_dim), jnp.float32)
    return p


# ----------------------------------------------------------------------------
# ISD: one ISDHead per resolution (each resolution gets its own jit trace).
# ----------------------------------------------------------------------------
def isd_forward(xs, idrs, prepared_params, *, depth, num_heads):
    fwd = jax.jit(partial(isd_head_forward, depth=depth, num_heads=num_heads))
    outs = []
    for fm, q, p in zip(xs, idrs, prepared_params):
        outs.append(fwd(fm, q, p))
    return tuple(outs)


if __name__ == "__main__":
    # Small but layout-friendly config.
    num_resolutions = 2
    depth = 2
    pixel_dim = 128
    query_dim = 128
    num_heads = 4
    output_dim = 1
    expansion = 2
    batch = 2
    num_queries = 8
    spatial = [(8, 8), (4, 4)]   # per-resolution H, W

    key = jax.random.PRNGKey(0)
    k_data, k_par = jax.random.split(key)
    data_keys = jax.random.split(k_data, 2 * num_resolutions)
    par_keys = jax.random.split(k_par, num_resolutions)

    xs, idrs, prepared = [], [], []
    for i, (H, W) in enumerate(spatial):
        xs.append(jax.random.normal(data_keys[2 * i],
                                    (batch, pixel_dim, H, W), jnp.float32))
        idrs.append(jax.random.normal(data_keys[2 * i + 1],
                                      (batch, num_queries, query_dim), jnp.float32))
        raw = init_head_params(par_keys[i], depth, pixel_dim, query_dim,
                               expansion, output_dim)
        prepared.append(prepare_head_params(raw, num_heads=num_heads))

    # TODO(synk): nn.Dropout(p=0.0) and tensor.clone() are no-ops and are omitted.
    outs = isd_forward(xs, idrs, prepared, depth=depth, num_heads=num_heads)
    outs = jax.block_until_ready(outs)

    expected = [(batch, output_dim, H, W) for (H, W) in spatial]
    assert tuple(o.shape for o in outs) == tuple(expected), \
        f"bad shapes: {[o.shape for o in outs]}"
    assert all(bool(jnp.all(jnp.isfinite(o))) for o in outs)
    print("KERNEL_OK")
</pallas_src>

<mosaic_0001>
module attributes {stable_mosaic.version = 11 : i64} {
  func.func @isd_head_kernel(%arg0: i32, %arg1: i32, %arg2: memref<1x64x128xf32, #tpu.memory_space<vmem>>, %arg3: memref<64x128xf32, #tpu.memory_space<vmem>>, %arg4: memref<1x2x128x128xbf16, #tpu.memory_space<vmem>>, %arg5: memref<1x2x512x128xbf16, #tpu.memory_space<vmem>>, %arg6: memref<2x2x128xf32, #tpu.memory_space<vmem>>, %arg7: memref<2x128x128xbf16, #tpu.memory_space<vmem>>, %arg8: memref<2x1x128xf32, #tpu.memory_space<vmem>>, %arg9: memref<2x1x128xf32, #tpu.memory_space<vmem>>, %arg10: memref<2x2x128xf32, #tpu.memory_space<vmem>>, %arg11: memref<2x128x256xbf16, #tpu.memory_space<vmem>>, %arg12: memref<2x1x256xf32, #tpu.memory_space<vmem>>, %arg13: memref<2x256x128xbf16, #tpu.memory_space<vmem>>, %arg14: memref<2x1x128xf32, #tpu.memory_space<vmem>>, %arg15: memref<2x128xf32, #tpu.memory_space<vmem>>, %arg16: memref<128x128xbf16, #tpu.memory_space<vmem>>, %arg17: memref<1x128xf32, #tpu.memory_space<vmem>>, %arg18: memref<2x128xf32, #tpu.memory_space<vmem>>, %arg19: memref<1x128xbf16, #tpu.memory_space<vmem>>, %arg20: memref<1x1xf32, #tpu.memory_space<vmem>>, %arg21: memref<1x1x64xf32, #tpu.memory_space<vmem>>) attributes {dimension_semantics = [#tpu.dimension_semantics<parallel>, #tpu.dimension_semantics<parallel>], iteration_bounds = array<i64: 2, 1>, scalar_prefetch = 0 : i64, scratch_operands = 0 : i64, tpu.core_type = #tpu.core_type<tc>, window_params = [{transform_indices = @transform_0, window_bounds = array<i64: 1, 64, 128>}, {transform_indices = @transform_1, window_bounds = array<i64: 64, 128>}, {transform_indices = @transform_2, window_bounds = array<i64: 1, 2, 128, 128>}, {transform_indices = @transform_3, window_bounds = array<i64: 1, 2, 512, 128>}, {pipeline_mode = #tpu.pipeline_mode<synchronous>, transform_indices = @transform_4, window_bounds = array<i64: 2, 2, 128>}, {pipeline_mode = #tpu.pipeline_mode<synchronous>, transform_indices = @transform_5, window_bounds = array<i64: 2, 128, 128>}, {pipeline_mode = #tpu.pipeline_mode<synchronous>, transform_indices = @transform_6, window_bounds = array<i64: 2, 1, 128>}, {pipeline_mode = #tpu.pipeline_mode<synchronous>, transform_indices = @transform_7, window_bounds = array<i64: 2, 1, 128>}, {pipeline_mode = #tpu.pipeline_mode<synchronous>, transform_indices = @transform_8, window_bounds = array<i64: 2, 2, 128>}, {pipeline_mode = #tpu.pipeline_mode<synchronous>, transform_indices = @transform_9, window_bounds = array<i64: 2, 128, 256>}, {pipeline_mode = #tpu.pipeline_mode<synchronous>, transform_indices = @transform_10, window_bounds = array<i64: 2, 1, 256>}, {pipeline_mode = #tpu.pipeline_mode<synchronous>, transform_indices = @transform_11, window_bounds = array<i64: 2, 256, 128>}, {pipeline_mode = #tpu.pipeline_mode<synchronous>, transform_indices = @transform_12, window_bounds = array<i64: 2, 1, 128>}, {pipeline_mode = #tpu.pipeline_mode<synchronous>, transform_indices = @transform_13, window_bounds = array<i64: 2, 128>}, {pipeline_mode = #tpu.pipeline_mode<synchronous>, transform_indices = @transform_14, window_bounds = array<i64: 128, 128>}, {pipeline_mode = #tpu.pipeline_mode<synchronous>, transform_indices = @transform_15, window_bounds = array<i64: 1, 128>}, {pipeline_mode = #tpu.pipeline_mode<synchronous>, transform_indices = @transform_16, window_bounds = array<i64: 2, 128>}, {pipeline_mode = #tpu.pipeline_mode<synchronous>, transform_indices = @transform_17, window_bounds = array<i64: 1, 128>}, {pipeline_mode = #tpu.pipeline_mode<synchronous>, transform_indices = @transform_18, window_bounds = array<i64: 1, 1>}, {transform_indices = @transform_19, window_bounds = array<i64: 1, 1, 64>}]} {
    %c0 = arith.constant 0 : index
    %c0_0 = arith.constant 0 : index
    %c0_1 = arith.constant 0 : index
    %0 = vector.load %arg2[%c0, %c0_0, %c0_1] : memref<1x64x128xf32, #tpu.memory_space<vmem>>, vector<1x64x128xf32>
    %1 = vector.shape_cast %0 : vector<1x64x128xf32> to vector<64x128xf32>
    %c0_2 = arith.constant 0 : index
    %c0_3 = arith.constant 0 : index
    %2 = vector.load %arg3[%c0_2, %c0_3] : memref<64x128xf32, #tpu.memory_space<vmem>>, vector<64x128xf32>
    %3 = arith.addf %1, %2 : vector<64x128xf32>
    %4 = tpu.iota {dimensions = array<i32: 1>} : vector<1x128xi32>
    %c8_i32 = arith.constant 8 : i32
    %5 = vector.broadcast %c8_i32 : i32 to vector<1x128xi32>
    %6 = arith.cmpi slt, %4, %5 : vector<1x128xi32>
    %c0_4 = arith.constant 0 : index
    %c0_5 = arith.constant 0 : index
    %c0_6 = arith.constant 0 : index
    %7 = vector.load %arg6[%c0_4, %c0_5, %c0_6] : memref<2x2x128xf32, #tpu.memory_space<vmem>>, vector<1x2x128xf32>
    %8 = vector.shape_cast %7 : vector<1x2x128xf32> to vector<2x128xf32>
    %9 = vector.extract_strided_slice %8 {offsets = [0, 0], sizes = [1, 128], strides = [1, 1]} : vector<2x128xf32> to vector<1x128xf32>
    %10 = vector.extract_strided_slice %8 {offsets = [1, 0], sizes = [1, 128], strides = [1, 1]} : vector<2x128xf32> to vector<1x128xf32>
    %cst = arith.constant dense<0.000000e+00> : vector<64xf32>
    %11 = vector.multi_reduction <add>, %3, %cst [1] : vector<64x128xf32> to vector<64xf32>
    %12 = vector.shape_cast %11 : vector<64xf32> to vector<64x1xf32>
    %cst_7 = arith.constant 1.280000e+02 : f32
    %13 = vector.broadcast %cst_7 : f32 to vector<64x1xf32>
    %14 = arith.divf %12, %13 : vector<64x1xf32>
    %15 = vector.broadcast %14 : vector<64x1xf32> to vector<64x128xf32>
    %16 = arith.subf %3, %15 : vector<64x128xf32>
    %17 = arith.mulf %16, %16 : vector<64x128xf32>
    %cst_8 = arith.constant dense<0.000000e+00> : vector<64xf32>
    %18 = vector.multi_reduction <add>, %17, %cst_8 [1] : vector<64x128xf32> to vector<64xf32>
    %19 = vector.shape_cast %18 : vector<64xf32> to vector<64x1xf32>
    %cst_9 = arith.constant 1.280000e+02 : f32
    %20 = vector.broadcast %cst_9 : f32 to vector<64x1xf32>
    %21 = arith.divf %19, %20 : vector<64x1xf32>
    %cst_10 = arith.constant 9.99999997E-7 : f32
    %22 = vector.broadcast %cst_10 : f32 to vector<64x1xf32>
    %23 = arith.addf %21, %22 : vector<64x1xf32>
    %24 = math.rsqrt %23 : vector<64x1xf32>
    %25 = vector.broadcast %24 : vector<64x1xf32> to vector<64x128xf32>
    %26 = arith.mulf %16, %25 : vector<64x128xf32>
    %27 = vector.broadcast %9 : vector<1x128xf32> to vector<64x128xf32>
    %28 = arith.mulf %26, %27 : vector<64x128xf32>
    %29 = vector.broadcast %10 : vector<1x128xf32> to vector<64x128xf32>
    %30 = arith.addf %28, %29 : vector<64x128xf32>
    %31 = arith.truncf %30 : vector<64x128xf32> to vector<64x128xbf16>
    %c0_11 = arith.constant 0 : index
    %c0_12 = arith.constant 0 : index
    %c0_13 = arith.constant 0 : index
    %32 = vector.load %arg7[%c0_11, %c0_12, %c0_13] : memref<2x128x128xbf16, #tpu.memory_space<vmem>>, vector<1x128x128xbf16>
    %33 = vector.shape_cast %32 : vector<1x128x128xbf16> to vector<128x128xbf16>
    %cst_14 = arith.constant dense<0.000000e+00> : vector<64x128xf32>
    %34 = tpu.matmul %31, %33, %cst_14 {dimension_numbers = #tpu.dot_dimension_numbers<[1], [0], [0], [1], [0, 0, 1, 1], [], []>} : vector<64x128xbf16>, vector<128x128xbf16>, vector<64x128xf32> -> vector<64x128xf32>
    %c0_15 = arith.constant 0 : index
    %c0_16 = arith.constant 0 : index
    %c0_17 = arith.constant 0 : index
    %35 = vector.load %arg8[%c0_15, %c0_16, %c0_17] : memref<2x1x128xf32, #tpu.memory_space<vmem>>, vector<1x1x128xf32>
    %36 = vector.shape_cast %35 : vector<1x1x128xf32> to vector<1x128xf32>
    %37 = vector.broadcast %36 : vector<1x128xf32> to vector<64x128xf32>
    %38 = arith.addf %34, %37 : vector<64x128xf32>
    %cst_18 = arith.constant 0.176776692 : f32
    %39 = vector.broadcast %cst_18 : f32 to vector<64x128xf32>
    %40 = arith.mulf %38, %39 : vector<64x128xf32>
    %c0_19 = arith.constant 0 : index
    %c0_20 = arith.constant 0 : index
    %c0_21 = arith.constant 0 : index
    %c0_22 = arith.constant 0 : index
    %41 = vector.load %arg4[%c0_19, %c0_20, %c0_21, %c0_22] : memref<1x2x128x128xbf16, #tpu.memory_space<vmem>>, vector<1x1x128x128xbf16>
    %42 = vector.shape_cast %41 : vector<1x1x128x128xbf16> to vector<128x128xbf16>
    %43 = vector.extract_strided_slice %40 {offsets = [0, 0], sizes = [64, 32], strides = [1, 1]} : vector<64x128xf32> to vector<64x32xf32>
    %44 = arith.truncf %43 : vector<64x32xf32> to vector<64x32xbf16>
    %45 = vector.extract_strided_slice %42 {offsets = [0, 0], sizes = [128, 32], strides = [1, 1]} : vector<128x128xbf16> to vector<128x32xbf16>
    %cst_23 = arith.constant dense<0.000000e+00> : vector<64x128xf32>
    %46 = tpu.matmul %44, %45, %cst_23 {dimension_numbers = #tpu.dot_dimension_numbers<[1], [1], [0], [0], [0, 0, 1, 0], [], []>} : vector<64x32xbf16>, vector<128x32xbf16>, vector<64x128xf32> -> vector<64x128xf32>
    %cst_24 = arith.constant -1.000000e+30 : f32
    %47 = vector.shape_cast %6 : vector<1x128xi1> to vector<1x128xi1>
    %48 = vector.broadcast %47 : vector<1x128xi1> to vector<64x128xi1>
    %49 = vector.broadcast %cst_24 : f32 to vector<64x128xf32>
    %50 = arith.select %48, %46, %49 : vector<64x128xi1>, vector<64x128xf32>
    %cst_25 = arith.constant dense<0xFF800000> : vector<64xf32>
    %51 = vector.multi_reduction <maximumf>, %50, %cst_25 [1] : vector<64x128xf32> to vector<64xf32>
    %52 = vector.shape_cast %51 : vector<64xf32> to vector<64x1xf32>
    %53 = vector.broadcast %52 : vector<64x1xf32> to vector<64x128xf32>
    %54 = arith.subf %50, %53 : vector<64x128xf32>
    %55 = math.exp %54 : vector<64x128xf32>
    %cst_26 = arith.constant dense<0.000000e+00> : vector<64xf32>
    %56 = vector.multi_reduction <add>, %55, %cst_26 [1] : vector<64x128xf32> to vector<64xf32>
    %57 = vector.shape_cast %56 : vector<64xf32> to vector<64x1xf32>
    %58 = tpu.reciprocal %57 {approx = true} : vector<64x1xf32> -> vector<64x1xf32>
    %59 = vector.broadcast %58 : vector<64x1xf32> to vector<64x128xf32>
    %60 = arith.mulf %55, %59 : vector<64x128xf32>
    %61 = vector.extract_strided_slice %40 {offsets = [0, 32], sizes = [64, 32], strides = [1, 1]} : vector<64x128xf32> to vector<64x32xf32>
    %62 = arith.truncf %61 : vector<64x32xf32> to vector<64x32xbf16>
    %63 = vector.extract_strided_slice %42 {offsets = [0, 32], sizes = [128, 32], strides = [1, 1]} : vector<128x128xbf16> to vector<128x32xbf16>
    %cst_27 = arith.constant dense<0.000000e+00> : vector<64x128xf32>
    %64 = tpu.matmul %62, %63, %cst_27 {dimension_numbers = #tpu.dot_dimension_numbers<[1], [1], [0], [0], [0, 0, 1, 0], [], []>} : vector<64x32xbf16>, vector<128x32xbf16>, vector<64x128xf32> -> vector<64x128xf32>
    %cst_28 = arith.constant -1.000000e+30 : f32
    %65 = vector.shape_cast %6 : vector<1x128xi1> to vector<1x128xi1>
    %66 = vector.broadcast %65 : vector<1x128xi1> to vector<64x128xi1>
    %67 = vector.broadcast %cst_28 : f32 to vector<64x128xf32>
    %68 = arith.select %66, %64, %67 : vector<64x128xi1>, vector<64x128xf32>
    %cst_29 = arith.constant dense<0xFF800000> : vector<64xf32>
    %69 = vector.multi_reduction <maximumf>, %68, %cst_29 [1] : vector<64x128xf32> to vector<64xf32>
    %70 = vector.shape_cast %69 : vector<64xf32> to vector<64x1xf32>
    %71 = vector.broadcast %70 : vector<64x1xf32> to vector<64x128xf32>
    %72 = arith.subf %68, %71 : vector<64x128xf32>
    %73 = math.exp %72 : vector<64x128xf32>
    %cst_30 = arith.constant dense<0.000000e+00> : vector<64xf32>
    %74 = vector.multi_reduction <add>, %73, %cst_30 [1] : vector<64x128xf32> to vector<64xf32>
    %75 = vector.shape_cast %74 : vector<64xf32> to vector<64x1xf32>
    %76 = tpu.reciprocal %75 {approx = true} : vector<64x1xf32> -> vector<64x1xf32>
    %77 = vector.broadcast %76 : vector<64x1xf32> to vector<64x128xf32>
    %78 = arith.mulf %73, %77 : vector<64x128xf32>
    %79 = vector.extract_strided_slice %40 {offsets = [0, 64], sizes = [64, 32], strides = [1, 1]} : vector<64x128xf32> to vector<64x32xf32>
    %80 = arith.truncf %79 : vector<64x32xf32> to vector<64x32xbf16>
    %81 = vector.extract_strided_slice %42 {offsets = [0, 64], sizes = [128, 32], strides = [1, 1]} : vector<128x128xbf16> to vector<128x32xbf16>
    %cst_31 = arith.constant dense<0.000000e+00> : vector<64x128xf32>
    %82 = tpu.matmul %80, %81, %cst_31 {dimension_numbers = #tpu.dot_dimension_numbers<[1], [1], [0], [0], [0, 0, 1, 0], [], []>} : vector<64x32xbf16>, vector<128x32xbf16>, vector<64x128xf32> -> vector<64x128xf32>
    %cst_32 = arith.constant -1.000000e+30 : f32
    %83 = vector.shape_cast %6 : vector<1x128xi1> to vector<1x128xi1>
    %84 = vector.broadcast %83 : vector<1x128xi1> to vector<64x128xi1>
    %85 = vector.broadcast %cst_32 : f32 to vector<64x128xf32>
    %86 = arith.select %84, %82, %85 : vector<64x128xi1>, vector<64x128xf32>
    %cst_33 = arith.constant dense<0xFF800000> : vector<64xf32>
    %87 = vector.multi_reduction <maximumf>, %86, %cst_33 [1] : vector<64x128xf32> to vector<64xf32>
    %88 = vector.shape_cast %87 : vector<64xf32> to vector<64x1xf32>
    %89 = vector.broadcast %88 : vector<64x1xf32> to vector<64x128xf32>
    %90 = arith.subf %86, %89 : vector<64x128xf32>
    %91 = math.exp %90 : vector<64x128xf32>
    %cst_34 = arith.constant dense<0.000000e+00> : vector<64xf32>
    %92 = vector.multi_reduction <add>, %91, %cst_34 [1] : vector<64x128xf32> to vector<64xf32>
    %93 = vector.shape_cast %92 : vector<64xf32> to vector<64x1xf32>
    %94 = tpu.reciprocal %93 {approx = true} : vector<64x1xf32> -> vector<64x1xf32>
    %95 = vector.broadcast %94 : vector<64x1xf32> to vector<64x128xf32>
    %96 = arith.mulf %91, %95 : vector<64x128xf32>
    %97 = vector.extract_strided_slice %40 {offsets = [0, 96], sizes = [64, 32], strides = [1, 1]} : vector<64x128xf32> to vector<64x32xf32>
    %98 = arith.truncf %97 : vector<64x32xf32> to vector<64x32xbf16>
    %99 = vector.extract_strided_slice %42 {offsets = [0, 96], sizes = [128, 32], strides = [1, 1]} : vector<128x128xbf16> to vector<128x32xbf16>
    %cst_35 = arith.constant dense<0.000000e+00> : vector<64x128xf32>
    %100 = tpu.matmul %98, %99, %cst_35 {dimension_numbers = #tpu.dot_dimension_numbers<[1], [1], [0], [0], [0, 0, 1, 0], [], []>} : vector<64x32xbf16>, vector<128x32xbf16>, vector<64x128xf32> -> vector<64x128xf32>
    %cst_36 = arith.constant -1.000000e+30 : f32
    %101 = vector.shape_cast %6 : vector<1x128xi1> to vector<1x128xi1>
    %102 = vector.broadcast %101 : vector<1x128xi1> to vector<64x128xi1>
    %103 = vector.broadcast %cst_36 : f32 to vector<64x128xf32>
    %104 = arith.select %102, %100, %103 : vector<64x128xi1>, vector<64x128xf32>
    %cst_37 = arith.constant dense<0xFF800000> : vector<64xf32>
    %105 = vector.multi_reduction <maximumf>, %104, %cst_37 [1] : vector<64x128xf32> to vector<64xf32>
    %106 = vector.shape_cast %105 : vector<64xf32> to vector<64x1xf32>
    %107 = vector.broadcast %106 : vector<64x1xf32> to vector<64x128xf32>
    %108 = arith.subf %104, %107 : vector<64x128xf32>
    %109 = math.exp %108 : vector<64x128xf32>
    %cst_38 = arith.constant dense<0.000000e+00> : vector<64xf32>
    %110 = vector.multi_reduction <add>, %109, %cst_38 [1] : vector<64x128xf32> to vector<64xf32>
    %111 = vector.shape_cast %110 : vector<64xf32> to vector<64x1xf32>
    %112 = tpu.reciprocal %111 {approx = true} : vector<64x1xf32> -> vector<64x1xf32>
    %113 = vector.broadcast %112 : vector<64x1xf32> to vector<64x128xf32>
    %114 = arith.mulf %109, %113 : vector<64x128xf32>
    %115 = tpu.concatenate %60, %78, %96, %114 in 1 : vector<64x128xf32>, vector<64x128xf32>, vector<64x128xf32>, vector<64x128xf32> -> vector<64x512xf32>
    %116 = arith.truncf %115 : vector<64x512xf32> to vector<64x512xbf16>
    %c0_39 = arith.constant 0 : index
    %c0_40 = arith.constant 0 : index
    %c0_41 = arith.constant 0 : index
    %c0_42 = arith.constant 0 : index
    %117 = vector.load %arg5[%c0_39, %c0_40, %c0_41, %c0_42] : memref<1x2x512x128xbf16, #tpu.memory_space<vmem>>, vector<1x1x512x128xbf16>
    %118 = vector.shape_cast %117 : vector<1x1x512x128xbf16> to vector<512x128xbf16>
    %cst_43 = arith.constant dense<0.000000e+00> : vector<64x128xf32>
    %119 = tpu.matmul %116, %118, %cst_43 {dimension_numbers = #tpu.dot_dimension_numbers<[1], [0], [0], [1], [0, 0, 1, 1], [], []>} : vector<64x512xbf16>, vector<512x128xbf16>, vector<64x128xf32> -> vector<64x128xf32>
    %120 = arith.addf %3, %119 : vector<64x128xf32>
    %c0_44 = arith.constant 0 : index
    %c0_45 = arith.constant 0 : index
    %c0_46 = arith.constant 0 : index
    %121 = vector.load %arg9[%c0_44, %c0_45, %c0_46] : memref<2x1x128xf32, #tpu.memory_space<vmem>>, vector<1x1x128xf32>
    %122 = vector.shape_cast %121 : vector<1x1x128xf32> to vector<1x128xf32>
    %123 = vector.broadcast %122 : vector<1x128xf32> to vector<64x128xf32>
    %124 = arith.addf %120, %123 : vector<64x128xf32>
    %c0_47 = arith.constant 0 : index
    %c0_48 = arith.constant 0 : index
    %c0_49 = arith.constant 0 : index
    %125 = vector.load %arg10[%c0_47, %c0_48, %c0_49] : memref<2x2x128xf32, #tpu.memory_space<vmem>>, vector<1x2x128xf32>
    %126 = vector.shape_cast %125 : vector<1x2x128xf32> to vector<2x128xf32>
    %127 = vector.extract_strided_slice %126 {offsets = [0, 0], sizes = [1, 128], strides = [1, 1]} : vector<2x128xf32> to vector<1x128xf32>
    %128 = vector.extract_strided_slice %126 {offsets = [1, 0], sizes = [1, 128], strides = [1, 1]} : vector<2x128xf32> to vector<1x128xf32>
    %cst_50 = arith.constant dense<0.000000e+00> : vector<64xf32>
    %129 = vector.multi_reduction <add>, %124, %cst_50 [1] : vector<64x128xf32> to vector<64xf32>
    %130 = vector.shape_cast %129 : vector<64xf32> to vector<64x1xf32>
    %cst_51 = arith.constant 1.280000e+02 : f32
    %131 = vector.broadcast %cst_51 : f32 to vector<64x1xf32>
    %132 = arith.divf %130, %131 : vector<64x1xf32>
    %133 = vector.broadcast %132 : vector<64x1xf32> to vector<64x128xf32>
    %134 = arith.subf %124, %133 : vector<64x128xf32>
    %135 = arith.mulf %134, %134 : vector<64x128xf32>
    %cst_52 = arith.constant dense<0.000000e+00> : vector<64xf32>
    %136 = vector.multi_reduction <add>, %135, %cst_52 [1] : vector<64x128xf32> to vector<64xf32>
    %137 = vector.shape_cast %136 : vector<64xf32> to vector<64x1xf32>
    %cst_53 = arith.constant 1.280000e+02 : f32
    %138 = vector.broadcast %cst_53 : f32 to vector<64x1xf32>
    %139 = arith.divf %137, %138 : vector<64x1xf32>
    %cst_54 = arith.constant 9.99999997E-7 : f32
    %140 = vector.broadcast %cst_54 : f32 to vector<64x1xf32>
    %141 = arith.addf %139, %140 : vector<64x1xf32>
    %142 = math.rsqrt %141 : vector<64x1xf32>
    %143 = vector.broadcast %142 : vector<64x1xf32> to vector<64x128xf32>
    %144 = arith.mulf %134, %143 : vector<64x128xf32>
    %145 = vector.broadcast %127 : vector<1x128xf32> to vector<64x128xf32>
    %146 = arith.mulf %144, %145 : vector<64x128xf32>
    %147 = vector.broadcast %128 : vector<1x128xf32> to vector<64x128xf32>
    %148 = arith.addf %146, %147 : vector<64x128xf32>
    %149 = arith.truncf %148 : vector<64x128xf32> to vector<64x128xbf16>
    %c0_55 = arith.constant 0 : index
    %c0_56 = arith.constant 0 : index
    %c0_57 = arith.constant 0 : index
    %150 = vector.load %arg11[%c0_55, %c0_56, %c0_57] : memref<2x128x256xbf16, #tpu.memory_space<vmem>>, vector<1x128x256xbf16>
    %151 = vector.shape_cast %150 : vector<1x128x256xbf16> to vector<128x256xbf16>
    %cst_58 = arith.constant dense<0.000000e+00> : vector<64x256xf32>
    %152 = tpu.matmul %149, %151, %cst_58 {dimension_numbers = #tpu.dot_dimension_numbers<[1], [0], [0], [1], [0, 0, 1, 1], [], []>} : vector<64x128xbf16>, vector<128x256xbf16>, vector<64x256xf32> -> vector<64x256xf32>
    %c0_59 = arith.constant 0 : index
    %c0_60 = arith.constant 0 : index
    %c0_61 = arith.constant 0 : index
    %153 = vector.load %arg12[%c0_59, %c0_60, %c0_61] : memref<2x1x256xf32, #tpu.memory_space<vmem>>, vector<1x1x256xf32>
    %154 = vector.shape_cast %153 : vector<1x1x256xf32> to vector<1x256xf32>
    %155 = vector.broadcast %154 : vector<1x256xf32> to vector<64x256xf32>
    %156 = arith.addf %152, %155 : vector<64x256xf32>
    %157 = arith.negf %156 : vector<64x256xf32>
    %158 = math.exp %157 : vector<64x256xf32>
    %cst_62 = arith.constant 1.000000e+00 : f32
    %159 = vector.broadcast %cst_62 : f32 to vector<64x256xf32>
    %160 = arith.addf %159, %158 : vector<64x256xf32>
    %161 = arith.divf %159, %160 : vector<64x256xf32>
    %162 = arith.mulf %156, %161 : vector<64x256xf32>
    %163 = arith.truncf %162 : vector<64x256xf32> to vector<64x256xbf16>
    %c0_63 = arith.constant 0 : index
    %c0_64 = arith.constant 0 : index
    %c0_65 = arith.constant 0 : index
    %164 = vector.load %arg13[%c0_63, %c0_64, %c0_65] : memref<2x256x128xbf16, #tpu.memory_space<vmem>>, vector<1x256x128xbf16>
    %165 = vector.shape_cast %164 : vector<1x256x128xbf16> to vector<256x128xbf16>
    %cst_66 = arith.constant dense<0.000000e+00> : vector<64x128xf32>
    %166 = tpu.matmul %163, %165, %cst_66 {dimension_numbers = #tpu.dot_dimension_numbers<[1], [0], [0], [1], [0, 0, 1, 1], [], []>} : vector<64x256xbf16>, vector<256x128xbf16>, vector<64x128xf32> -> vector<64x128xf32>
    %c0_67 = arith.constant 0 : index
    %c0_68 = arith.constant 0 : index
    %c0_69 = arith.constant 0 : index
    %167 = vector.load %arg14[%c0_67, %c0_68, %c0_69] : memref<2x1x128xf32, #tpu.memory_space<vmem>>, vector<1x1x128xf32>
    %168 = vector.shape_cast %167 : vector<1x1x128xf32> to vector<1x128xf32>
    %169 = vector.broadcast %168 : vector<1x128xf32> to vector<64x128xf32>
    %170 = arith.addf %166, %169 : vector<64x128xf32>
    %171 = arith.addf %124, %170 : vector<64x128xf32>
    %c1 = arith.constant 1 : index
    %c0_70 = arith.constant 0 : index
    %c0_71 = arith.constant 0 : index
    %172 = vector.load %arg6[%c1, %c0_70, %c0_71] : memref<2x2x128xf32, #tpu.memory_space<vmem>>, vector<1x2x128xf32>
    %173 = vector.shape_cast %172 : vector<1x2x128xf32> to vector<2x128xf32>
    %174 = vector.extract_strided_slice %173 {offsets = [0, 0], sizes = [1, 128], strides = [1, 1]} : vector<2x128xf32> to vector<1x128xf32>
    %175 = vector.extract_strided_slice %173 {offsets = [1, 0], sizes = [1, 128], strides = [1, 1]} : vector<2x128xf32> to vector<1x128xf32>
    %cst_72 = arith.constant dense<0.000000e+00> : vector<64xf32>
    %176 = vector.multi_reduction <add>, %171, %cst_72 [1] : vector<64x128xf32> to vector<64xf32>
    %177 = vector.shape_cast %176 : vector<64xf32> to vector<64x1xf32>
    %cst_73 = arith.constant 1.280000e+02 : f32
    %178 = vector.broadcast %cst_73 : f32 to vector<64x1xf32>
    %179 = arith.divf %177, %178 : vector<64x1xf32>
    %180 = vector.broadcast %179 : vector<64x1xf32> to vector<64x128xf32>
    %181 = arith.subf %171, %180 : vector<64x128xf32>
    %182 = arith.mulf %181, %181 : vector<64x128xf32>
    %cst_74 = arith.constant dense<0.000000e+00> : vector<64xf32>
    %183 = vector.multi_reduction <add>, %182, %cst_74 [1] : vector<64x128xf32> to vector<64xf32>
    %184 = vector.shape_cast %183 : vector<64xf32> to vector<64x1xf32>
    %cst_75 = arith.constant 1.280000e+02 : f32
    %185 = vector.broadcast %cst_75 : f32 to vector<64x1xf32>
    %186 = arith.divf %184, %185 : vector<64x1xf32>
    %cst_76 = arith.constant 9.99999997E-7 : f32
    %187 = vector.broadcast %cst_76 : f32 to vector<64x1xf32>
    %188 = arith.addf %186, %187 : vector<64x1xf32>
    %189 = math.rsqrt %188 : vector<64x1xf32>
    %190 = vector.broadcast %189 : vector<64x1xf32> to vector<64x128xf32>
    %191 = arith.mulf %181, %190 : vector<64x128xf32>
    %192 = vector.broadcast %174 : vector<1x128xf32> to vector<64x128xf32>
    %193 = arith.mulf %191, %192 : vector<64x128xf32>
    %194 = vector.broadcast %175 : vector<1x128xf32> to vector<64x128xf32>
    %195 = arith.addf %193, %194 : vector<64x128xf32>
    %196 = arith.truncf %195 : vector<64x128xf32> to vector<64x128xbf16>
    %c1_77 = arith.constant 1 : index
    %c0_78 = arith.constant 0 : index
    %c0_79 = arith.constant 0 : index
    %197 = vector.load %arg7[%c1_77, %c0_78, %c0_79] : memref<2x128x128xbf16, #tpu.memory_space<vmem>>, vector<1x128x128xbf16>
    %198 = vector.shape_cast %197 : vector<1x128x128xbf16> to vector<128x128xbf16>
    %cst_80 = arith.constant dense<0.000000e+00> : vector<64x128xf32>
    %199 = tpu.matmul %196, %198, %cst_80 {dimension_numbers = #tpu.dot_dimension_numbers<[1], [0], [0], [1], [0, 0, 1, 1], [], []>} : vector<64x128xbf16>, vector<128x128xbf16>, vector<64x128xf32> -> vector<64x128xf32>
    %c1_81 = arith.constant 1 : index
    %c0_82 = arith.constant 0 : index
    %c0_83 = arith.constant 0 : index
    %200 = vector.load %arg8[%c1_81, %c0_82, %c0_83] : memref<2x1x128xf32, #tpu.memory_space<vmem>>, vector<1x1x128xf32>
    %201 = vector.shape_cast %200 : vector<1x1x128xf32> to vector<1x128xf32>
    %202 = vector.broadcast %201 : vector<1x128xf32> to vector<64x128xf32>
    %203 = arith.addf %199, %202 : vector<64x128xf32>
    %cst_84 = arith.constant 0.176776692 : f32
    %204 = vector.broadcast %cst_84 : f32 to vector<64x128xf32>
    %205 = arith.mulf %203, %204 : vector<64x128xf32>
    %c0_85 = arith.constant 0 : index
    %c1_86 = arith.constant 1 : index
    %c0_87 = arith.constant 0 : index
    %c0_88 = arith.constant 0 : index
    %206 = vector.load %arg4[%c0_85, %c1_86, %c0_87, %c0_88] : memref<1x2x128x128xbf16, #tpu.memory_space<vmem>>, vector<1x1x128x128xbf16>
    %207 = vector.shape_cast %206 : vector<1x1x128x128xbf16> to vector<128x128xbf16>
    %208 = vector.extract_strided_slice %205 {offsets = [0, 0], sizes = [64, 32], strides = [1, 1]} : vector<64x128xf32> to vector<64x32xf32>
    %209 = arith.truncf %208 : vector<64x32xf32> to vector<64x32xbf16>
    %210 = vector.extract_strided_slice %207 {offsets = [0, 0], sizes = [128, 32], strides = [1, 1]} : vector<128x128xbf16> to vector<128x32xbf16>
    %cst_89 = arith.constant dense<0.000000e+00> : vector<64x128xf32>
    %211 = tpu.matmul %209, %210, %cst_89 {dimension_numbers = #tpu.dot_dimension_numbers<[1], [1], [0], [0], [0, 0, 1, 0], [], []>} : vector<64x32xbf16>, vector<128x32xbf16>, vector<64x128xf32> -> vector<64x128xf32>
    %cst_90 = arith.constant -1.000000e+30 : f32
    %212 = vector.shape_cast %6 : vector<1x128xi1> to vector<1x128xi1>
    %213 = vector.broadcast %212 : vector<1x128xi1> to vector<64x128xi1>
    %214 = vector.broadcast %cst_90 : f32 to vector<64x128xf32>
    %215 = arith.select %213, %211, %214 : vector<64x128xi1>, vector<64x128xf32>
    %cst_91 = arith.constant dense<0xFF800000> : vector<64xf32>
    %216 = vector.multi_reduction <maximumf>, %215, %cst_91 [1] : vector<64x128xf32> to vector<64xf32>
    %217 = vector.shape_cast %216 : vector<64xf32> to vector<64x1xf32>
    %218 = vector.broadcast %217 : vector<64x1xf32> to vector<64x128xf32>
    %219 = arith.subf %215, %218 : vector<64x128xf32>
    %220 = math.exp %219 : vector<64x128xf32>
    %cst_92 = arith.constant dense<0.000000e+00> : vector<64xf32>
    %221 = vector.multi_reduction <add>, %220, %cst_92 [1] : vector<64x128xf32> to vector<64xf32>
    %222 = vector.shape_cast %221 : vector<64xf32> to vector<64x1xf32>
    %223 = tpu.reciprocal %222 {approx = true} : vector<64x1xf32> -> vector<64x1xf32>
    %224 = vector.broadcast %223 : vector<64x1xf32> to vector<64x128xf32>
    %225 = arith.mulf %220, %224 : vector<64x128xf32>
    %226 = vector.extract_strided_slice %205 {offsets = [0, 32], sizes = [64, 32], strides = [1, 1]} : vector<64x128xf32> to vector<64x32xf32>
    %227 = arith.truncf %226 : vector<64x32xf32> to vector<64x32xbf16>
    %228 = vector.extract_strided_slice %207 {offsets = [0, 32], sizes = [128, 32], strides = [1, 1]} : vector<128x128xbf16> to vector<128x32xbf16>
    %cst_93 = arith.constant dense<0.000000e+00> : vector<64x128xf32>
    %229 = tpu.matmul %227, %228, %cst_93 {dimension_numbers = #tpu.dot_dimension_numbers<[1], [1], [0], [0], [0, 0, 1, 0], [], []>} : vector<64x32xbf16>, vector<128x32xbf16>, vector<64x128xf32> -> vector<64x128xf32>
    %cst_94 = arith.constant -1.000000e+30 : f32
    %230 = vector.shape_cast %6 : vector<1x128xi1> to vector<1x128xi1>
    %231 = vector.broadcast %230 : vector<1x128xi1> to vector<64x128xi1>
    %232 = vector.broadcast %cst_94 : f32 to vector<64x128xf32>
    %233 = arith.select %231, %229, %232 : vector<64x128xi1>, vector<64x128xf32>
    %cst_95 = arith.constant dense<0xFF800000> : vector<64xf32>
    %234 = vector.multi_reduction <maximumf>, %233, %cst_95 [1] : vector<64x128xf32> to vector<64xf32>
    %235 = vector.shape_cast %234 : vector<64xf32> to vector<64x1xf32>
    %236 = vector.broadcast %235 : vector<64x1xf32> to vector<64x128xf32>
    %237 = arith.subf %233, %236 : vector<64x128xf32>
    %238 = math.exp %237 : vector<64x128xf32>
    %cst_96 = arith.constant dense<0.000000e+00> : vector<64xf32>
    %239 = vector.multi_reduction <add>, %238, %cst_96 [1] : vector<64x128xf32> to vector<64xf32>
    %240 = vector.shape_cast %239 : vector<64xf32> to vector<64x1xf32>
    %241 = tpu.reciprocal %240 {approx = true} : vector<64x1xf32> -> vector<64x1xf32>
    %242 = vector.broadcast %241 : vector<64x1xf32> to vector<64x128xf32>
    %243 = arith.mulf %238, %242 : vector<64x128xf32>
    %244 = vector.extract_strided_slice %205 {offsets = [0, 64], sizes = [64, 32], strides = [1, 1]} : vector<64x128xf32> to vector<64x32xf32>
    %245 = arith.truncf %244 : vector<64x32xf32> to vector<64x32xbf16>
    %246 = vector.extract_strided_slice %207 {offsets = [0, 64], sizes = [128, 32], strides = [1, 1]} : vector<128x128xbf16> to vector<128x32xbf16>
    %cst_97 = arith.constant dense<0.000000e+00> : vector<64x128xf32>
    %247 = tpu.matmul %245, %246, %cst_97 {dimension_numbers = #tpu.dot_dimension_numbers<[1], [1], [0], [0], [0, 0, 1, 0], [], []>} : vector<64x32xbf16>, vector<128x32xbf16>, vector<64x128xf32> -> vector<64x128xf32>
    %cst_98 = arith.constant -1.000000e+30 : f32
    %248 = vector.shape_cast %6 : vector<1x128xi1> to vector<1x128xi1>
    %249 = vector.broadcast %248 : vector<1x128xi1> to vector<64x128xi1>
    %250 = vector.broadcast %cst_98 : f32 to vector<64x128xf32>
    %251 = arith.select %249, %247, %250 : vector<64x128xi1>, vector<64x128xf32>
    %cst_99 = arith.constant dense<0xFF800000> : vector<64xf32>
    %252 = vector.multi_reduction <maximumf>, %251, %cst_99 [1] : vector<64x128xf32> to vector<64xf32>
    %253 = vector.shape_cast %252 : vector<64xf32> to vector<64x1xf32>
    %254 = vector.broadcast %253 : vector<64x1xf32> to vector<64x128xf32>
    %255 = arith.subf %251, %254 : vector<64x128xf32>
    %256 = math.exp %255 : vector<64x128xf32>
    %cst_100 = arith.constant dense<0.000000e+00> : vector<64xf32>
    %257 = vector.multi_reduction <add>, %256, %cst_100 [1] : vector<64x128xf32> to vector<64xf32>
    %258 = vector.shape_cast %257 : vector<64xf32> to vector<64x1xf32>
    %259 = tpu.reciprocal %258 {approx = true} : vector<64x1xf32> -> vector<64x1xf32>
    %260 = vector.broadcast %259 : vector<64x1xf32> to vector<64x128xf32>
    %261 = arith.mulf %256, %260 : vector<64x128xf32>
    %262 = vector.extract_strided_slice %205 {offsets = [0, 96], sizes = [64, 32], strides = [1, 1]} : vector<64x128xf32> to vector<64x32xf32>
    %263 = arith.truncf %262 : vector<64x32xf32> to vector<64x32xbf16>
    %264 = vector.extract_strided_slice %207 {offsets = [0, 96], sizes = [128, 32], strides = [1, 1]} : vector<128x128xbf16> to vector<128x32xbf16>
    %cst_101 = arith.constant dense<0.000000e+00> : vector<64x128xf32>
    %265 = tpu.matmul %263, %264, %cst_101 {dimension_numbers = #tpu.dot_dimension_numbers<[1], [1], [0], [0], [0, 0, 1, 0], [], []>} : vector<64x32xbf16>, vector<128x32xbf16>, vector<64x128xf32> -> vector<64x128xf32>
    %cst_102 = arith.constant -1.000000e+30 : f32
    %266 = vector.shape_cast %6 : vector<1x128xi1> to vector<1x128xi1>
    %267 = vector.broadcast %266 : vector<1x128xi1> to vector<64x128xi1>
    %268 = vector.broadcast %cst_102 : f32 to vector<64x128xf32>
    %269 = arith.select %267, %265, %268 : vector<64x128xi1>, vector<64x128xf32>
    %cst_103 = arith.constant dense<0xFF800000> : vector<64xf32>
    %270 = vector.multi_reduction <maximumf>, %269, %cst_103 [1] : vector<64x128xf32> to vector<64xf32>
    %271 = vector.shape_cast %270 : vector<64xf32> to vector<64x1xf32>
    %272 = vector.broadcast %271 : vector<64x1xf32> to vector<64x128xf32>
    %273 = arith.subf %269, %272 : vector<64x128xf32>
    %274 = math.exp %273 : vector<64x128xf32>
    %cst_104 = arith.constant dense<0.000000e+00> : vector<64xf32>
    %275 = vector.multi_reduction <add>, %274, %cst_104 [1] : vector<64x128xf32> to vector<64xf32>
    %276 = vector.shape_cast %275 : vector<64xf32> to vector<64x1xf32>
    %277 = tpu.reciprocal %276 {approx = true} : vector<64x1xf32> -> vector<64x1xf32>
    %278 = vector.broadcast %277 : vector<64x1xf32> to vector<64x128xf32>
    %279 = arith.mulf %274, %278 : vector<64x128xf32>
    %280 = tpu.concatenate %225, %243, %261, %279 in 1 : vector<64x128xf32>, vector<64x128xf32>, vector<64x128xf32>, vector<64x128xf32> -> vector<64x512xf32>
    %281 = arith.truncf %280 : vector<64x512xf32> to vector<64x512xbf16>
    %c0_105 = arith.constant 0 : index
    %c1_106 = arith.constant 1 : index
    %c0_107 = arith.constant 0 : index
    %c0_108 = arith.constant 0 : index
    %282 = vector.load %arg5[%c0_105, %c1_106, %c0_107, %c0_108] : memref<1x2x512x128xbf16, #tpu.memory_space<vmem>>, vector<1x1x512x128xbf16>
    %283 = vector.shape_cast %282 : vector<1x1x512x128xbf16> to vector<512x128xbf16>
    %cst_109 = arith.constant dense<0.000000e+00> : vector<64x128xf32>
    %284 = tpu.matmul %281, %283, %cst_109 {dimension_numbers = #tpu.dot_dimension_numbers<[1], [0], [0], [1], [0, 0, 1, 1], [], []>} : vector<64x512xbf16>, vector<512x128xbf16>, vector<64x128xf32> -> vector<64x128xf32>
    %285 = arith.addf %171, %284 : vector<64x128xf32>
    %c1_110 = arith.constant 1 : index
    %c0_111 = arith.constant 0 : index
    %c0_112 = arith.constant 0 : index
    %286 = vector.load %arg9[%c1_110, %c0_111, %c0_112] : memref<2x1x128xf32, #tpu.memory_space<vmem>>, vector<1x1x128xf32>
    %287 = vector.shape_cast %286 : vector<1x1x128xf32> to vector<1x128xf32>
    %288 = vector.broadcast %287 : vector<1x128xf32> to vector<64x128xf32>
    %289 = arith.addf %285, %288 : vector<64x128xf32>
    %c1_113 = arith.constant 1 : index
    %c0_114 = arith.constant 0 : index
    %c0_115 = arith.constant 0 : index
    %290 = vector.load %arg10[%c1_113, %c0_114, %c0_115] : memref<2x2x128xf32, #tpu.memory_space<vmem>>, vector<1x2x128xf32>
    %291 = vector.shape_cast %290 : vector<1x2x128xf32> to vector<2x128xf32>
    %292 = vector.extract_strided_slice %291 {offsets = [0, 0], sizes = [1, 128], strides = [1, 1]} : vector<2x128xf32> to vector<1x128xf32>
    %293 = vector.extract_strided_slice %291 {offsets = [1, 0], sizes = [1, 128], strides = [1, 1]} : vector<2x128xf32> to vector<1x128xf32>
    %cst_116 = arith.constant dense<0.000000e+00> : vector<64xf32>
    %294 = vector.multi_reduction <add>, %289, %cst_116 [1] : vector<64x128xf32> to vector<64xf32>
    %295 = vector.shape_cast %294 : vector<64xf32> to vector<64x1xf32>
    %cst_117 = arith.constant 1.280000e+02 : f32
    %296 = vector.broadcast %cst_117 : f32 to vector<64x1xf32>
    %297 = arith.divf %295, %296 : vector<64x1xf32>
    %298 = vector.broadcast %297 : vector<64x1xf32> to vector<64x128xf32>
    %299 = arith.subf %289, %298 : vector<64x128xf32>
    %300 = arith.mulf %299, %299 : vector<64x128xf32>
    %cst_118 = arith.constant dense<0.000000e+00> : vector<64xf32>
    %301 = vector.multi_reduction <add>, %300, %cst_118 [1] : vector<64x128xf32> to vector<64xf32>
    %302 = vector.shape_cast %301 : vector<64xf32> to vector<64x1xf32>
    %cst_119 = arith.constant 1.280000e+02 : f32
    %303 = vector.broadcast %cst_119 : f32 to vector<64x1xf32>
    %304 = arith.divf %302, %303 : vector<64x1xf32>
    %cst_120 = arith.constant 9.99999997E-7 : f32
    %305 = vector.broadcast %cst_120 : f32 to vector<64x1xf32>
    %306 = arith.addf %304, %305 : vector<64x1xf32>
    %307 = math.rsqrt %306 : vector<64x1xf32>
    %308 = vector.broadcast %307 : vector<64x1xf32> to vector<64x128xf32>
    %309 = arith.mulf %299, %308 : vector<64x128xf32>
    %310 = vector.broadcast %292 : vector<1x128xf32> to vector<64x128xf32>
    %311 = arith.mulf %309, %310 : vector<64x128xf32>
    %312 = vector.broadcast %293 : vector<1x128xf32> to vector<64x128xf32>
    %313 = arith.addf %311, %312 : vector<64x128xf32>
    %314 = arith.truncf %313 : vector<64x128xf32> to vector<64x128xbf16>
    %c1_121 = arith.constant 1 : index
    %c0_122 = arith.constant 0 : index
    %c0_123 = arith.constant 0 : index
    %315 = vector.load %arg11[%c1_121, %c0_122, %c0_123] : memref<2x128x256xbf16, #tpu.memory_space<vmem>>, vector<1x128x256xbf16>
    %316 = vector.shape_cast %315 : vector<1x128x256xbf16> to vector<128x256xbf16>
    %cst_124 = arith.constant dense<0.000000e+00> : vector<64x256xf32>
    %317 = tpu.matmul %314, %316, %cst_124 {dimension_numbers = #tpu.dot_dimension_numbers<[1], [0], [0], [1], [0, 0, 1, 1], [], []>} : vector<64x128xbf16>, vector<128x256xbf16>, vector<64x256xf32> -> vector<64x256xf32>
    %c1_125 = arith.constant 1 : index
    %c0_126 = arith.constant 0 : index
    %c0_127 = arith.constant 0 : index
    %318 = vector.load %arg12[%c1_125, %c0_126, %c0_127] : memref<2x1x256xf32, #tpu.memory_space<vmem>>, vector<1x1x256xf32>
    %319 = vector.shape_cast %318 : vector<1x1x256xf32> to vector<1x256xf32>
    %320 = vector.broadcast %319 : vector<1x256xf32> to vector<64x256xf32>
    %321 = arith.addf %317, %320 : vector<64x256xf32>
    %322 = arith.negf %321 : vector<64x256xf32>
    %323 = math.exp %322 : vector<64x256xf32>
    %cst_128 = arith.constant 1.000000e+00 : f32
    %324 = vector.broadcast %cst_128 : f32 to vector<64x256xf32>
    %325 = arith.addf %324, %323 : vector<64x256xf32>
    %326 = arith.divf %324, %325 : vector<64x256xf32>
    %327 = arith.mulf %321, %326 : vector<64x256xf32>
    %328 = arith.truncf %327 : vector<64x256xf32> to vector<64x256xbf16>
    %c1_129 = arith.constant 1 : index
    %c0_130 = arith.constant 0 : index
    %c0_131 = arith.constant 0 : index
    %329 = vector.load %arg13[%c1_129, %c0_130, %c0_131] : memref<2x256x128xbf16, #tpu.memory_space<vmem>>, vector<1x256x128xbf16>
    %330 = vector.shape_cast %329 : vector<1x256x128xbf16> to vector<256x128xbf16>
    %cst_132 = arith.constant dense<0.000000e+00> : vector<64x128xf32>
    %331 = tpu.matmul %328, %330, %cst_132 {dimension_numbers = #tpu.dot_dimension_numbers<[1], [0], [0], [1], [0, 0, 1, 1], [], []>} : vector<64x256xbf16>, vector<256x128xbf16>, vector<64x128xf32> -> vector<64x128xf32>
    %c1_133 = arith.constant 1 : index
    %c0_134 = arith.constant 0 : index
    %c0_135 = arith.constant 0 : index
    %332 = vector.load %arg14[%c1_133, %c0_134, %c0_135] : memref<2x1x128xf32, #tpu.memory_space<vmem>>, vector<1x1x128xf32>
    %333 = vector.shape_cast %332 : vector<1x1x128xf32> to vector<1x128xf32>
    %334 = vector.broadcast %333 : vector<1x128xf32> to vector<64x128xf32>
    %335 = arith.addf %331, %334 : vector<64x128xf32>
    %336 = arith.addf %289, %335 : vector<64x128xf32>
    %c0_136 = arith.constant 0 : index
    %c0_137 = arith.constant 0 : index
    %337 = vector.load %arg15[%c0_136, %c0_137] : memref<2x128xf32, #tpu.memory_space<vmem>>, vector<2x128xf32>
    %338 = vector.extract_strided_slice %337 {offsets = [0, 0], sizes = [1, 128], strides = [1, 1]} : vector<2x128xf32> to vector<1x128xf32>
    %339 = vector.extract_strided_slice %337 {offsets = [1, 0], sizes = [1, 128], strides = [1, 1]} : vector<2x128xf32> to vector<1x128xf32>
    %cst_138 = arith.constant dense<0.000000e+00> : vector<64xf32>
    %340 = vector.multi_reduction <add>, %336, %cst_138 [1] : vector<64x128xf32> to vector<64xf32>
    %341 = vector.shape_cast %340 : vector<64xf32> to vector<64x1xf32>
    %cst_139 = arith.constant 1.280000e+02 : f32
    %342 = vector.broadcast %cst_139 : f32 to vector<64x1xf32>
    %343 = arith.divf %341, %342 : vector<64x1xf32>
    %344 = vector.broadcast %343 : vector<64x1xf32> to vector<64x128xf32>
    %345 = arith.subf %336, %344 : vector<64x128xf32>
    %346 = arith.mulf %345, %345 : vector<64x128xf32>
    %cst_140 = arith.constant dense<0.000000e+00> : vector<64xf32>
    %347 = vector.multi_reduction <add>, %346, %cst_140 [1] : vector<64x128xf32> to vector<64xf32>
    %348 = vector.shape_cast %347 : vector<64xf32> to vector<64x1xf32>
    %cst_141 = arith.constant 1.280000e+02 : f32
    %349 = vector.broadcast %cst_141 : f32 to vector<64x1xf32>
    %350 = arith.divf %348, %349 : vector<64x1xf32>
    %cst_142 = arith.constant 9.99999997E-7 : f32
    %351 = vector.broadcast %cst_142 : f32 to vector<64x1xf32>
    %352 = arith.addf %350, %351 : vector<64x1xf32>
    %353 = math.rsqrt %352 : vector<64x1xf32>
    %354 = vector.broadcast %353 : vector<64x1xf32> to vector<64x128xf32>
    %355 = arith.mulf %345, %354 : vector<64x128xf32>
    %356 = vector.broadcast %338 : vector<1x128xf32> to vector<64x128xf32>
    %357 = arith.mulf %355, %356 : vector<64x128xf32>
    %358 = vector.broadcast %339 : vector<1x128xf32> to vector<64x128xf32>
    %359 = arith.addf %357, %358 : vector<64x128xf32>
    %360 = arith.truncf %359 : vector<64x128xf32> to vector<64x128xbf16>
    %c0_143 = arith.constant 0 : index
    %c0_144 = arith.constant 0 : index
    %361 = vector.load %arg16[%c0_143, %c0_144] : memref<128x128xbf16, #tpu.memory_space<vmem>>, vector<128x128xbf16>
    %cst_145 = arith.constant dense<0.000000e+00> : vector<64x128xf32>
    %362 = tpu.matmul %360, %361, %cst_145 {dimension_numbers = #tpu.dot_dimension_numbers<[1], [0], [0], [1], [0, 0, 1, 1], [], []>} : vector<64x128xbf16>, vector<128x128xbf16>, vector<64x128xf32> -> vector<64x128xf32>
    %c0_146 = arith.constant 0 : index
    %c0_147 = arith.constant 0 : index
    %363 = vector.load %arg17[%c0_146, %c0_147] : memref<1x128xf32, #tpu.memory_space<vmem>>, vector<1x128xf32>
    %364 = vector.broadcast %363 : vector<1x128xf32> to vector<64x128xf32>
    %365 = arith.addf %362, %364 : vector<64x128xf32>
    %c0_148 = arith.constant 0 : index
    %c0_149 = arith.constant 0 : index
    %366 = vector.load %arg18[%c0_148, %c0_149] : memref<2x128xf32, #tpu.memory_space<vmem>>, vector<2x128xf32>
    %367 = vector.extract_strided_slice %366 {offsets = [0, 0], sizes = [1, 128], strides = [1, 1]} : vector<2x128xf32> to vector<1x128xf32>
    %368 = vector.extract_strided_slice %366 {offsets = [1, 0], sizes = [1, 128], strides = [1, 1]} : vector<2x128xf32> to vector<1x128xf32>
    %cst_150 = arith.constant dense<0.000000e+00> : vector<64xf32>
    %369 = vector.multi_reduction <add>, %365, %cst_150 [1] : vector<64x128xf32> to vector<64xf32>
    %370 = vector.shape_cast %369 : vector<64xf32> to vector<64x1xf32>
    %cst_151 = arith.constant 1.280000e+02 : f32
    %371 = vector.broadcast %cst_151 : f32 to vector<64x1xf32>
    %372 = arith.divf %370, %371 : vector<64x1xf32>
    %373 = vector.broadcast %372 : vector<64x1xf32> to vector<64x128xf32>
    %374 = arith.subf %365, %373 : vector<64x128xf32>
    %375 = arith.mulf %374, %374 : vector<64x128xf32>
    %cst_152 = arith.constant dense<0.000000e+00> : vector<64xf32>
    %376 = vector.multi_reduction <add>, %375, %cst_152 [1] : vector<64x128xf32> to vector<64xf32>
    %377 = vector.shape_cast %376 : vector<64xf32> to vector<64x1xf32>
    %cst_153 = arith.constant 1.280000e+02 : f32
    %378 = vector.broadcast %cst_153 : f32 to vector<64x1xf32>
    %379 = arith.divf %377, %378 : vector<64x1xf32>
    %cst_154 = arith.constant 9.99999997E-7 : f32
    %380 = vector.broadcast %cst_154 : f32 to vector<64x1xf32>
    %381 = arith.addf %379, %380 : vector<64x1xf32>
    %382 = math.rsqrt %381 : vector<64x1xf32>
    %383 = vector.broadcast %382 : vector<64x1xf32> to vector<64x128xf32>
    %384 = arith.mulf %374, %383 : vector<64x128xf32>
    %385 = vector.broadcast %367 : vector<1x128xf32> to vector<64x128xf32>
    %386 = arith.mulf %384, %385 : vector<64x128xf32>
    %387 = vector.broadcast %368 : vector<1x128xf32> to vector<64x128xf32>
    %388 = arith.addf %386, %387 : vector<64x128xf32>
    %c0_155 = arith.constant 0 : index
    %c0_156 = arith.constant 0 : index
    %389 = vector.load %arg19[%c0_155, %c0_156] : memref<1x128xbf16, #tpu.memory_space<vmem>>, vector<1x128xbf16>
    %390 = arith.truncf %388 : vector<64x128xf32> to vector<64x128xbf16>
    %cst_157 = arith.constant dense<0.000000e+00> : vector<1x64xf32>
    %391 = tpu.matmul %389, %390, %cst_157 {dimension_numbers = #tpu.dot_dimension_numbers<[1], [1], [0], [0], [0, 0, 1, 0], [], []>} : vector<1x128xbf16>, vector<64x128xbf16>, vector<1x64xf32> -> vector<1x64xf32>
    %c0_158 = arith.constant 0 : index
    %c0_159 = arith.constant 0 : index
    %392 = vector.load %arg20[%c0_158, %c0_159] : memref<1x1xf32, #tpu.memory_space<vmem>>, vector<1x1xf32>
    %393 = vector.broadcast %392 : vector<1x1xf32> to vector<1x64xf32>
    %394 = arith.addf %391, %393 : vector<1x64xf32>
    %c0_160 = arith.constant 0 : index
    %c0_161 = arith.constant 0 : index
    %c0_162 = arith.constant 0 : index
    %395 = vector.load %arg21[%c0_160, %c0_161, %c0_162] : memref<1x1x64xf32, #tpu.memory_space<vmem>>, vector<1x1x64xf32>
    %396 = vector.shape_cast %395 : vector<1x1x64xf32> to vector<1x64xf32>
    %397 = vector.shape_cast %394 : vector<1x64xf32> to vector<1x1x64xf32>
    tpu.vector_store %arg21[%c0_160, %c0_161, %c0_162], %397 {strides = array<i32>} : memref<1x1x64xf32, #tpu.memory_space<vmem>>, vector<1x1x64xf32>,
    return
  }
  func.func @transform_0(%arg0: i32, %arg1: i32) -> (i32, i32, i32) {
    %c0_i32 = arith.constant 0 : i32
    %c0_i32_0 = arith.constant 0 : i32
    return %arg0, %arg1, %c0_i32 : i32, i32, i32
  }
  func.func @transform_1(%arg0: i32, %arg1: i32) -> (i32, i32) {
    %c0_i32 = arith.constant 0 : i32
    %c0_i32_0 = arith.constant 0 : i32
    return %arg1, %c0_i32 : i32, i32
  }
  func.func @transform_2(%arg0: i32, %arg1: i32) -> (i32, i32, i32, i32) {
    %c0_i32 = arith.constant 0 : i32
    %c0_i32_0 = arith.constant 0 : i32
    %c0_i32_1 = arith.constant 0 : i32
    %c0_i32_2 = arith.constant 0 : i32
    return %arg0, %c0_i32, %c0_i32_0, %c0_i32_1 : i32, i32, i32, i32
  }
  func.func @transform_3(%arg0: i32, %arg1: i32) -> (i32, i32, i32, i32) {
    %c0_i32 = arith.constant 0 : i32
    %c0_i32_0 = arith.constant 0 : i32
    %c0_i32_1 = arith.constant 0 : i32
    %c0_i32_2 = arith.constant 0 : i32
    return %arg0, %c0_i32, %c0_i32_0, %c0_i32_1 : i32, i32, i32, i32
  }
  func.func @transform_4(%arg0: i32, %arg1: i32) -> (i32, i32, i32) {
    %c0_i32 = arith.constant 0 : i32
    %c0_i32_0 = arith.constant 0 : i32
    %c0_i32_1 = arith.constant 0 : i32
    %c0_i32_2 = arith.constant 0 : i32
    return %c0_i32, %c0_i32_0, %c0_i32_1 : i32, i32, i32
  }
  func.func @transform_5(%arg0: i32, %arg1: i32) -> (i32, i32, i32) {
    %c0_i32 = arith.constant 0 : i32
    %c0_i32_0 = arith.constant 0 : i32
    %c0_i32_1 = arith.constant 0 : i32
    %c0_i32_2 = arith.constant 0 : i32
    return %c0_i32, %c0_i32_0, %c0_i32_1 : i32, i32, i32
  }
  func.func @transform_6(%arg0: i32, %arg1: i32) -> (i32, i32, i32) {
    %c0_i32 = arith.constant 0 : i32
    %c0_i32_0 = arith.constant 0 : i32
    %c0_i32_1 = arith.constant 0 : i32
    %c0_i32_2 = arith.constant 0 : i32
    return %c0_i32, %c0_i32_0, %c0_i32_1 : i32, i32, i32
  }
  func.func @transform_7(%arg0: i32, %arg1: i32) -> (i32, i32, i32) {
    %c0_i32 = arith.constant 0 : i32
    %c0_i32_0 = arith.constant 0 : i32
    %c0_i32_1 = arith.constant 0 : i32
    %c0_i32_2 = arith.constant 0 : i32
    return %c0_i32, %c0_i32_0, %c0_i32_1 : i32, i32, i32
  }
  func.func @transform_8(%arg0: i32, %arg1: i32) -> (i32, i32, i32) {
    %c0_i32 = arith.constant 0 : i32
    %c0_i32_0 = arith.constant 0 : i32
    %c0_i32_1 = arith.constant 0 : i32
    %c0_i32_2 = arith.constant 0 : i32
    return %c0_i32, %c0_i32_0, %c0_i32_1 : i32, i32, i32
  }
  func.func @transform_9(%arg0: i32, %arg1: i32) -> (i32, i32, i32) {
    %c0_i32 = arith.constant 0 : i32
    %c0_i32_0 = arith.constant 0 : i32
    %c0_i32_1 = arith.constant 0 : i32
    %c0_i32_2 = arith.constant 0 : i32
    return %c0_i32, %c0_i32_0, %c0_i32_1 : i32, i32, i32
  }
  func.func @transform_10(%arg0: i32, %arg1: i32) -> (i32, i32, i32) {
    %c0_i32 = arith.constant 0 : i32
    %c0_i32_0 = arith.constant 0 : i32
    %c0_i32_1 = arith.constant 0 : i32
    %c0_i32_2 = arith.constant 0 : i32
    return %c0_i32, %c0_i32_0, %c0_i32_1 : i32, i32, i32
  }
  func.func @transform_11(%arg0: i32, %arg1: i32) -> (i32, i32, i32) {
    %c0_i32 = arith.constant 0 : i32
    %c0_i32_0 = arith.constant 0 : i32
    %c0_i32_1 = arith.constant 0 : i32
    %c0_i32_2 = arith.constant 0 : i32
    return %c0_i32, %c0_i32_0, %c0_i32_1 : i32, i32, i32
  }
  func.func @transform_12(%arg0: i32, %arg1: i32) -> (i32, i32, i32) {
    %c0_i32 = arith.constant 0 : i32
    %c0_i32_0 = arith.constant 0 : i32
    %c0_i32_1 = arith.constant 0 : i32
    %c0_i32_2 = arith.constant 0 : i32
    return %c0_i32, %c0_i32_0, %c0_i32_1 : i32, i32, i32
  }
  func.func @transform_13(%arg0: i32, %arg1: i32) -> (i32, i32) {
    %c0_i32 = arith.constant 0 : i32
    %c0_i32_0 = arith.constant 0 : i32
    %c0_i32_1 = arith.constant 0 : i32
    return %c0_i32, %c0_i32_0 : i32, i32
  }
  func.func @transform_14(%arg0: i32, %arg1: i32) -> (i32, i32) {
    %c0_i32 = arith.constant 0 : i32
    %c0_i32_0 = arith.constant 0 : i32
    %c0_i32_1 = arith.constant 0 : i32
    return %c0_i32, %c0_i32_0 : i32, i32
  }
  func.func @transform_15(%arg0: i32, %arg1: i32) -> (i32, i32) {
    %c0_i32 = arith.constant 0 : i32
    %c0_i32_0 = arith.constant 0 : i32
    %c0_i32_1 = arith.constant 0 : i32
    return %c0_i32, %c0_i32_0 : i32, i32
  }
  func.func @transform_16(%arg0: i32, %arg1: i32) -> (i32, i32) {
    %c0_i32 = arith.constant 0 : i32
    %c0_i32_0 = arith.constant 0 : i32
    %c0_i32_1 = arith.constant 0 : i32
    return %c0_i32, %c0_i32_0 : i32, i32
  }
  func.func @transform_17(%arg0: i32, %arg1: i32) -> (i32, i32) {
    %c0_i32 = arith.constant 0 : i32
    %c0_i32_0 = arith.constant 0 : i32
    %c0_i32_1 = arith.constant 0 : i32
    return %c0_i32, %c0_i32_0 : i32, i32
  }
  func.func @transform_18(%arg0: i32, %arg1: i32) -> (i32, i32) {
    %c0_i32 = arith.constant 0 : i32
    %c0_i32_0 = arith.constant 0 : i32
    %c0_i32_1 = arith.constant 0 : i32
    return %c0_i32, %c0_i32_0 : i32, i32
  }
  func.func @transform_19(%arg0: i32, %arg1: i32) -> (i32, i32, i32) {
    %c0_i32 = arith.constant 0 : i32
    %c0_i32_0 = arith.constant 0 : i32
    return %arg0, %c0_i32, %arg1 : i32, i32, i32
  }
}

</mosaic_0001>

<bundles_post_ra>
// kernel: isd_head_forward.1
= control target key start
LH: loop header
LB: loop body
LE: loop exit
PB: predicated region body
PF: predicated region fallthrough
CT: control target
= control target key end

     0   :  { %s7571_s20 = smov 0   ;;  %s7573_s21 = smov 0   ;;  %s9612_s0 = inlined_call_operand.vmem [shape: f32[2,64,128], index: 0, kind: input, shape index: {}]   ;;  %s9613_s1 = inlined_call_operand.vmem [shape: f32[64,128], index: 1, kind: input, shape index: {}]   ;;  %s9614_s2 = inlined_call_operand.vmem [shape: bf16[2,2,128,128], index: 2, kind: input, shape index: {}]   ;;  %s9615_s3 = inlined_call_operand.vmem [shape: bf16[2,2,512,128], index: 3, kind: input, shape index: {}]   ;;  %s9616_s4 = inlined_call_operand.vmem [shape: f32[2,2,128], index: 4, kind: input, shape index: {}]   ;;  %s9617_s5 = inlined_call_operand.vmem [shape: bf16[2,128,128], index: 5, kind: input, shape index: {}]   ;;  %s9618_s6 = inlined_call_operand.vmem [shape: f32[2,1,128], index: 6, kind: input, shape index: {}]   ;;  %s9619_s7 = inlined_call_operand.vmem [shape: f32[2,1,128], index: 7, kind: input, shape index: {}]   ;;  %s9620_s8 = inlined_call_operand.vmem [shape: f32[2,2,128], index: 8, kind: input, shape index: {}]   ;;  %s9621_s9 = inlined_call_operand.vmem [shape: bf16[2,128,256], index: 9, kind: input, shape index: {}]   ;;  %s9622_s10 = inlined_call_operand.vmem [shape: f32[2,1,256], index: 10, kind: input, shape index: {}]   ;;  %s9623_s11 = inlined_call_operand.vmem [shape: bf16[2,256,128], index: 11, kind: input, shape index: {}]   ;;  %s9624_s12 = inlined_call_operand.vmem [shape: f32[2,1,128], index: 12, kind: input, shape index: {}]   ;;  %s9625_s13 = inlined_call_operand.vmem [shape: f32[2,128], index: 13, kind: input, shape index: {}]   ;;  %s9626_s14 = inlined_call_operand.vmem [shape: bf16[128,128], index: 14, kind: input, shape index: {}]   ;;  %s9627_s15 = inlined_call_operand.vmem [shape: f32[1,128], index: 15, kind: input, shape index: {}]   ;;  %s9628_s16 = inlined_call_operand.vmem [shape: f32[2,128], index: 16, kind: input, shape index: {}]   ;;  %s9629_s17 = inlined_call_operand.vmem [shape: bf16[1,128], index: 17, kind: input, shape index: {}]   ;;  %s9630_s18 = inlined_call_operand.<no memory space> [shape: f32[1,1], index: 18, kind: input, shape index: {}]   ;;  %s9631_s19 = inlined_call_operand.vmem [shape: f32[2,1,64], index: 19, kind: output, shape index: {}]  }
   0x1   :  { %9641 = sst [smem:[#allocation4_spill]] %s9612_s0  ;;  %v24_v0 = vstv %s9630_s18 }
   0x2   :  { %9642 = sst [smem:[#allocation5_spill]] %s9613_s1  ;;  %25 = vst [vmem:[#allocation2] sm:$0x1] %v24_v0  ;;  %s7575_s1 = smov 0  }
   0x3   :  { %9643 = sst [smem:[#allocation6_spill]] %s9614_s2 }
   0x4   :  { %9644 = sst [smem:[#allocation7_spill]] %s9615_s3 }
   0x5 LB: > { %s43_s18 = sadd.s32 1, %s7456_s21  ;;  %p5625_p0 = scmp.ge.s32.totalorder %s7460_s1, 1  ;;  %s7460_s1 = sphi %s7575_s1, %s31_s1   ;;  %s7456_s21 = sphi %s7573_s21, %s9656_s21   ;;  %s7452_s20 = sphi %s7571_s20, %s9655_s20  }
   0x6   : > { %p45_p1 = scmp.ge.s32.totalorder %s43_s18, 2  ;;  %p591_p2 = scmp.lt.s32.totalorder %s7460_s1, 3 }
   0x8   : > { %s9658_s18 = smov (%p45_p1, %s43_s18), 0  ;;  %p592_p3 = pnand %p5625_p0, %p591_p2 }
   0x9   : > { %9645 = sst [smem:[#allocation3_spill]] %s9658_s18  ;;  %p668_p4 = scmp.lt.s32.totalorder (!%p592_p3), %s7452_s20, 1  ;;  %v6774_v25 = vld [vmem:[%s9617_s5] sm:$0xff] (!%p592_p3)   ;;  %v6775_v58 = vld [vmem:[%s9617_s5 + $0x8] sm:$0xff] (!%p592_p3)   ;;  %v6776_v59 = vld [vmem:[%s9617_s5 + $0x10] sm:$0xff] (!%p592_p3)   ;;  %vm1049_vm0 = vcmask (!%p592_p3), 261120  }
   0xa   : > { %595 = sbr.rel (%p592_p3) target bundleno = 5665 (0x1621), region = 96  ;;  %s9646_s23 = sld [smem:[#allocation5_spill]] (!%p592_p3)  ;;  %6403 = vmatprep.subr.bf16.mxu0 (!%p592_p3), %v6774_v25  ;;  %v6777_v60 = vld [vmem:[%s9617_s5 + $0x18] sm:$0xff] (!%p592_p3)   ;;  %v6778_v61 = vld [vmem:[%s9617_s5 + $0x20] sm:$0xff] (!%p592_p3)   ;;  %v6779_v62 = vld [vmem:[%s9617_s5 + $0x28] sm:$0xff] (!%p592_p3)   ;;  %vm7467_vm2 = vmmov (!%p592_p3), 0  }
   0xb   : > { %s9647_s22 = sld [smem:[#allocation4_spill]] (!%p592_p3)  ;;  %s9648_s0 = sld [smem:[#allocation6_spill]] (!%p592_p3)  ;;  %6404 = vmatpush3.bf16.msra.mxu0 (!%p592_p3), %v6774_v25  ;;  %v6780_v63 = vld [vmem:[%s9617_s5 + $0x30] sm:$0xff] (!%p592_p3)   ;;  %v6781_v0 = vld [vmem:[%s9617_s5 + $0x38] sm:$0xff] (!%p592_p3)   ;;  %vm5507_vm3 = vcmask (!%p592_p3), 516096  }
   0xc   : > { %6405 = vmatprep.subr.bf16.mxu0 (!%p592_p3), %v6775_v58  ;;  %s9637_s27 = smov (!%p592_p3), 96   ;;  %s9633_s28 = smov (!%p592_p3), 64  }
   0xd   : > { %s9651_s25 = smov (!%p592_p3), 32  }
   0xf   : > { %6406 = vmatpush3.bf16.msra.mxu0 (!%p592_p3), %v6775_v58 }
  0x10   : > { %v708_v1 = vld [vmem:[%s9646_s23] sm:$0xff] (!%p592_p3)  ;;  %v710_v2 = vld [vmem:[%s9646_s23 + $0x10] sm:$0xff] (!%p592_p3)  ;;  %v709_v3 = vld [vmem:[%s9646_s23 + $0x8] sm:$0xff] (!%p592_p3)  ;;  %6407 = vmatprep.subr.bf16.mxu0 (!%p592_p3), %v6776_v59 }
  0x11   : > { %s9660_s20 = smov (!%p668_p4, %s7452_s20), 1  ;;  %v711_v4 = vld [vmem:[%s9646_s23 + $0x18] sm:$0xff]  ;;  %v712_v12 = vld [vmem:[%s9646_s23 + $0x20] sm:$0xff]  ;;  %v713_v14 = vld [vmem:[%s9646_s23 + $0x28] sm:$0xff] }
  0x12   : > { %s6023_s3 = sshll.u32 %s9660_s20, 6  ;;  %s6024_s18 = sshll.u32 %s9660_s20, 7  ;;  %v714_v18 = vld [vmem:[%s9646_s23 + $0x30] sm:$0xff]  ;;  %v715_v20 = vld [vmem:[%s9646_s23 + $0x38] sm:$0xff] }
  0x13   : > { %s675_s2 = scalar_lea.vmem %s9647_s22, %s6023_s3  ;;  %s6025_s24 = sshll.u32 %s9660_s20, 9  ;;  %6408 = vmatpush3.bf16.msra.mxu0 %v6776_v59 }
  0x14   : > { %v700_v5 = vld [vmem:[%s675_s2] sm:$0xff]  ;;  %v702_v6 = vld [vmem:[%s675_s2 + $0x10] sm:$0xff]  ;;  %v701_v7 = vld [vmem:[%s675_s2 + $0x8] sm:$0xff]  ;;  %s7628_s30 = scalar_lea.vmem %s9648_s0, %s6024_s18  ;;  %s9649_s3 = sld [smem:[#allocation7_spill]]  ;;  %6409 = vmatprep.subr.bf16.mxu0 %v6777_v60 }
  0x15   : > { %v7608_v8 = vadd.f32 %v708_v1, %v700_v5  ;;  %v7610_v9 = vadd.f32 %v710_v2, %v702_v6  ;;  %v703_v10 = vld [vmem:[%s675_s2 + $0x18] sm:$0xff]  ;;  %v704_v11 = vld [vmem:[%s675_s2 + $0x20] sm:$0xff]  ;;  %v705_v13 = vld [vmem:[%s675_s2 + $0x28] sm:$0xff]  ;;  %v7621_v15 = vadd.f32 %v709_v3, %v701_v7  ;;  %s9635_s18 = smov 32   ;;  %s9650_s22 = smov 96  }
  0x16   : > { %v7623_v16 = vadd.f32 %v711_v4, %v703_v10  ;;  %v706_v17 = vld [vmem:[%s675_s2 + $0x30] sm:$0xff]  ;;  %v707_v19 = vld [vmem:[%s675_s2 + $0x38] sm:$0xff]  ;;  %v7638_v21 = vadd.f32 %v712_v12, %v704_v11  ;;  %v7640_v22 = vadd.f32 %v713_v14, %v705_v13  ;;  %v7720_v1 = vld [vmem:[%s7628_s30 + $0x8] sm:$0xff]  }
  0x17   : > { %728 = vadd.xlane.f32.xlu0 %v7608_v8  ;;  %732 = vadd.xlane.f32.xlu1 %v7610_v9  ;;  %v7649_v23 = vadd.f32 %v714_v18, %v706_v17  ;;  %v7651_v24 = vadd.f32 %v715_v20, %v707_v19  ;;  %v6784_v2 = vld [vmem:[%s7628_s30] sm:$0xff]   ;;  %v7726_v3 = vld [vmem:[%s7628_s30 + $0x10] sm:$0xff]   ;;  %v7739_v6 = vld [vmem:[%s7628_s30 + $0x18] sm:$0xff]   ;;  %v1066_v10 = vsel %vm1049_vm0, %v7720_v1, 0 }
  0x18   : > { %6410 = vmatpush3.bf16.msra.mxu0 %v6777_v60  ;;  %v1063_v4 = vsel %vm1049_vm0, %v6784_v2, 0  ;;  %v7731_v5 = vld [vmem:[%s7628_s30 + $0x20] sm:$0xff]   ;;  %6679 = vmatprep.subr.msk.bf16.mxu1 %vm1049_vm0, %v6784_v2  ;;  %v7744_v7 = vld [vmem:[%s7628_s30 + $0x30] sm:$0xff]   ;;  %v7751_v11 = vld [vmem:[%s7628_s30 + $0x28] sm:$0xff]   ;;  %v1069_v13 = vsel %vm1049_vm0, %v7726_v3, 0  ;;  %v1072_v14 = vsel %vm1049_vm0, %v7739_v6, 0 }
  0x19   : > { %6411 = vmatprep.subr.bf16.mxu0 %v6778_v61  ;;  %6428 = vmatpush3.bf16.xpose.msra.mxu1 %v1063_v4  ;;  %v7760_v12 = vld [vmem:[%s7628_s30 + $0x38] sm:$0xff]   ;;  %v1075_v17 = vsel %vm1049_vm0, %v7731_v5, 0  ;;  %v1078_v18 = vsel %vm1049_vm0, %v7751_v11, 0  ;;  %v1081_v19 = vsel %vm1049_vm0, %v7744_v7, 0 }
  0x1a   : > { %s7645_s29 = scalar_lea.vmem %s9649_s3, %s6025_s24  ;;  %6680 = vmatprep.subr.msk.bf16.mxu1 %vm1049_vm0, %v7720_v1  ;;  %s698_s24 = scalar_lea.vmem %s9631_s19, %s9660_s20 }
  0x1b   : > { %730 = vadd.xlane.f32.xlu0 %v7621_v15  ;;  %734 = vadd.xlane.f32.xlu1 %v7623_v16 }
  0x1c   : > { %6412 = vmatpush3.bf16.msra.mxu0 %v6778_v61 }
  0x1d   : > { %6413 = vmatprep.subr.bf16.mxu0 %v6779_v62 }
  0x1f   : > { %736 = vadd.xlane.f32.xlu0 %v7638_v21  ;;  %738 = vadd.xlane.f32.xlu1 %v7640_v22 }
  0x20   : > { %6414 = vmatpush3.bf16.msra.mxu0 %v6779_v62 }
  0x21   : > { %6415 = vmatprep.subr.bf16.mxu0 %v6780_v63  ;;  %6430 = vmatpush3.bf16.xpose.msra.mxu1 %v1066_v10 }
  0x22   : > { %6681 = vmatprep.subr.msk.bf16.mxu1 %vm1049_vm0, %v7726_v3 }
  0x23   : > { %740 = vadd.xlane.f32.xlu0 %v7649_v23  ;;  %742 = vadd.xlane.f32.xlu1 %v7651_v24 }
  0x24   : > { %6416 = vmatpush3.bf16.msra.mxu0 %v6780_v63 }
  0x25   : > { %6417 = vmatprep.subr.bf16.mxu0 %v6781_v0 }
  0x28   : > { %6418 = vmatpush3.bf16.msra.mxu0 %v6781_v0 }
  0x29   : > { %6432 = vmatpush3.bf16.xpose.msra.mxu1 %v1069_v13 }
  0x2a   : > { %6682 = vmatprep.subr.msk.bf16.mxu1 %vm1049_vm0, %v7739_v6 }
  0x31   : > { %6434 = vmatpush3.bf16.xpose.msra.mxu1 %v1072_v14 }
  0x32   : > { %6683 = vmatprep.subr.msk.bf16.mxu1 %vm1049_vm0, %v7731_v5 }
  0x39   : > { %6436 = vmatpush3.bf16.xpose.msra.mxu1 %v1075_v17 }
  0x3a   : > { %6684 = vmatprep.subr.msk.bf16.mxu1 %vm1049_vm0, %v7751_v11 }
  0x41   : > { %6438 = vmatpush3.bf16.xpose.msra.mxu1 %v1078_v18 }
  0x42   : > { %6685 = vmatprep.subr.msk.bf16.mxu1 %vm1049_vm0, %v7744_v7 }
  0x49   : > { %6440 = vmatpush3.bf16.xpose.msra.mxu1 %v1081_v19 }
  0x4a   : > { %6686 = vmatprep.subr.msk.bf16.mxu1 %vm1049_vm0, %v7760_v12 }
  0xa4   : > { %v729_v26 = vpop.xlane.xlu0 %728  ;;  %v733_v27 = vpop.xlane.xlu1 %732 }
  0xa5   : > { %v745_v28 = vmul.f32 0.0078125, %v729_v26  ;;  %v747_v29 = vmul.f32 0.0078125, %v733_v27 }
  0xa7   : > { %v7659_v30 = vsub.f32 %v7608_v8, %v745_v28  ;;  %v7662_v31 = vsub.f32 %v7610_v9, %v747_v29  ;;  %v724_v29 = vlaneseq }
  0xa8   : > { %v731_v32 = vpop.xlane.xlu0 %730  ;;  %v735_v33 = vpop.xlane.xlu1 %734 }
  0xa9   : > { %v746_v34 = vmul.f32 0.0078125, %v731_v32  ;;  %v761_v35 = vmul.f32 %v7659_v30, %v7659_v30  ;;  %v748_v36 = vmul.f32 0.0078125, %v735_v33  ;;  %v763_v37 = vmul.f32 %v7662_v31, %v7662_v31 }
  0xab   : > { %769 = vadd.xlane.f32.xlu0 %v761_v35  ;;  %v7669_v38 = vsub.f32 %v7621_v15, %v746_v34  ;;  %v7672_v39 = vsub.f32 %v7623_v16, %v748_v36 }
  0xac   : > { %v737_v40 = vpop.xlane.xlu0 %736  ;;  %v739_v41 = vpop.xlane.xlu1 %738 }
  0xad   : > { %v749_v42 = vmul.f32 0.0078125, %v737_v40  ;;  %v762_v43 = vmul.f32 %v7669_v38, %v7669_v38  ;;  %v750_v44 = vmul.f32 0.0078125, %v739_v41  ;;  %v764_v45 = vmul.f32 %v7672_v39, %v7672_v39 }
  0xae   : > { %v818_v40 = vshrl.u32 %v724_v29, 7 }
  0xaf   : > { %773 = vadd.xlane.f32.xlu0 %v763_v37  ;;  %771 = vadd.xlane.f32.xlu1 %v762_v43  ;;  %v7679_v46 = vsub.f32 %v7638_v21, %v749_v42  ;;  %v7682_v47 = vsub.f32 %v7640_v22, %v750_v44 }
  0xb0   : > { %v741_v48 = vpop.xlane.xlu0 %740  ;;  %v743_v49 = vpop.xlane.xlu1 %742  ;;  %v7806_v61 = vsub.s32 1, %v818_v40 }
  0xb1   : > { %v751_v50 = vmul.f32 0.0078125, %v741_v48  ;;  %v765_v51 = vmul.f32 %v7679_v46, %v7679_v46  ;;  %v752_v52 = vmul.f32 0.0078125, %v743_v49  ;;  %v766_v53 = vmul.f32 %v7682_v47, %v7682_v47 }
  0xb2   : > { %v7799_v49 = vsub.s32 0, %v818_v40 }
  0xb3   : > { %775 = vadd.xlane.f32.xlu1 %v764_v45  ;;  %777 = vadd.xlane.f32.xlu0 %v765_v51  ;;  %v7689_v54 = vsub.f32 %v7649_v23, %v751_v50  ;;  %v7692_v55 = vsub.f32 %v7651_v24, %v752_v52  ;;  %v727_v52 = vld [vmem:[%s9616_s4] sm:$0x3] }
  0xb4   : > { %v820_v60 = vrot.slane %v727_v52, %v7799_v49  ;;  %v832_v13 = vrot.slane %v727_v52, %v7806_v61 }
  0xb5   : > { %v767_v56 = vmul.f32 %v7689_v54, %v7689_v54  ;;  %v768_v57 = vmul.f32 %v7692_v55, %v7692_v55 }
  0xb7   : > { %779 = vadd.xlane.f32.xlu1 %v766_v53  ;;  %781 = vadd.xlane.f32.xlu0 %v767_v56 }
  0xbb   : > { %783 = vadd.xlane.f32.xlu1 %v768_v57 }
  0xcc   : > { %1247 = vrot.lane.b32.xlu1 %v7720_v1, %s9637_s27 }
  0xcd   : > { %1245 = vrot.lane.b32.xlu0 %v6784_v2, %s9637_s27 }
  0xd0   : > { %1249 = vrot.lane.b32.xlu1 %v7726_v3, %s9637_s27 }
  0xd1   : > { %1253 = vrot.lane.b32.xlu0 %v7731_v5, %s9637_s27 }
  0xd4   : > { %1251 = vrot.lane.b32.xlu1 %v7739_v6, %s9637_s27 }
  0xd5   : > { %1257 = vrot.lane.b32.xlu0 %v7744_v7, %s9637_s27 }
  0xd8   : > { %1255 = vrot.lane.b32.xlu1 %v7751_v11, %s9637_s27 }
  0xdc   : > { %1259 = vrot.lane.b32.xlu1 %v7760_v12, %s9637_s27 }
  0xe0   : > { %1655 = vrot.lane.b32.xlu1 %v6784_v2, %s9635_s18 }
  0xe4   : > { %1450 = vrot.lane.b32.xlu1 %v6784_v2, %s9633_s28 }
  0xe8   : > { %1452 = vrot.lane.b32.xlu1 %v7720_v1, %s9633_s28 }
  0xec   : > { %1454 = vrot.lane.b32.xlu1 %v7726_v3, %s9633_s28 }
  0xf0   : > { %1456 = vrot.lane.b32.xlu1 %v7739_v6, %s9633_s28 }
  0xf4   : > { %1458 = vrot.lane.b32.xlu1 %v7731_v5, %s9633_s28 }
  0xf8   : > { %1460 = vrot.lane.b32.xlu1 %v7751_v11, %s9633_s28 }
  0xfc   : > { %1462 = vrot.lane.b32.xlu1 %v7744_v7, %s9633_s28 }
 0x138   : > { %v770_v20 = vpop.xlane.xlu0 %769 }
 0x139   : > { %v785_v25 = vmul.f32 0.0078125, %v770_v20 }
 0x13b   : > { %v793_v26 = vadd.f32 1e-06, %v785_v25 }
 0x13c   : > { %v772_v27 = vpop.xlane.xlu1 %771  ;;  %v774_v28 = vpop.xlane.xlu0 %773 }
 0x13d   : > { %6958 = vrsqrt.f32 %v793_v26  ;;  %v786_v32 = vmul.f32 0.0078125, %v772_v27  ;;  %v787_v33 = vmul.f32 0.0078125, %v774_v28 }
 0x13f   : > { %v794_v34 = vadd.f32 1e-06, %v786_v32  ;;  %v795_v35 = vadd.f32 1e-06, %v787_v33 }
 0x140   : > { %v776_v36 = vpop.xlane.xlu1 %775  ;;  %v778_v37 = vpop.xlane.xlu0 %777 }
 0x141   : > { %6960 = vrsqrt.f32 %v794_v34  ;;  %v788_v41 = vmul.f32 0.0078125, %v776_v36  ;;  %v789_v42 = vmul.f32 0.0078125, %v778_v37 }
 0x142   : > { %6962 = vrsqrt.f32 %v795_v35 }
 0x143   : > { %v796_v43 = vadd.f32 1e-06, %v788_v41  ;;  %v797_v44 = vadd.f32 1e-06, %v789_v42 }
 0x144   : > { %v780_v45 = vpop.xlane.xlu1 %779  ;;  %v782_v48 = vpop.xlane.xlu0 %781 }
 0x145   : > { %6964 = vrsqrt.f32 %v796_v43  ;;  %v790_v50 = vmul.f32 0.0078125, %v780_v45  ;;  %v791_v51 = vmul.f32 0.0078125, %v782_v48 }
 0x146   : > { %6966 = vrsqrt.f32 %v797_v44 }
 0x147   : > { %v6959_v53 = vpop.eup %6958  ;;  %v798_v56 = vadd.f32 1e-06, %v790_v50  ;;  %v799_v57 = vadd.f32 1e-06, %v791_v51 }
 0x148   : > { %v784_v58 = vpop.xlane.xlu1 %783  ;;  %v809_v59 = vmul.f32 %v6959_v53, %v7659_v30 }
 0x149   : > { %6968 = vrsqrt.f32 %v798_v56  ;;  %v792_v62 = vmul.f32 0.0078125, %v784_v58  ;;  %v1246_v56 = vpop.permute.xlu0 %1245 }
 0x14a   : > { %6970 = vrsqrt.f32 %v799_v57  ;;  %v821_v10 = vmul.f32 %v820_v60, %v809_v59  ;;  %6687 = vmatprep.subr.msk.bf16.mxu0 %vm1049_vm0, %v1246_v56  ;;  %v1274_v57 = vsel %vm1049_vm0, %v1246_v56, 0 }
 0x14b   : > { %v6961_v63 = vpop.eup %6960  ;;  %v800_v0 = vadd.f32 1e-06, %v792_v62 }
 0x14c   : > { %v6963_v2 = vpop.eup %6962  ;;  %v810_v4 = vmul.f32 %v6961_v63, %v7669_v38  ;;  %v833_v19 = vadd.f32 %v832_v13, %v821_v10 }
 0x14d   : > { %6972 = vrsqrt.f32 %v800_v0  ;;  %v811_v14 = vmul.f32 %v6963_v2, %v7662_v31 }
 0x14e   : > { %v822_v17 = vmul.f32 %v820_v60, %v810_v4  ;;  %v1254_v4 = vpop.permute.xlu0 %1253 }
 0x14f   : > { %v6965_v30 = vpop.eup %6964  ;;  %v823_v26 = vmul.f32 %v820_v60, %v811_v14  ;;  %v1286_v10 = vsel %vm1049_vm0, %v1254_v4, 0 }
 0x150   : > { %v6967_v18 = vpop.eup %6966  ;;  %v834_v20 = vadd.f32 %v832_v13, %v822_v17  ;;  %v812_v25 = vmul.f32 %v6965_v30, %v7672_v39 }
 0x151   : > { %v813_v27 = vmul.f32 %v6967_v18, %v7679_v46  ;;  %v835_v34 = vadd.f32 %v832_v13, %v823_v26  ;;  %v5632_v18 = vld [vmem:[%s9618_s6] ss:$0 sm:$0xff] }
 0x152   : > { %v841_v28 = vpack.c.bf16 %v834_v20, %v833_v19  ;;  %v824_v32 = vmul.f32 %v820_v60, %v812_v25  ;;  %v1258_v14 = vpop.permute.xlu0 %1257 }
 0x153   : > { %v6969_v33 = vpop.eup %6968  ;;  %v825_v31 = vmul.f32 %v820_v60, %v813_v27  ;;  %v1292_v17 = vsel %vm1049_vm0, %v1258_v14, 0 }
 0x154   : > { %v6971_v38 = vpop.eup %6970  ;;  %6419 = vmatprep.mubr.bf16.mxu0 %v841_v28  ;;  %v836_v35 = vadd.f32 %v832_v13, %v824_v32  ;;  %v814_v36 = vmul.f32 %v6969_v33, %v7682_v47  ;;  %v1084_v47 = vsel %vm1049_vm0, %v7760_v12, 0 }
 0x155   : > { %v815_v37 = vmul.f32 %v6971_v38, %v7689_v54  ;;  %v837_v39 = vadd.f32 %v832_v13, %v825_v31  ;;  %6442 = vmatpush3.bf16.xpose.msra.mxu1 %v1084_v47  ;;  %v1248_v54 = vpop.permute.xlu1 %1247 }
 0x156   : > { %v842_v40 = vpack.c.bf16 %v836_v35, %v835_v34  ;;  %v826_v41 = vmul.f32 %v820_v60, %v814_v36  ;;  %v1277_v58 = vsel %vm1049_vm0, %v1248_v54, 0 }
 0x157   : > { %v6973_v42 = vpop.eup %6972  ;;  %v827_v44 = vmul.f32 %v820_v60, %v815_v37 }
 0x158   : > { %6420 = vmatmul.mubr.bf16.vlgmr.msra.gmra.mrb[0].mxu0 %v842_v40  ;;  %v838_v43 = vadd.f32 %v832_v13, %v826_v41  ;;  %v816_v46 = vmul.f32 %v6973_v42, %v7692_v55 }
 0x159   : > { %v839_v50 = vadd.f32 %v832_v13, %v827_v44  ;;  %v1250_v53 = vpop.permute.xlu1 %1249  ;;  %6452 = vmatpush3.bf16.xpose.msra.mxu0 %v1274_v57 }
 0x15a   : > { %v843_v45 = vpack.c.bf16 %v838_v43, %v837_v39  ;;  %v828_v48 = vmul.f32 %v820_v60, %v816_v46  ;;  %6688 = vmatprep.subr.msk.bf16.mxu0 %vm1049_vm0, %v1248_v54  ;;  %v1280_v62 = vsel %vm1049_vm0, %v1250_v53, 0 }
 0x15c   : > { %6423 = vmatprep.mubr.bf16.mxu0 %v843_v45  ;;  %v840_v51 = vadd.f32 %v832_v13, %v828_v48 }
 0x15d   : > { %v1252_v55 = vpop.permute.xlu1 %1251 }
 0x15e   : > { %v844_v52 = vpack.c.bf16 %v840_v51, %v839_v50  ;;  %v1283_v2 = vsel %vm1049_vm0, %v1252_v55, 0 }
 0x160   : > { %6424 = vmatmul.mubr.bf16.gmra.mrb[4].mxu0 %v844_v52 }
 0x161   : > { %v1256_v59 = vpop.permute.xlu1 %1255  ;;  %6454 = vmatpush3.bf16.xpose.msra.mxu0 %v1277_v58 }
 0x162   : > { %6689 = vmatprep.subr.msk.bf16.mxu0 %vm1049_vm0, %v1250_v53  ;;  %v1289_v13 = vsel %vm1049_vm0, %v1256_v59, 0 }
 0x165   : > { %v1260_v60 = vpop.permute.xlu1 %1259 }
 0x166   : > { %v1295_v30 = vsel %vm1049_vm0, %v1260_v60, 0 }
 0x169   : > { %v7824_v63 = vpop.permute.xlu1 %1655  ;;  %6456 = vmatpush3.bf16.xpose.msra.mxu0 %v1280_v62 }
 0x16a   : > { %6690 = vmatprep.subr.msk.bf16.mxu0 %vm1049_vm0, %v1252_v55 }
 0x16d   : > { %v1451_v0 = vpop.permute.xlu1 %1450 }
 0x16e   : > { %6695 = vmatprep.subr.msk.bf16.mxu1 %vm1049_vm0, %v1451_v0  ;;  %v1479_v39 = vsel %vm1049_vm0, %v1451_v0, 0  ;;  %v1684_v0 = vsel %vm1049_vm0, %v7824_v63, 0 }
 0x171   : > { %6458 = vmatpush3.bf16.xpose.msra.mxu0 %v1283_v2  ;;  %v1453_v44 = vpop.permute.xlu1 %1452 }
 0x172   : > { %6691 = vmatprep.subr.msk.bf16.mxu0 %vm1049_vm0, %v1254_v4  ;;  %v1482_v57 = vsel %vm1049_vm0, %v1453_v44, 0 }
 0x175   : > { %v1455_v55 = vpop.permute.xlu1 %1454 }
 0x176   : > { %v1485_v58 = vsel %vm1049_vm0, %v1455_v55, 0 }
 0x179   : > { %6460 = vmatpush3.bf16.xpose.msra.mxu0 %v1286_v10 }
 0x17a   : > { %6692 = vmatprep.subr.msk.bf16.mxu0 %vm1049_vm0, %v1256_v59 }
 0x181   : > { %6462 = vmatpush3.bf16.xpose.msra.mxu0 %v1289_v13 }
 0x182   : > { %6693 = vmatprep.subr.msk.bf16.mxu0 %vm1049_vm0, %v1258_v14 }
 0x189   : > { %6464 = vmatpush3.bf16.xpose.msra.mxu0 %v1292_v17 }
 0x18a   : > { %6694 = vmatprep.subr.msk.bf16.mxu0 %vm1049_vm0, %v1260_v60 }
 0x191   : > { %6466 = vmatpush3.bf16.xpose.msra.mxu0 %v1295_v30 }
 0x192   : > { %6703 = vmatprep.subr.msk.bf16.mxu0 %vm1049_vm0, %v7824_v63 }
 0x22b   : > { %v6421_v19 = vpop.f32.mrb[0].mxu0 }
 0x22c   : > { %v959_v20 = vadd.f32 %v6421_v19, %v5632_v18  ;;  %v950_v25 = vpop.f32.mrb[1].mxu0 }
 0x22d   : > { %v951_v26 = vadd.f32 %v5632_v18, %v950_v25  ;;  %v6422_v27 = vpop.f32.mrb[2].mxu0 }
 0x22e   : > { %v962_v28 = vadd.f32 %v6422_v27, %v5632_v18  ;;  %v953_v32 = vpop.f32.mrb[3].mxu0  ;;  %v983_v38 = vmul.f32 0.17677669, %v959_v20 }
 0x22f   : > { %v954_v33 = vadd.f32 %v5632_v18, %v953_v32  ;;  %v981_v35 = vmul.f32 0.17677669, %v951_v26 }
 0x230   : > { %v984_v34 = vmul.f32 0.17677669, %v962_v28 }
 0x231   : > { %v982_v36 = vmul.f32 0.17677669, %v954_v33 }
 0x232   : > { %v1006_v31 = vpack.c.bf16 %v984_v34, %v983_v38 }
 0x233   : > { %v1005_v37 = vpack.c.bf16 %v982_v36, %v981_v35  ;;  %v6425_v40 = vpop.f32.mrb[4].mxu0 }
 0x234   : > { %v975_v41 = vadd.f32 %v6425_v40, %v5632_v18  ;;  %v966_v42 = vpop.f32.mrb[5].mxu0 }
 0x235   : > { %v967_v43 = vadd.f32 %v5632_v18, %v966_v42  ;;  %1237 = vrot.lane.b32.xlu0 %v1005_v37, %s9637_s27  ;;  %v6426_v46 = vpop.f32.mrb[6].mxu0  ;;  %6443 = vmatprep.mubr.msk.bf16.mxu1 %vm1049_vm0, %v1005_v37 }
 0x236   : > { %v978_v45 = vadd.f32 %v6426_v46, %v5632_v18  ;;  %v969_v48 = vpop.f32.mrb[7].mxu0  ;;  %6444 = vmatmul.mubr.msk.bf16.vlgmr.msra.gmra.mrb[0].mxu1 %vm1049_vm0, %v1006_v31  ;;  %v987_v51 = vmul.f32 0.17677669, %v975_v41 }
 0x237   : > { %v970_v50 = vadd.f32 %v5632_v18, %v969_v48  ;;  %6476 = vmatpush3.bf16.xpose.msra.mxu1 %v1479_v39  ;;  %v985_v47 = vmul.f32 0.17677669, %v967_v43  ;;  %v7918_v39 = vand.u32 127, %v724_v29 }
 0x238   : > { %v988_v52 = vmul.f32 0.17677669, %v978_v45  ;;  %6696 = vmatprep.subr.msk.bf16.mxu1 %vm1049_vm0, %v1453_v44 }
 0x239   : > { %v986_v54 = vmul.f32 0.17677669, %v970_v50  ;;  %1239 = vrot.lane.b32.xlu0 %v1006_v31, %s9637_s27  ;;  %vm726_vm1 = vcmp.lt.s32.totalorder %v7918_v39, 8 }
 0x23a   : > { %v1008_v53 = vpack.c.bf16 %v988_v52, %v987_v51 }
 0x23b   : > { %v1007_v56 = vpack.c.bf16 %v986_v54, %v985_v47 }
 0x23c   : > { %1243 = vrot.lane.b32.xlu1 %v1008_v53, %s9637_s27 }
 0x23d   : > { %1657 = vrot.lane.b32.xlu0 %v7720_v1, %s9635_s18  ;;  %6447 = vmatprep.mubr.msk.bf16.mxu1 %vm1049_vm0, %v1007_v56  ;;  %v1457_v1 = vpop.permute.xlu1 %1456 }
 0x23e   : > { %6448 = vmatmul.mubr.msk.bf16.gmra.mrb[4].mxu1 %vm1049_vm0, %v1008_v53 }
 0x23f   : > { %6478 = vmatpush3.bf16.xpose.msra.mxu1 %v1482_v57 }
 0x240   : > { %1464 = vrot.lane.b32.xlu1 %v7760_v12, %s9633_s28  ;;  %6697 = vmatprep.subr.msk.bf16.mxu1 %vm1049_vm0, %v1455_v55 }
 0x241   : > { %1659 = vrot.lane.b32.xlu0 %v7726_v3, %s9635_s18  ;;  %v1488_v3 = vsel %vm1049_vm0, %v1457_v1, 0  ;;  %v1459_v59 = vpop.permute.xlu1 %1458 }
 0x244   : > { %1442 = vrot.lane.b32.xlu1 %v1005_v37, %s9633_s28 }
 0x245   : > { %1661 = vrot.lane.b32.xlu0 %v7739_v6, %s9635_s18  ;;  %v1491_v6 = vsel %vm1049_vm0, %v1459_v59, 0 }
 0x247   : > { %6480 = vmatpush3.bf16.xpose.msra.mxu1 %v1485_v58 }
 0x248   : > { %1444 = vrot.lane.b32.xlu1 %v1006_v31, %s9633_s28  ;;  %6698 = vmatprep.subr.msk.bf16.mxu1 %vm1049_vm0, %v1457_v1 }
 0x249   : > { %1663 = vrot.lane.b32.xlu0 %v7731_v5, %s9635_s18  ;;  %v1461_v5 = vpop.permute.xlu1 %1460 }
 0x24c   : > { %1446 = vrot.lane.b32.xlu1 %v1007_v56, %s9633_s28 }
 0x24d   : > { %1665 = vrot.lane.b32.xlu0 %v7751_v11, %s9635_s18  ;;  %v1494_v11 = vsel %vm1049_vm0, %v1461_v5, 0  ;;  %v1463_v60 = vpop.permute.xlu1 %1462 }
 0x24f   : > { %6482 = vmatpush3.bf16.xpose.msra.mxu1 %v1488_v3 }
 0x250   : > { %1448 = vrot.lane.b32.xlu1 %v1008_v53, %s9633_s28  ;;  %6699 = vmatprep.subr.msk.bf16.mxu1 %vm1049_vm0, %v1459_v59  ;;  %s9652_s28 = smov 64  }
 0x251   : > { %1667 = vrot.lane.b32.xlu0 %v7744_v7, %s9635_s18  ;;  %v1497_v7 = vsel %vm1049_vm0, %v1463_v60, 0 }
 0x255   : > { %1241 = vrot.lane.b32.xlu0 %v1007_v56, %s9637_s27 }
 0x257   : > { %6484 = vmatpush3.bf16.xpose.msra.mxu1 %v1491_v6 }
 0x258   : > { %6700 = vmatprep.subr.msk.bf16.mxu1 %vm1049_vm0, %v1461_v5 }
 0x259   : > { %1669 = vrot.lane.b32.xlu0 %v7760_v12, %s9635_s18 }
 0x25d   : > { %1647 = vrot.lane.b32.xlu0 %v1005_v37, %s9635_s18 }
 0x25f   : > { %6486 = vmatpush3.bf16.xpose.msra.mxu1 %v1494_v11 }
 0x260   : > { %6701 = vmatprep.subr.msk.bf16.mxu1 %vm1049_vm0, %v1463_v60 }
 0x261   : > { %1649 = vrot.lane.b32.xlu0 %v1006_v31, %s9635_s18 }
 0x265   : > { %1651 = vrot.lane.b32.xlu0 %v1007_v56, %s9635_s18 }
 0x267   : > { %6488 = vmatpush3.bf16.xpose.msra.mxu1 %v1497_v7 }
 0x269   : > { %1653 = vrot.lane.b32.xlu0 %v1008_v53, %s9635_s18 }
 0x2a7   : > { %v1238_v62 = vpop.permute.xlu0 %1237 }
 0x2a8   : > { %6467 = vmatprep.mubr.msk.bf16.mxu0 %vm1049_vm0, %v1238_v62 }
 0x2ab   : > { %v1240_v12 = vpop.permute.xlu0 %1239 }
 0x2ac   : > { %6468 = vmatmul.mubr.msk.bf16.vlgmr.msra.gmra.mrb[8].mxu0 %vm1049_vm0, %v1240_v12 }
 0x2ad   : > { %6500 = vmatpush3.bf16.xpose.msra.mxu0 %v1684_v0 }
 0x2ae   : > { %v1244_v2 = vpop.permute.xlu1 %1243 }
 0x2af   : > { %v1658_v4 = vpop.permute.xlu0 %1657 }
 0x2b0   : > { %6704 = vmatprep.subr.msk.bf16.mxu0 %vm1049_vm0, %v1658_v4  ;;  %v1687_v13 = vsel %vm1049_vm0, %v1658_v4, 0 }
 0x2b2   : > { %v1465_v10 = vpop.permute.xlu1 %1464 }
 0x2b3   : > { %6702 = vmatprep.subr.msk.bf16.mxu1 %vm1049_vm0, %v1465_v10  ;;  %v1660_v14 = vpop.permute.xlu0 %1659  ;;  %v1500_v17 = vsel %vm1049_vm0, %v1465_v10, 0 }
 0x2b4   : > { %6490 = vmatpush3.bf16.xpose.msra.mxu1 %v1500_v17  ;;  %v1690_v19 = vsel %vm1049_vm0, %v1660_v14, 0 }
 0x2b5   : > { %6502 = vmatpush3.bf16.xpose.msra.mxu0 %v1687_v13 }
 0x2b6   : > { %v1443_v30 = vpop.permute.xlu1 %1442  ;;  %6705 = vmatprep.subr.msk.bf16.mxu0 %vm1049_vm0, %v1660_v14 }
 0x2b7   : > { %6491 = vmatprep.mubr.msk.bf16.mxu1 %vm1049_vm0, %v1443_v30  ;;  %v1662_v63 = vpop.permute.xlu0 %1661 }
 0x2b8   : > { %v1693_v28 = vsel %vm1049_vm0, %v1662_v63, 0 }
 0x2ba   : > { %v1445_v18 = vpop.permute.xlu1 %1444 }
 0x2bb   : > { %6492 = vmatmul.mubr.msk.bf16.vlgmr.msra.gmra.mrb[8].mxu1 %vm1049_vm0, %v1445_v18  ;;  %v1664_v20 = vpop.permute.xlu0 %1663 }
 0x2bc   : > { %v1696_v38 = vsel %vm1049_vm0, %v1664_v20, 0 }
 0x2bd   : > { %6504 = vmatpush3.bf16.xpose.msra.mxu0 %v1690_v19 }
 0x2be   : > { %v1447_v25 = vpop.permute.xlu1 %1446  ;;  %6706 = vmatprep.subr.msk.bf16.mxu0 %vm1049_vm0, %v1662_v63 }
 0x2bf   : > { %6495 = vmatprep.mubr.msk.bf16.mxu1 %vm1049_vm0, %v1447_v25  ;;  %v1666_v26 = vpop.permute.xlu0 %1665 }
 0x2c0   : > { %v1699_v36 = vsel %vm1049_vm0, %v1666_v26, 0 }
 0x2c2   : > { %v1449_v27 = vpop.permute.xlu1 %1448 }
 0x2c3   : > { %6496 = vmatmul.mubr.msk.bf16.gmra.mrb[12].mxu1 %vm1049_vm0, %v1449_v27  ;;  %v1668_v32 = vpop.permute.xlu0 %1667 }
 0x2c4   : > { %v1702_v31 = vsel %vm1049_vm0, %v1668_v32, 0 }
 0x2c5   : > { %6506 = vmatpush3.bf16.xpose.msra.mxu0 %v1693_v28 }
 0x2c6   : > { %6707 = vmatprep.subr.msk.bf16.mxu0 %vm1049_vm0, %v1664_v20 }
 0x2c7   : > { %v1242_v33 = vpop.permute.xlu0 %1241 }
 0x2c8   : > { %6471 = vmatprep.mubr.msk.bf16.mxu0 %vm1049_vm0, %v1242_v33 }
 0x2c9   : > { %6472 = vmatmul.mubr.msk.bf16.gmra.mrb[12].mxu0 %vm1049_vm0, %v1244_v2 }
 0x2cb   : > { %v1670_v34 = vpop.permute.xlu0 %1669 }
 0x2cc   : > { %v1705_v37 = vsel %vm1049_vm0, %v1670_v34, 0 }
 0x2cd   : > { %6508 = vmatpush3.bf16.xpose.msra.mxu0 %v1696_v38 }
 0x2ce   : > { %6708 = vmatprep.subr.msk.bf16.mxu0 %vm1049_vm0, %v1666_v26 }
 0x2cf   : > { %v1648_v35 = vpop.permute.xlu0 %1647 }
 0x2d0   : > { %6515 = vmatprep.mubr.msk.bf16.mxu0 %vm1049_vm0, %v1648_v35 }
 0x2d3   : > { %v1650_v40 = vpop.permute.xlu0 %1649 }
 0x2d5   : > { %6510 = vmatpush3.bf16.xpose.msra.mxu0 %v1699_v36 }
 0x2d6   : > { %6709 = vmatprep.subr.msk.bf16.mxu0 %vm1049_vm0, %v1668_v32 }
 0x2d7   : > { %v1652_v41 = vpop.permute.xlu0 %1651 }
 0x2db   : > { %v1654_v42 = vpop.permute.xlu0 %1653 }
 0x2dd   : > { %6512 = vmatpush3.bf16.xpose.msra.mxu0 %v1702_v31 }
 0x2de   : > { %6710 = vmatprep.subr.msk.bf16.mxu0 %vm1049_vm0, %v1670_v34 }
 0x2e5   : > { %6514 = vmatpush3.bf16.xpose.msra.mxu0 %v1705_v37 }
 0x2ec   : > { %6516 = vmatmul.mubr.msk.bf16.vlgmr.msra.gmra.mrb[16].mxu0 %vm1049_vm0, %v1650_v40 }
 0x2ed   : > { %6519 = vmatprep.mubr.msk.bf16.mxu0 %vm1049_vm0, %v1652_v41 }
 0x2f4   : > { %6520 = vmatmul.mubr.msk.bf16.gmra.mrb[20].mxu0 %vm1049_vm0, %v1654_v42 }
 0x309   : > { %v6445_v43 = vpop.f32.mrb[0].mxu1 }
 0x30a   : > { %v1120_v46 = vpop.f32.mrb[1].mxu1  ;;  %v8003_v35 = vsel %vm726_vm1, %v6445_v43, -1e+30 }
 0x30b   : > { %v6446_v44 = vpop.f32.mrb[2].mxu1  ;;  %v7923_v45 = vsel %vm726_vm1, %v1120_v46, -1e+30 }
 0x30c   : > { %v1123_v48 = vpop.f32.mrb[3].mxu1  ;;  %1161 = vmax.xlane.f32.xlu0 %v7923_v45  ;;  %v7988_v26 = vsel %vm726_vm1, %v6446_v44, -1e+30 }
 0x30d   : > { %v7928_v50 = vsel %vm726_vm1, %v1123_v48, -1e+30 }
 0x30e   : > { %1163 = vmax.xlane.f32.xlu1 %v7928_v50 }
 0x311   : > { %v7931_v29 = vpop.f32.mrb[4].mxu1 }
 0x312   : > { %v7933_v51 = vpop.f32.mrb[5].mxu1 }
 0x313   : > { %v7935_v52 = vpop.f32.mrb[6].mxu1  ;;  %v8034_v43 = vsel %vm726_vm1, %v7933_v51, -1e+30 }
 0x314   : > { %v1139_v47 = vpop.f32.mrb[7].mxu1 }
 0x315   : > { %v8018_v37 = vsel %vm726_vm1, %v1139_v47, -1e+30 }
 0x37f   : > { %v6469_v54 = vpop.f32.mrb[8].mxu0 }
 0x380   : > { %v1331_v53 = vpop.f32.mrb[9].mxu0  ;;  %v7939_v56 = vsel %vm726_vm1, %v6469_v54, -1e+30 }
 0x381   : > { %1374 = vmax.xlane.f32.xlu0 %v7939_v56  ;;  %v6470_v57 = vpop.f32.mrb[10].mxu0  ;;  %v7949_v1 = vsel %vm726_vm1, %v1331_v53, -1e+30 }
 0x382   : > { %v1334_v55 = vpop.f32.mrb[11].mxu0  ;;  %v7944_v58 = vsel %vm726_vm1, %v6470_v57, -1e+30 }
 0x383   : > { %1376 = vmax.xlane.f32.xlu1 %v7944_v58  ;;  %v7954_v3 = vsel %vm726_vm1, %v1334_v55, -1e+30 }
 0x385   : > { %1370 = vmax.xlane.f32.xlu0 %v7949_v1 }
 0x387   : > { %1372 = vmax.xlane.f32.xlu1 %v7954_v3 }
 0x38e   : > { %v6493_v59 = vpop.f32.mrb[8].mxu1 }
 0x38f   : > { %v1536_v6 = vpop.f32.mrb[9].mxu1  ;;  %v8013_v31 = vsel %vm726_vm1, %v6493_v59, -1e+30  ;;  %v8072_v59 = vsel %vm726_vm1, %v7935_v52, -1e+30 }
 0x390   : > { %v6494_v5 = vpop.f32.mrb[10].mxu1  ;;  %v7959_v11 = vsel %vm726_vm1, %v1536_v6, -1e+30  ;;  %v8089_v52 = vsel %vm726_vm1, %v7931_v29, -1e+30 }
 0x391   : > { %v1539_v60 = vpop.f32.mrb[11].mxu1  ;;  %1575 = vmax.xlane.f32.xlu0 %v7959_v11  ;;  %v7998_v34 = vsel %vm726_vm1, %v6494_v5, -1e+30 }
 0x392   : > { %v7964_v7 = vsel %vm726_vm1, %v1539_v60, -1e+30 }
 0x393   : > { %1577 = vmax.xlane.f32.xlu1 %v7964_v7 }
 0x396   : > { %v7967_v62 = vpop.f32.mrb[12].mxu1 }
 0x397   : > { %v1552_v12 = vpop.f32.mrb[13].mxu1 }
 0x398   : > { %v7969_v0 = vpop.f32.mrb[14].mxu1  ;;  %v8045_v48 = vsel %vm726_vm1, %v1552_v12, -1e+30  ;;  %v8098_v12 = vsel %vm726_vm1, %v7967_v62, -1e+30 }
 0x399   : > { %v1555_v2 = vpop.f32.mrb[15].mxu1  ;;  %v1162_v47 = vpop.xlane.xlu0 %1161  ;;  %v8083_v5 = vsel %vm726_vm1, %v7969_v0, -1e+30 }
 0x39a   : > { %v8028_v41 = vsel %vm726_vm1, %v1555_v2, -1e+30  ;;  %v1177_v57 = vsub.f32 %v7923_v45, %v1162_v47 }
 0x39b   : > { %v1164_v42 = vpop.xlane.xlu1 %1163 }
 0x39c   : > { %v6473_v4 = vpop.f32.mrb[12].mxu0  ;;  %v1178_v44 = vsub.f32 %v7928_v50, %v1164_v42  ;;  %v1185_v6 = vmul.f32 1.442695, %v1177_v57 }
 0x39d   : > { %v1347_v10 = vpop.f32.mrb[13].mxu0  ;;  %v8055_v53 = vsel %vm726_vm1, %v6473_v4, -1e+30 }
 0x39e   : > { %v6474_v13 = vpop.f32.mrb[14].mxu0  ;;  %v8023_v40 = vsel %vm726_vm1, %v1347_v10, -1e+30  ;;  %v1187_v54 = vmul.f32 1.442695, %v1178_v44  ;;  %v6790_v10 = vld [vmem:[%s7645_s29 + $0x40] sm:$0xff]  }
 0x39f   : > { %v1350_v14 = vpop.f32.mrb[15].mxu0  ;;  %v8039_v46 = vsel %vm726_vm1, %v6474_v13, -1e+30  ;;  %v6791_v13 = vld [vmem:[%s7645_s29] sm:$0xff]   ;;  %6086 = vmatprep.subr.bf16.mxu1 %v6790_v10  ;;  %v6796_v10 = vld [vmem:[%s7645_s29 + $0x58] sm:$0xff]  }
 0x3a0   : > { %v8008_v36 = vsel %vm726_vm1, %v1350_v14, -1e+30  ;;  %6974 = vpow2.f32 %v1187_v54  ;;  %v6792_v14 = vld [vmem:[%s7645_s29 + $0x48] sm:$0xff]   ;;  %6087 = vmatpush3.bf16.msra.mxu1 %v6791_v13 }
 0x3a1   : > { %6976 = vpow2.f32 %v1185_v6  ;;  %6088 = vmatprep.subr.bf16.mxu1 %v6792_v14  ;;  %v6798_v14 = vld [vmem:[%s7645_s29 + $0x60] sm:$0xff]  }
 0x3aa   : > { %v8091_v60 = vpop.eup %6974 }
 0x3ab   : > { %v8101_v0 = vpop.eup %6976 }
 0x3bf   : > { %v6517_v17 = vpop.f32.mrb[16].mxu0 }
 0x3c0   : > { %v1741_v30 = vpop.f32.mrb[17].mxu0  ;;  %v7993_v33 = vsel %vm726_vm1, %v6517_v17, -1e+30 }
 0x3c1   : > { %v6518_v63 = vpop.f32.mrb[18].mxu0  ;;  %v7973_v18 = vsel %vm726_vm1, %v1741_v30, -1e+30 }
 0x3c2   : > { %1780 = vmax.xlane.f32.xlu0 %v7973_v18  ;;  %v1744_v19 = vpop.f32.mrb[19].mxu0  ;;  %v7978_v20 = vsel %vm726_vm1, %v6518_v63, -1e+30 }
 0x3c3   : > { %1786 = vmax.xlane.f32.xlu1 %v7978_v20  ;;  %v7983_v25 = vsel %vm726_vm1, %v1744_v19, -1e+30 }
 0x3c6   : > { %1782 = vmax.xlane.f32.xlu0 %v7983_v25 }
 0x3c7   : > { %1167 = vmax.xlane.f32.xlu1 %v7988_v26  ;;  %v6521_v27 = vpop.f32.mrb[20].mxu0 }
 0x3c8   : > { %v1757_v28 = vpop.f32.mrb[21].mxu0  ;;  %v8077_v45 = vsel %vm726_vm1, %v6521_v27, -1e+30  ;;  %v6793_v27 = vld [vmem:[%s7645_s29 + $0x8] sm:$0xff]  }
 0x3c9   : > { %v6522_v32 = vpop.f32.mrb[22].mxu0  ;;  %v8066_v55 = vsel %vm726_vm1, %v1757_v28, -1e+30  ;;  %6089 = vmatpush3.bf16.msra.mxu1 %v6793_v27  ;;  %v6804_v27 = vld [vmem:[%s7645_s29 + $0x78] sm:$0xff]  }
 0x3ca   : > { %1784 = vmax.xlane.f32.xlu0 %v7993_v33  ;;  %v1760_v38 = vpop.f32.mrb[23].mxu0  ;;  %v8060_v50 = vsel %vm726_vm1, %v6522_v32, -1e+30 }
 0x3cb   : > { %1581 = vmax.xlane.f32.xlu1 %v7998_v34  ;;  %v8050_v51 = vsel %vm726_vm1, %v1760_v38, -1e+30 }
 0x3ce   : > { %1165 = vmax.xlane.f32.xlu0 %v8003_v35 }
 0x3cf   : > { %1380 = vmax.xlane.f32.xlu1 %v8008_v36 }
 0x3d2   : > { %1579 = vmax.xlane.f32.xlu0 %v8013_v31 }
 0x3d3   : > { %1171 = vmax.xlane.f32.xlu1 %v8018_v37 }
 0x3d6   : > { %1378 = vmax.xlane.f32.xlu0 %v8023_v40 }
 0x3d7   : > { %1585 = vmax.xlane.f32.xlu1 %v8028_v41 }
 0x3da   : > { %1169 = vmax.xlane.f32.xlu0 %v8034_v43 }
 0x3db   : > { %1384 = vmax.xlane.f32.xlu1 %v8039_v46 }
 0x3de   : > { %1583 = vmax.xlane.f32.xlu0 %v8045_v48 }
 0x3df   : > { %1790 = vmax.xlane.f32.xlu1 %v8050_v51 }
 0x3e2   : > { %1382 = vmax.xlane.f32.xlu0 %v8055_v53 }
 0x3e3   : > { %1794 = vmax.xlane.f32.xlu1 %v8060_v50 }
 0x3e6   : > { %1788 = vmax.xlane.f32.xlu0 %v8066_v55 }
 0x3e7   : > { %1175 = vmax.xlane.f32.xlu1 %v8072_v59 }
 0x3ea   : > { %1792 = vmax.xlane.f32.xlu0 %v8077_v45 }
 0x3eb   : > { %1589 = vmax.xlane.f32.xlu1 %v8083_v5 }
 0x3ee   : > { %1173 = vmax.xlane.f32.xlu0 %v8089_v52 }
 0x3ef   : > { %1203 = vadd.xlane.f32.xlu1 %v8091_v60 }
 0x3f2   : > { %1587 = vmax.xlane.f32.xlu0 %v8098_v12 }
 0x3f6   : > { %1201 = vadd.xlane.f32.xlu0 %v8101_v0 }
 0x40e   : > { %v1375_v29 = vpop.xlane.xlu0 %1374 }
 0x40f   : > { %v1388_v2 = vsub.f32 %v7939_v56, %v1375_v29  ;;  %v6794_v56 = vld [vmem:[%s7645_s29 + $0x50] sm:$0xff]  }
 0x410   : > { %v1377_v4 = vpop.xlane.xlu1 %1376  ;;  %6090 = vmatprep.subr.bf16.mxu1 %v6794_v56  ;;  %v6806_v56 = vld [vmem:[%s7645_s29 + $0xc0] sm:$0xff]  }
 0x411   : > { %v1398_v17 = vmul.f32 1.442695, %v1388_v2  ;;  %v1389_v30 = vsub.f32 %v7944_v58, %v1377_v4  ;;  %v6795_v58 = vld [vmem:[%s7645_s29 + $0x10] sm:$0xff]   ;;  %6126 = vmatprep.subr.bf16.mxu0 %v6806_v56 }
 0x412   : > { %v1371_v62 = vpop.xlane.xlu0 %1370  ;;  %6091 = vmatpush3.bf16.msra.mxu1 %v6795_v58  ;;  %v6810_v58 = vld [vmem:[%s7645_s29 + $0xd0] sm:$0xff]  }
 0x413   : > { %6978 = vpow2.f32 %v1398_v17  ;;  %v1400_v63 = vmul.f32 1.442695, %v1389_v30  ;;  %v1386_v19 = vsub.f32 %v7949_v1, %v1371_v62  ;;  %6092 = vmatprep.subr.bf16.mxu1 %v6796_v10  ;;  %v6799_v17 = vld [vmem:[%s7645_s29 + $0x20] sm:$0xff]   ;;  %v6800_v30 = vld [vmem:[%s7645_s29 + $0x68] sm:$0xff]  }
 0x414   : > { %v1373_v28 = vpop.xlane.xlu1 %1372  ;;  %v6801_v62 = vld [vmem:[%s7645_s29 + $0x28] sm:$0xff]  }
 0x415   : > { %6980 = vpow2.f32 %v1400_v63  ;;  %v1394_v32 = vmul.f32 1.442695, %v1386_v19  ;;  %v1387_v38 = vsub.f32 %v7954_v3, %v1373_v28  ;;  %v6802_v63 = vld [vmem:[%s7645_s29 + $0x70] sm:$0xff]   ;;  %v6805_v28 = vld [vmem:[%s7645_s29 + $0x38] sm:$0xff]  }
 0x416   : > { %v6803_v19 = vld [vmem:[%s7645_s29 + $0x30] sm:$0xff]  }
 0x417   : > { %6982 = vpow2.f32 %v1394_v32  ;;  %v1396_v42 = vmul.f32 1.442695, %v1387_v38  ;;  %v6807_v32 = vld [vmem:[%s7645_s29 + $0x80] sm:$0xff]   ;;  %v6808_v38 = vld [vmem:[%s7645_s29 + $0xc8] sm:$0xff]  }
 0x418   : > { %6127 = vmatpush3.bf16.msra.mxu0 %v6807_v32 }
 0x419   : > { %6984 = vpow2.f32 %v1396_v42  ;;  %v6809_v42 = vld [vmem:[%s7645_s29 + $0x88] sm:$0xff]   ;;  %6128 = vmatprep.subr.bf16.mxu0 %v6808_v38 }
 0x41c   : > { %6129 = vmatpush3.bf16.msra.mxu0 %v6809_v42 }
 0x41d   : > { %v8114_v44 = vpop.eup %6978  ;;  %6130 = vmatprep.subr.bf16.mxu0 %v6810_v58 }
 0x41e   : > { %1414 = vadd.xlane.f32.xlu0 %v8114_v44  ;;  %v1576_v1 = vpop.xlane.xlu0 %1575 }
 0x41f   : > { %v8117_v47 = vpop.eup %6980  ;;  %v1591_v54 = vsub.f32 %v7959_v11, %v1576_v1 }
 0x420   : > { %v1578_v57 = vpop.xlane.xlu1 %1577  ;;  %1416 = vadd.xlane.f32.xlu1 %v8117_v47 }
 0x421   : > { %v8121_v3 = vpop.eup %6982  ;;  %v1599_v6 = vmul.f32 1.442695, %v1591_v54  ;;  %v1592_v29 = vsub.f32 %v7964_v7, %v1578_v57  ;;  %v6797_v7 = vld [vmem:[%s7645_s29 + $0x18] sm:$0xff]  }
 0x422   : > { %1410 = vadd.xlane.f32.xlu0 %v8121_v3  ;;  %6093 = vmatpush3.bf16.msra.mxu1 %v6797_v7 }
 0x423   : > { %v8125_v2 = vpop.eup %6984  ;;  %6986 = vpow2.f32 %v1599_v6  ;;  %v1601_v4 = vmul.f32 1.442695, %v1592_v29  ;;  %6094 = vmatprep.subr.bf16.mxu1 %v6798_v14  ;;  %v6811_v6 = vld [vmem:[%s7645_s29 + $0x90] sm:$0xff]  }
 0x424   : > { %1412 = vadd.xlane.f32.xlu1 %v8125_v2  ;;  %6131 = vmatpush3.bf16.msra.mxu0 %v6811_v6 }
 0x425   : > { %6988 = vpow2.f32 %v1601_v4 }
 0x426   : > { %6095 = vmatpush3.bf16.msra.mxu1 %v6799_v17 }
 0x427   : > { %6096 = vmatprep.subr.bf16.mxu1 %v6800_v30 }
 0x42a   : > { %6097 = vmatpush3.bf16.msra.mxu1 %v6801_v62 }
 0x42b   : > { %6098 = vmatprep.subr.bf16.mxu1 %v6802_v63 }
 0x42d   : > { %v8128_v11 = vpop.eup %6986 }
 0x42e   : > { %1615 = vadd.xlane.f32.xlu0 %v8128_v11  ;;  %6099 = vmatpush3.bf16.msra.mxu1 %v6803_v19 }
 0x42f   : > { %v8133_v13 = vpop.eup %6988  ;;  %6100 = vmatprep.subr.bf16.mxu1 %v6804_v27 }
 0x430   : > { %1617 = vadd.xlane.f32.xlu1 %v8133_v13 }
 0x432   : > { %6101 = vmatpush3.bf16.msra.mxu1 %v6805_v28 }
 0x44f   : > { %v1781_v1 = vpop.xlane.xlu0 %1780 }
 0x450   : > { %v1796_v54 = vsub.f32 %v7973_v18, %v1781_v1  ;;  %v1787_v57 = vpop.xlane.xlu1 %1786 }
 0x451   : > { %v1799_v4 = vsub.f32 %v7978_v20, %v1787_v57 }
 0x452   : > { %v1804_v29 = vmul.f32 1.442695, %v1796_v54 }
 0x453   : > { %v1783_v10 = vpop.xlane.xlu0 %1782  ;;  %v1810_v30 = vmul.f32 1.442695, %v1799_v4 }
 0x454   : > { %6990 = vpow2.f32 %v1804_v29  ;;  %v1797_v7 = vsub.f32 %v7983_v25, %v1783_v10  ;;  %v1168_v14 = vpop.xlane.xlu1 %1167 }
 0x455   : > { %v1180_v62 = vsub.f32 %v7988_v26, %v1168_v14 }
 0x456   : > { %v1806_v17 = vmul.f32 1.442695, %v1797_v7 }
 0x457   : > { %v1785_v63 = vpop.xlane.xlu0 %1784  ;;  %v1191_v28 = vmul.f32 1.442695, %v1180_v62 }
 0x458   : > { %6992 = vpow2.f32 %v1806_v17  ;;  %v1798_v18 = vsub.f32 %v7993_v33, %v1785_v63  ;;  %v1582_v19 = vpop.xlane.xlu1 %1581 }
 0x459   : > { %6994 = vpow2.f32 %v1810_v30  ;;  %v1594_v20 = vsub.f32 %v7998_v34, %v1582_v19 }
 0x45a   : > { %v1808_v27 = vmul.f32 1.442695, %v1798_v18 }
 0x45b   : > { %v1166_v56 = vpop.xlane.xlu0 %1165  ;;  %v1605_v26 = vmul.f32 1.442695, %v1594_v20  ;;  %v6812_v20 = vld [vmem:[%s7645_s29 + $0xd8] sm:$0xff]  }
 0x45c   : > { %6996 = vpow2.f32 %v1808_v27  ;;  %v1179_v25 = vsub.f32 %v8003_v35, %v1166_v56  ;;  %v1381_v32 = vpop.xlane.xlu1 %1380  ;;  %6132 = vmatprep.subr.bf16.mxu0 %v6812_v20 }
 0x45d   : > { %6998 = vpow2.f32 %v1191_v28  ;;  %v1391_v58 = vsub.f32 %v8008_v36, %v1381_v32 }
 0x45e   : > { %v8157_v38 = vpop.eup %6990  ;;  %v1189_v42 = vmul.f32 1.442695, %v1179_v25  ;;  %v6813_v25 = vld [vmem:[%s7645_s29 + $0x98] sm:$0xff]  }
 0x45f   : > { %1820 = vadd.xlane.f32.xlu0 %v8157_v38  ;;  %v1580_v33 = vpop.xlane.xlu0 %1579  ;;  %v1404_v35 = vmul.f32 1.442695, %v1391_v58  ;;  %6133 = vmatpush3.bf16.msra.mxu0 %v6813_v25 }
 0x460   : > { %7000 = vpow2.f32 %v1189_v42  ;;  %v1593_v1 = vsub.f32 %v8013_v31, %v1580_v33  ;;  %v1172_v54 = vpop.xlane.xlu1 %1171 }
 0x461   : > { %7002 = vpow2.f32 %v1605_v26  ;;  %v1182_v6 = vsub.f32 %v8018_v37, %v1172_v54 }
 0x462   : > { %v8162_v34 = vpop.eup %6992  ;;  %v1603_v57 = vmul.f32 1.442695, %v1593_v1  ;;  %v6814_v1 = vld [vmem:[%s7645_s29 + $0xe0] sm:$0xff]  }
 0x463   : > { %1822 = vadd.xlane.f32.xlu1 %v8162_v34  ;;  %v1379_v29 = vpop.xlane.xlu0 %1378  ;;  %v8167_v10 = vpop.eup %6994  ;;  %v1195_v14 = vmul.f32 1.442695, %v1182_v6  ;;  %6134 = vmatprep.subr.bf16.mxu0 %v6814_v1 }
 0x464   : > { %7004 = vpow2.f32 %v1603_v57  ;;  %v1390_v36 = vsub.f32 %v8023_v40, %v1379_v29  ;;  %v1586_v4 = vpop.xlane.xlu1 %1585  ;;  %v6815_v57 = vld [vmem:[%s7645_s29 + $0xa0] sm:$0xff]  }
 0x465   : > { %7006 = vpow2.f32 %v1404_v35  ;;  %v1596_v17 = vsub.f32 %v8028_v41, %v1586_v4  ;;  %6135 = vmatpush3.bf16.msra.mxu0 %v6815_v57 }
 0x466   : > { %v8169_v7 = vpop.eup %6996  ;;  %v1402_v31 = vmul.f32 1.442695, %v1390_v36 }
 0x467   : > { %1826 = vadd.xlane.f32.xlu1 %v8167_v10  ;;  %1824 = vadd.xlane.f32.xlu0 %v8169_v7  ;;  %v1170_v37 = vpop.xlane.xlu0 %1169  ;;  %v8175_v62 = vpop.eup %6998  ;;  %v1609_v19 = vmul.f32 1.442695, %v1596_v17  ;;  %v6817_v17 = vld [vmem:[%s7645_s29 + $0xa8] sm:$0xff]  }
 0x468   : > { %7008 = vpow2.f32 %v1402_v31  ;;  %v1181_v30 = vsub.f32 %v8034_v43, %v1170_v37  ;;  %v1385_v40 = vpop.xlane.xlu1 %1384  ;;  %v6816_v31 = vld [vmem:[%s7645_s29 + $0xe8] sm:$0xff]  }
 0x469   : > { %7010 = vpow2.f32 %v1195_v14  ;;  %v1393_v41 = vsub.f32 %v8039_v46, %v1385_v40  ;;  %6136 = vmatprep.subr.bf16.mxu0 %v6816_v31 }
 0x46a   : > { %v8177_v63 = vpop.eup %7000  ;;  %v1193_v18 = vmul.f32 1.442695, %v1181_v30  ;;  %6137 = vmatpush3.bf16.msra.mxu0 %v6817_v17 }
 0x46b   : > { %1207 = vadd.xlane.f32.xlu1 %v8175_v62  ;;  %1205 = vadd.xlane.f32.xlu0 %v8177_v63  ;;  %v1584_v27 = vpop.xlane.xlu0 %1583  ;;  %v8184_v56 = vpop.eup %7002  ;;  %v1408_v46 = vmul.f32 1.442695, %v1393_v41  ;;  %v6818_v41 = vld [vmem:[%s7645_s29 + $0xf0] sm:$0xff]  }
 0x46c   : > { %7012 = vpow2.f32 %v1193_v18  ;;  %v1595_v28 = vsub.f32 %v8045_v48, %v1584_v27  ;;  %v1791_v43 = vpop.xlane.xlu1 %1790  ;;  %6138 = vmatprep.subr.bf16.mxu0 %v6818_v41 }
 0x46d   : > { %7014 = vpow2.f32 %v1609_v19  ;;  %v1801_v26 = vsub.f32 %v8050_v51, %v1791_v43 }
 0x46e   : > { %v8187_v32 = vpop.eup %7004  ;;  %v1607_v42 = vmul.f32 1.442695, %v1595_v28  ;;  %v6819_v28 = vld [vmem:[%s7645_s29 + $0xb0] sm:$0xff]  }
 0x46f   : > { %1621 = vadd.xlane.f32.xlu1 %v8184_v56  ;;  %1619 = vadd.xlane.f32.xlu0 %v8187_v32  ;;  %v1383_v48 = vpop.xlane.xlu0 %1382  ;;  %v8194_v54 = vpop.eup %7006  ;;  %v1814_v51 = vmul.f32 1.442695, %v1801_v26 }
 0x470   : > { %7016 = vpow2.f32 %v1607_v42  ;;  %v1392_v58 = vsub.f32 %v8055_v53, %v1383_v48  ;;  %v1795_v33 = vpop.xlane.xlu1 %1794  ;;  %6139 = vmatpush3.bf16.msra.mxu0 %v6819_v28  ;;  %v6821_v48 = vld [vmem:[%s7645_s29 + $0xb8] sm:$0xff]  }
 0x471   : > { %7018 = vpow2.f32 %v1408_v46  ;;  %v1803_v29 = vsub.f32 %v8060_v50, %v1795_v33  ;;  %v6820_v46 = vld [vmem:[%s7645_s29 + $0xf8] sm:$0xff]  }
 0x472   : > { %v8197_v35 = vpop.eup %7008  ;;  %v1406_v6 = vmul.f32 1.442695, %v1392_v58  ;;  %6140 = vmatprep.subr.bf16.mxu0 %v6820_v46 }
 0x473   : > { %1420 = vadd.xlane.f32.xlu1 %v8194_v54  ;;  %1418 = vadd.xlane.f32.xlu0 %v8197_v35  ;;  %v1789_v53 = vpop.xlane.xlu0 %1788  ;;  %v8204_v14 = vpop.eup %7010  ;;  %v1818_v50 = vmul.f32 1.442695, %v1803_v29 }
 0x474   : > { %7020 = vpow2.f32 %v1406_v6  ;;  %v1800_v36 = vsub.f32 %v8066_v55, %v1789_v53  ;;  %v1176_v4 = vpop.xlane.xlu1 %1175  ;;  %6141 = vmatpush3.bf16.msra.mxu0 %v6821_v48 }
 0x475   : > { %7022 = vpow2.f32 %v1814_v51  ;;  %v1184_v40 = vsub.f32 %v8072_v59, %v1176_v4 }
 0x476   : > { %v8207_v37 = vpop.eup %7012  ;;  %v1812_v30 = vmul.f32 1.442695, %v1800_v36 }
 0x477   : > { %1211 = vadd.xlane.f32.xlu1 %v8204_v14  ;;  %1209 = vadd.xlane.f32.xlu0 %v8207_v37  ;;  %v1793_v55 = vpop.xlane.xlu0 %1792  ;;  %v8214_v27 = vpop.eup %7014  ;;  %v1199_v59 = vmul.f32 1.442695, %v1184_v40 }
 0x478   : > { %7024 = vpow2.f32 %v1812_v30  ;;  %v1802_v18 = vsub.f32 %v8077_v45, %v1793_v55  ;;  %v1590_v19 = vpop.xlane.xlu1 %1589 }
 0x479   : > { %7026 = vpow2.f32 %v1818_v50  ;;  %v1598_v25 = vsub.f32 %v8083_v5, %v1590_v19 }
 0x47a   : > { %v8217_v43 = vpop.eup %7016  ;;  %v1816_v20 = vmul.f32 1.442695, %v1802_v18 }
 0x47b   : > { %1625 = vadd.xlane.f32.xlu1 %v8214_v27  ;;  %1623 = vadd.xlane.f32.xlu0 %v8217_v43  ;;  %v1174_v45 = vpop.xlane.xlu0 %1173  ;;  %v8224_v26 = vpop.eup %7018  ;;  %v1613_v1 = vmul.f32 1.442695, %v1598_v25 }
 0x47c   : > { %7028 = vpow2.f32 %v1816_v20  ;;  %v1183_v42 = vsub.f32 %v8089_v52, %v1174_v45  ;;  %v1204_v30 = vpop.xlane.xlu1 %1203 }
 0x47d   : > { %7030 = vpow2.f32 %v1199_v59 }
 0x47e   : > { %v8227_v58 = vpop.eup %7020  ;;  %v1197_v33 = vmul.f32 1.442695, %v1183_v42 }
 0x47f   : > { %1424 = vadd.xlane.f32.xlu1 %v8224_v26  ;;  %1422 = vadd.xlane.f32.xlu0 %v8227_v58  ;;  %v1588_v5 = vpop.xlane.xlu0 %1587  ;;  %v8232_v52 = vpop.eup %7022 }
 0x480   : > { %7032 = vpow2.f32 %v1197_v33  ;;  %v1597_v57 = vsub.f32 %v8098_v12, %v1588_v5 }
 0x481   : > { %7034 = vpow2.f32 %v1613_v1 }
 0x482   : > { %v8234_v6 = vpop.eup %7024  ;;  %v1611_v51 = vmul.f32 1.442695, %v1597_v57 }
 0x483   : > { %1830 = vadd.xlane.f32.xlu1 %v8232_v52  ;;  %1828 = vadd.xlane.f32.xlu0 %v8234_v6  ;;  %v8238_v29 = vpop.eup %7026  ;;  %v1202_v17 = vpop.xlane.xlu0 %1201 }
 0x484   : > { %7036 = vpow2.f32 %v1611_v51 }
 0x485   : > { %7038 = vrcp.f32 %v1204_v30 }
 0x486   : > { %v8240_v53 = vpop.eup %7028  ;;  %7040 = vrcp.f32 %v1202_v17 }
 0x487   : > { %1834 = vadd.xlane.f32.xlu1 %v8238_v29  ;;  %1832 = vadd.xlane.f32.xlu0 %v8240_v53  ;;  %v8244_v12 = vpop.eup %7030 }
 0x48a   : > { %v8246_v36 = vpop.eup %7032 }
 0x48b   : > { %1215 = vadd.xlane.f32.xlu1 %v8244_v12  ;;  %1213 = vadd.xlane.f32.xlu0 %v8246_v36  ;;  %v8250_v4 = vpop.eup %7034 }
 0x48e   : > { %v8252_v31 = vpop.eup %7036 }
 0x48f   : > { %1629 = vadd.xlane.f32.xlu1 %v8250_v4  ;;  %1627 = vadd.xlane.f32.xlu0 %v8252_v31  ;;  %v7039_v19 = vpop.eup %7038 }
 0x490   : > { %v7041_v41 = vpop.eup %7040  ;;  %v1226_v33 = vmul.f32 %v7039_v19, %v8091_v60 }
 0x491   : > { %v1225_v45 = vmul.f32 %v7041_v41, %v8101_v0 }
 0x493   : > { %v1852_v57 = vpack.c.bf16 %v1226_v33, %v1225_v45 }
 0x4ab   : > { %v1415_v50 = vpop.xlane.xlu0 %1414 }
 0x4ad   : > { %v1417_v40 = vpop.xlane.xlu1 %1416 }
 0x4ae   : > { %7042 = vrcp.f32 %v1417_v40 }
 0x4af   : > { %v1411_v55 = vpop.xlane.xlu0 %1410 }
 0x4b0   : > { %7044 = vrcp.f32 %v1411_v55 }
 0x4b1   : > { %7046 = vrcp.f32 %v1415_v50  ;;  %v1413_v18 = vpop.xlane.xlu1 %1412 }
 0x4b2   : > { %7048 = vrcp.f32 %v1413_v18 }
 0x4b8   : > { %v7043_v28 = vpop.eup %7042 }
 0x4b9   : > { %v1437_v48 = vmul.f32 %v7043_v28, %v8117_v47 }
 0x4ba   : > { %v7045_v20 = vpop.eup %7044 }
 0x4bb   : > { %v7047_v59 = vpop.eup %7046  ;;  %v1434_v42 = vmul.f32 %v7045_v20, %v8121_v3  ;;  %v1616_v17 = vpop.xlane.xlu0 %1615 }
 0x4bc   : > { %v7049_v25 = vpop.eup %7048  ;;  %v1436_v5 = vmul.f32 %v7047_v59, %v8114_v44 }
 0x4bd   : > { %v1435_v46 = vmul.f32 %v7049_v25, %v8125_v2  ;;  %v1618_v30 = vpop.xlane.xlu1 %1617 }
 0x4be   : > { %v1857_v51 = vpack.c.bf16 %v1437_v48, %v1436_v5  ;;  %7050 = vrcp.f32 %v1618_v30 }
 0x4bf   : > { %v1853_v1 = vpack.c.bf16 %v1435_v46, %v1434_v42 }
 0x4c1   : > { %2156 = vmatprep.mubr.bf16.mxu1 %v1853_v1 }
 0x4c2   : > { %2157 = vmatmul.mubr.bf16.vlgmr.msra.gmra.mrb[16].mxu1 %v1852_v57 }
 0x4c3   : > { %2164 = vmatprep.mubr.bf16.mxu1 %v1857_v51 }
 0x4c8   : > { %v7051_v60 = vpop.eup %7050 }
 0x4c9   : > { %v1640_v19 = vmul.f32 %v7051_v60, %v8133_v13 }
 0x4ec   : > { %v1821_v50 = vpop.xlane.xlu0 %1820 }
 0x4ed   : > { %7052 = vrcp.f32 %v1821_v50 }
 0x4ee   : > { %7054 = vrcp.f32 %v1616_v17 }
 0x4f0   : > { %v1823_v0 = vpop.xlane.xlu1 %1822 }
 0x4f1   : > { %7056 = vrcp.f32 %v1823_v0 }
 0x4f4   : > { %v1827_v3 = vpop.xlane.xlu1 %1826  ;;  %v1825_v47 = vpop.xlane.xlu0 %1824 }
 0x4f5   : > { %7058 = vrcp.f32 %v1827_v3 }
 0x4f6   : > { %7060 = vrcp.f32 %v1825_v47 }
 0x4f7   : > { %v7053_v40 = vpop.eup %7052 }
 0x4f8   : > { %v1208_v2 = vpop.xlane.xlu1 %1207  ;;  %v1206_v44 = vpop.xlane.xlu0 %1205  ;;  %v1844_v20 = vmul.f32 %v7053_v40, %v8157_v38 }
 0x4f9   : > { %7062 = vrcp.f32 %v1208_v2  ;;  %v7055_v55 = vpop.eup %7054 }
 0x4fa   : > { %7064 = vrcp.f32 %v1206_v44  ;;  %v1639_v25 = vmul.f32 %v7055_v55, %v8128_v11 }
 0x4fb   : > { %v7057_v18 = vpop.eup %7056 }
 0x4fc   : > { %v1622_v41 = vpop.xlane.xlu1 %1621  ;;  %v1620_v28 = vpop.xlane.xlu0 %1619  ;;  %v1845_v59 = vmul.f32 %v7057_v18, %v8162_v34  ;;  %v1854_v46 = vpack.c.bf16 %v1640_v19, %v1639_v25 }
 0x4fd   : > { %7066 = vrcp.f32 %v1622_v41 }
 0x4fe   : > { %7068 = vrcp.f32 %v1620_v28  ;;  %v1855_v45 = vpack.c.bf16 %v1845_v59, %v1844_v20 }
 0x4ff   : > { %v7059_v42 = vpop.eup %7058 }
 0x500   : > { %v7061_v48 = vpop.eup %7060  ;;  %v1421_v33 = vpop.xlane.xlu1 %1420  ;;  %2221 = vmatprep.mubr.bf16.mxu0 %v1855_v45  ;;  %v1847_v5 = vmul.f32 %v7059_v42, %v8167_v10 }
 0x501   : > { %v1419_v1 = vpop.xlane.xlu0 %1418  ;;  %7070 = vrcp.f32 %v1421_v33  ;;  %2222 = vmatmul.mubr.bf16.vlgmr.msra.gmra.mrb[24].mxu0 %v1854_v46  ;;  %v1846_v13 = vmul.f32 %v7061_v48, %v8169_v7 }
 0x502   : > { %7072 = vrcp.f32 %v1419_v1 }
 0x503   : > { %v7063_v38 = vpop.eup %7062  ;;  %v1859_v34 = vpack.c.bf16 %v1847_v5, %v1846_v13 }
 0x504   : > { %v7065_v57 = vpop.eup %7064  ;;  %v1212_v11 = vpop.xlane.xlu1 %1211  ;;  %v1228_v17 = vmul.f32 %v7063_v38, %v8175_v62 }
 0x505   : > { %v1210_v51 = vpop.xlane.xlu0 %1209  ;;  %7074 = vrcp.f32 %v1212_v11  ;;  %2229 = vmatprep.mubr.bf16.mxu0 %v1859_v34  ;;  %v1227_v30 = vmul.f32 %v7065_v57, %v8177_v63 }
 0x506   : > { %7076 = vrcp.f32 %v1210_v51 }
 0x507   : > { %v7067_v50 = vpop.eup %7066  ;;  %v1856_v0 = vpack.c.bf16 %v1228_v17, %v1227_v30 }
 0x508   : > { %v7069_v10 = vpop.eup %7068  ;;  %v1626_v3 = vpop.xlane.xlu1 %1625  ;;  %v1642_v7 = vmul.f32 %v7067_v50, %v8184_v56 }
 0x509   : > { %v1624_v47 = vpop.xlane.xlu0 %1623  ;;  %2165 = vmatmul.mubr.bf16.gmra.mrb[20].mxu1 %v1856_v0  ;;  %v1641_v60 = vmul.f32 %v7069_v10, %v8187_v32  ;;  %7078 = vrcp.f32 %v1626_v3 }
 0x50b   : > { %v7071_v2 = vpop.eup %7070  ;;  %v1858_v44 = vpack.c.bf16 %v1642_v7, %v1641_v60 }
 0x50c   : > { %v7073_v40 = vpop.eup %7072  ;;  %v1425_v62 = vpop.xlane.xlu1 %1424  ;;  %v1439_v18 = vmul.f32 %v7071_v2, %v8194_v54 }
 0x50d   : > { %v1423_v55 = vpop.xlane.xlu0 %1422  ;;  %7080 = vrcp.f32 %v1425_v62  ;;  %2230 = vmatmul.mubr.bf16.gmra.mrb[28].mxu0 %v1858_v44  ;;  %v1438_v63 = vmul.f32 %v7073_v40, %v8197_v35 }
 0x50e   : > { %7082 = vrcp.f32 %v1423_v55 }
 0x50f   : > { %v7075_v19 = vpop.eup %7074  ;;  %7084 = vrcp.f32 %v1624_v47  ;;  %v1861_v41 = vpack.c.bf16 %v1439_v18, %v1438_v63 }
 0x510   : > { %v7077_v56 = vpop.eup %7076  ;;  %v1831_v28 = vpop.xlane.xlu1 %1830  ;;  %v1230_v32 = vmul.f32 %v7075_v19, %v8204_v14 }
 0x511   : > { %v1829_v20 = vpop.xlane.xlu0 %1828  ;;  %7086 = vrcp.f32 %v1831_v28  ;;  %2172 = vmatprep.mubr.bf16.mxu1 %v1861_v41  ;;  %v1229_v59 = vmul.f32 %v7077_v56, %v8207_v37 }
 0x512   : > { %7088 = vrcp.f32 %v1829_v20 }
 0x513   : > { %v1860_v25 = vpack.c.bf16 %v1230_v32, %v1229_v59  ;;  %v7079_v35 = vpop.eup %7078 }
 0x514   : > { %v1835_v54 = vpop.xlane.xlu1 %1834  ;;  %v1644_v17 = vmul.f32 %v7079_v35, %v8214_v27 }
 0x515   : > { %v1833_v45 = vpop.xlane.xlu0 %1832  ;;  %7090 = vrcp.f32 %v1835_v54  ;;  %2173 = vmatmul.mubr.bf16.gmra.mrb[24].mxu1 %v1860_v25 }
 0x516   : > { %7092 = vrcp.f32 %v1833_v45 }
 0x517   : > { %v7081_v42 = vpop.eup %7080 }
 0x518   : > { %v7083_v46 = vpop.eup %7082  ;;  %v1216_v48 = vpop.xlane.xlu1 %1215  ;;  %v1441_v1 = vmul.f32 %v7081_v42, %v8224_v26 }
 0x519   : > { %v1214_v33 = vpop.xlane.xlu0 %1213  ;;  %v7085_v5 = vpop.eup %7084  ;;  %7094 = vrcp.f32 %v1216_v48  ;;  %v1440_v14 = vmul.f32 %v7083_v46, %v8227_v58 }
 0x51a   : > { %7096 = vrcp.f32 %v1214_v33  ;;  %v1643_v51 = vmul.f32 %v7085_v5, %v8217_v43 }
 0x51b   : > { %v7087_v37 = vpop.eup %7086  ;;  %v1865_v13 = vpack.c.bf16 %v1441_v1, %v1440_v14 }
 0x51c   : > { %v7089_v38 = vpop.eup %7088  ;;  %v1630_v34 = vpop.xlane.xlu1 %1629  ;;  %v1849_v11 = vmul.f32 %v7087_v37, %v8232_v52  ;;  %v1862_v0 = vpack.c.bf16 %v1644_v17, %v1643_v51 }
 0x51d   : > { %v1628_v57 = vpop.xlane.xlu0 %1627  ;;  %7098 = vrcp.f32 %v1630_v34  ;;  %2180 = vmatprep.mubr.bf16.mxu1 %v1865_v13  ;;  %v1848_v26 = vmul.f32 %v7089_v38, %v8234_v6 }
 0x51e   : > { %7100 = vrcp.f32 %v1628_v57 }
 0x51f   : > { %v7091_v30 = vpop.eup %7090  ;;  %v1863_v50 = vpack.c.bf16 %v1849_v11, %v1848_v26 }
 0x520   : > { %v7093_v58 = vpop.eup %7092  ;;  %v1851_v10 = vmul.f32 %v7091_v30, %v8238_v29 }
 0x521   : > { %2237 = vmatprep.mubr.bf16.mxu0 %v1863_v50  ;;  %v1850_v3 = vmul.f32 %v7093_v58, %v8240_v53 }
 0x522   : > { %2238 = vmatmul.mubr.bf16.gmra.mrb[32].mxu0 %v1862_v0 }
 0x523   : > { %v7095_v52 = vpop.eup %7094  ;;  %v1867_v47 = vpack.c.bf16 %v1851_v10, %v1850_v3 }
 0x524   : > { %v7097_v43 = vpop.eup %7096  ;;  %v1232_v27 = vmul.f32 %v7095_v52, %v8244_v12 }
 0x525   : > { %2245 = vmatprep.mubr.bf16.mxu0 %v1867_v47  ;;  %v1231_v7 = vmul.f32 %v7097_v43, %v8246_v36 }
 0x527   : > { %v7099_v6 = vpop.eup %7098  ;;  %v1864_v60 = vpack.c.bf16 %v1232_v27, %v1231_v7 }
 0x528   : > { %v7101_v2 = vpop.eup %7100  ;;  %v1646_v44 = vmul.f32 %v7099_v6, %v8250_v4  ;;  %v8291_v4 = vld [vmem:[%s9619_s7] ss:$0 sm:$0xff] }
 0x529   : > { %2181 = vmatmul.mubr.bf16.gmra.mrb[28].mxu1 %v1864_v60  ;;  %v1645_v29 = vmul.f32 %v7101_v2, %v8252_v31 }
 0x52b   : > { %v1866_v40 = vpack.c.bf16 %v1646_v44, %v1645_v29 }
 0x52d   : > { %2246 = vmatmul.mubr.bf16.gmra.mrb[36].mxu0 %v1866_v40 }
 0x595   : > { %v6102_v53 = vpop.f32.mrb[16].mxu1 }
 0x596   : > { %v6103_v62 = vpop.f32.mrb[17].mxu1 }
 0x597   : > { %v6104_v55 = vadd.f32 %v6103_v62, %v6102_v53  ;;  %v6105_v18 = vpop.f32.mrb[18].mxu1 }
 0x598   : > { %v6106_v63 = vpop.f32.mrb[19].mxu1 }
 0x599   : > { %v6107_v19 = vadd.f32 %v6106_v63, %v6105_v18 }
 0x5d4   : > { %v6142_v12 = vpop.f32.mrb[24].mxu0 }
 0x5d5   : > { %v6143_v41 = vpop.f32.mrb[25].mxu0 }
 0x5d6   : > { %v6144_v56 = vadd.f32 %v6143_v41, %v6142_v12  ;;  %v6145_v36 = vpop.f32.mrb[26].mxu0 }
 0x5d7   : > { %v6146_v28 = vpop.f32.mrb[27].mxu0 }
 0x5d8   : > { %v2224_v20 = vadd.f32 %v6144_v56, %v6104_v55  ;;  %v6147_v32 = vadd.f32 %v6146_v28, %v6145_v36 }
 0x5da   : > { %v2254_v31 = vadd.f32 %v2224_v20, %v7608_v8  ;;  %v2227_v59 = vadd.f32 %v6147_v32, %v6107_v19 }
 0x5dc   : > { %v2255_v25 = vadd.f32 %v2227_v59, %v7621_v15  ;;  %v6108_v54 = vpop.f32.mrb[20].mxu1  ;;  %v8296_v45 = vadd.f32 %v8291_v4, %v2254_v31  ;;  %v6822_v59 = vld [vmem:[%s9621_s9] ss:$8 sps:$4 sm:$0xff]  }
 0x5dd   : > { %v6109_v35 = vpop.f32.mrb[21].mxu1 }
 0x5de   : > { %v6110_v42 = vadd.f32 %v6109_v35, %v6108_v54  ;;  %v6111_v46 = vpop.f32.mrb[22].mxu1  ;;  %2278 = vadd.xlane.f32.xlu0 %v8296_v45  ;;  %v8300_v48 = vadd.f32 %v8291_v4, %v2255_v25 }
 0x5df   : > { %v6112_v33 = vpop.f32.mrb[23].mxu1 }
 0x5e0   : > { %v6113_v1 = vadd.f32 %v6112_v33, %v6111_v46  ;;  %v6148_v5 = vpop.f32.mrb[28].mxu0  ;;  %2280 = vadd.xlane.f32.xlu1 %v8300_v48 }
 0x5e1   : > { %v6149_v8 = vpop.f32.mrb[29].mxu0 }
 0x5e2   : > { %v6150_v14 = vadd.f32 %v6149_v8, %v6148_v5  ;;  %v6151_v15 = vpop.f32.mrb[30].mxu0 }
 0x5e3   : > { %v6152_v37 = vpop.f32.mrb[31].mxu0 }
 0x5e4   : > { %v2232_v13 = vadd.f32 %v6150_v14, %v6110_v42  ;;  %v6153_v38 = vadd.f32 %v6152_v37, %v6151_v15 }
 0x5e6   : > { %v2256_v34 = vadd.f32 %v2232_v13, %v7610_v9  ;;  %v2235_v57 = vadd.f32 %v6153_v38, %v6113_v1 }
 0x5e8   : > { %v2257_v11 = vadd.f32 %v2235_v57, %v7623_v16  ;;  %v6114_v51 = vpop.f32.mrb[24].mxu1  ;;  %v8306_v17 = vadd.f32 %v8291_v4, %v2256_v34 }
 0x5e9   : > { %v6115_v26 = vpop.f32.mrb[25].mxu1 }
 0x5ea   : > { %v6116_v30 = vadd.f32 %v6115_v26, %v6114_v51  ;;  %2282 = vadd.xlane.f32.xlu0 %v8306_v17  ;;  %v6117_v50 = vpop.f32.mrb[26].mxu1  ;;  %v8310_v58 = vadd.f32 %v8291_v4, %v2257_v11  ;;  %v6830_v11 = vld [vmem:[%s9621_s9 + $0x24] ss:$8 sps:$4 sm:$0xff]   ;;  %v6828_v51 = vld [vmem:[%s9621_s9 + $0x20] ss:$8 sps:$4 sm:$0xff]  }
 0x5eb   : > { %v6118_v0 = vpop.f32.mrb[27].mxu1  ;;  %v6833_v26 = vld [vmem:[%s9621_s9 + $0x34] ss:$8 sps:$4 sm:$0xff]  }
 0x5ec   : > { %v6119_v10 = vadd.f32 %v6118_v0, %v6117_v50  ;;  %2284 = vadd.xlane.f32.xlu1 %v8310_v58  ;;  %v6836_v50 = vld [vmem:[%s9621_s9 + $0x44] ss:$8 sps:$4 sm:$0xff]   ;;  %v6834_v0 = vld [vmem:[%s9621_s9 + $0x40] ss:$8 sps:$4 sm:$0xff]  }
 0x5f5   : > { %v6154_v9 = vpop.f32.mrb[32].mxu0 }
 0x5f6   : > { %v6155_v3 = vpop.f32.mrb[33].mxu0 }
 0x5f7   : > { %v6156_v52 = vadd.f32 %v6155_v3, %v6154_v9  ;;  %v6157_v16 = vpop.f32.mrb[34].mxu0  ;;  %v6839_v9 = vld [vmem:[%s9621_s9 + $0x54] ss:$8 sps:$4 sm:$0xff]  }
 0x5f8   : > { %v6158_v47 = vpop.f32.mrb[35].mxu0 }
 0x5f9   : > { %v2240_v43 = vadd.f32 %v6156_v52, %v6116_v30  ;;  %v6159_v27 = vadd.f32 %v6158_v47, %v6157_v16  ;;  %v6831_v30 = vld [vmem:[%s9621_s9 + $0x30] ss:$8 sps:$4 sm:$0xff]  }
 0x5fa   : > { %v6837_v52 = vld [vmem:[%s9621_s9 + $0x50] ss:$8 sps:$4 sm:$0xff]  }
 0x5fb   : > { %v2258_v7 = vadd.f32 %v2240_v43, %v7638_v21  ;;  %v2243_v6 = vadd.f32 %v6159_v27, %v6119_v10  ;;  %v6842_v27 = vld [vmem:[%s9621_s9 + $0x64] ss:$8 sps:$4 sm:$0xff]  }
 0x5fc   : > { %v6120_v60 = vpop.f32.mrb[28].mxu1 }
 0x5fd   : > { %v2259_v2 = vadd.f32 %v2243_v6, %v7640_v22  ;;  %v6121_v44 = vpop.f32.mrb[29].mxu1  ;;  %v8316_v29 = vadd.f32 %v8291_v4, %v2258_v7 }
 0x5fe   : > { %v6122_v40 = vadd.f32 %v6121_v44, %v6120_v60  ;;  %v6123_v53 = vpop.f32.mrb[30].mxu1  ;;  %v6840_v60 = vld [vmem:[%s9621_s9 + $0x60] ss:$8 sps:$4 sm:$0xff]   ;;  %v6843_v44 = vld [vmem:[%s9621_s9 + $0x70] ss:$8 sps:$4 sm:$0xff]  }
 0x5ff   : > { %2286 = vadd.xlane.f32.xlu0 %v8316_v29  ;;  %v6124_v62 = vpop.f32.mrb[31].mxu1  ;;  %v8320_v55 = vadd.f32 %v8291_v4, %v2259_v2 }
 0x600   : > { %v6125_v18 = vadd.f32 %v6124_v62, %v6123_v53  ;;  %v6160_v63 = vpop.f32.mrb[36].mxu0  ;;  %v9639_v53 = vmov 0  }
 0x601   : > { %2288 = vadd.xlane.f32.xlu1 %v8320_v55  ;;  %v6161_v21 = vpop.f32.mrb[37].mxu0  ;;  %2534 = vmatprep.mubr.bf16.mxu1 %v9639_v53 }
 0x602   : > { %v6162_v19 = vadd.f32 %v6161_v21, %v6160_v63  ;;  %v6163_v12 = vpop.f32.mrb[38].mxu0  ;;  %6773 = vset.pattern.permute.xlu0 %v9639_v53 }
 0x603   : > { %v6164_v22 = vpop.f32.mrb[39].mxu0 }
 0x604   : > { %v2248_v41 = vadd.f32 %v6162_v19, %v6122_v40  ;;  %v6165_v56 = vadd.f32 %v6164_v22, %v6163_v12  ;;  %v6845_v40 = vld [vmem:[%s9621_s9 + $0x74] ss:$8 sps:$4 sm:$0xff]  }
 0x606   : > { %v2260_v36 = vadd.f32 %v2248_v41, %v7649_v23  ;;  %v2251_v28 = vadd.f32 %v6165_v56, %v6125_v18  ;;  %v6824_v23 = vld [vmem:[%s9621_s9 + $0x4] ss:$8 sps:$4 sm:$0xff]  }
 0x607   : > { %2502 = vmatprep.subr.bf16.mxu1 %v6824_v23 }
 0x608   : > { %v2261_v20 = vadd.f32 %v2251_v28, %v7651_v24  ;;  %v8326_v32 = vadd.f32 %v8291_v4, %v2260_v36  ;;  %v6827_v24 = vld [vmem:[%s9621_s9 + $0x14] ss:$8 sps:$4 sm:$0xff]   ;;  %2503 = vmatpush1.bf16.msra.mxu1 %v6822_v59 }
 0x609   : > { %2504 = vmatprep.subr.bf16.mxu1 %v6827_v24  ;;  %v2277_v24 = vld [vmem:[%s9620_s8] sm:$0x3] }
 0x60a   : > { %2290 = vadd.xlane.f32.xlu0 %v8326_v32  ;;  %v8330_v31 = vadd.f32 %v8291_v4, %v2261_v20  ;;  %v6825_v4 = vld [vmem:[%s9621_s9 + $0x10] ss:$8 sps:$4 sm:$0xff]  }
 0x60c   : > { %2292 = vadd.xlane.f32.xlu1 %v8330_v31  ;;  %2505 = vmatpush1.bf16.msra.mxu1 %v6825_v4 }
 0x60d   : > { %2506 = vmatprep.subr.bf16.mxu1 %v6830_v11 }
 0x610   : > { %2507 = vmatpush1.bf16.msra.mxu1 %v6828_v51 }
 0x611   : > { %2508 = vmatprep.subr.bf16.mxu1 %v6833_v26 }
 0x614   : > { %2509 = vmatpush1.bf16.msra.mxu1 %v6831_v30 }
 0x615   : > { %2510 = vmatprep.subr.bf16.mxu1 %v6836_v50 }
 0x618   : > { %2511 = vmatpush1.bf16.msra.mxu1 %v6834_v0 }
 0x619   : > { %2512 = vmatprep.subr.bf16.mxu1 %v6839_v9 }
 0x61c   : > { %2513 = vmatpush1.bf16.msra.mxu1 %v6837_v52 }
 0x61d   : > { %2514 = vmatprep.subr.bf16.mxu1 %v6842_v27 }
 0x620   : > { %2515 = vmatpush1.bf16.msra.mxu1 %v6840_v60 }
 0x621   : > { %2516 = vmatprep.subr.bf16.mxu1 %v6845_v40 }
 0x624   : > { %2517 = vmatpush1.bf16.msra.mxu1 %v6843_v44 }
 0x66b   : > { %v2279_v25 = vpop.xlane.xlu0 %2278 }
 0x66c   : > { %v2294_v54 = vmul.f32 0.0078125, %v2279_v25 }
 0x66d   : > { %v2281_v35 = vpop.xlane.xlu1 %2280 }
 0x66e   : > { %v8346_v42 = vsub.f32 %v8296_v45, %v2294_v54  ;;  %v2295_v46 = vmul.f32 0.0078125, %v2281_v35  ;;  %v2369_v54 = vrot.slane %v2277_v24, %v7799_v49 }
 0x670   : > { %v8349_v33 = vsub.f32 %v8300_v48, %v2295_v46  ;;  %v2310_v1 = vmul.f32 %v8346_v42, %v8346_v42 }
 0x672   : > { %2318 = vadd.xlane.f32.xlu0 %v2310_v1  ;;  %v2311_v5 = vmul.f32 %v8349_v33, %v8349_v33 }
 0x674   : > { %2320 = vadd.xlane.f32.xlu1 %v2311_v5 }
 0x677   : > { %v2283_v8 = vpop.xlane.xlu0 %2282 }
 0x678   : > { %v2296_v14 = vmul.f32 0.0078125, %v2283_v8 }
 0x679   : > { %v2285_v15 = vpop.xlane.xlu1 %2284 }
 0x67a   : > { %v8356_v37 = vsub.f32 %v8306_v17, %v2296_v14  ;;  %v2297_v13 = vmul.f32 0.0078125, %v2285_v15 }
 0x67c   : > { %v8359_v38 = vsub.f32 %v8310_v58, %v2297_v13  ;;  %v2312_v34 = vmul.f32 %v8356_v37, %v8356_v37 }
 0x67e   : > { %2322 = vadd.xlane.f32.xlu0 %v2312_v34  ;;  %v2313_v57 = vmul.f32 %v8359_v38, %v8359_v38 }
 0x680   : > { %2324 = vadd.xlane.f32.xlu1 %v2313_v57  ;;  %v2381_v57 = vrot.slane %v2277_v24, %v7806_v61 }
 0x68c   : > { %v2287_v10 = vpop.xlane.xlu0 %2286 }
 0x68d   : > { %v2298_v3 = vmul.f32 0.0078125, %v2287_v10 }
 0x68e   : > { %v2289_v16 = vpop.xlane.xlu1 %2288 }
 0x68f   : > { %v8390_v47 = vsub.f32 %v8316_v29, %v2298_v3  ;;  %v2299_v43 = vmul.f32 0.0078125, %v2289_v16 }
 0x691   : > { %v8396_v7 = vsub.f32 %v8320_v55, %v2299_v43  ;;  %v2314_v6 = vmul.f32 %v8390_v47, %v8390_v47 }
 0x693   : > { %2326 = vadd.xlane.f32.xlu0 %v2314_v6  ;;  %v2315_v2 = vmul.f32 %v8396_v7, %v8396_v7 }
 0x695   : > { %2328 = vadd.xlane.f32.xlu1 %v2315_v2 }
 0x697   : > { %v2291_v62 = vpop.xlane.xlu0 %2290 }
 0x698   : > { %v2300_v18 = vmul.f32 0.0078125, %v2291_v62 }
 0x699   : > { %v2293_v63 = vpop.xlane.xlu1 %2292 }
 0x69a   : > { %v8414_v21 = vsub.f32 %v8326_v32, %v2300_v18  ;;  %v2301_v19 = vmul.f32 0.0078125, %v2293_v63 }
 0x69c   : > { %v8417_v12 = vsub.f32 %v8330_v31, %v2301_v19  ;;  %v2316_v22 = vmul.f32 %v8414_v21, %v8414_v21 }
 0x69e   : > { %2330 = vadd.xlane.f32.xlu0 %v2316_v22  ;;  %v2317_v41 = vmul.f32 %v8417_v12, %v8417_v12 }
 0x6a0   : > { %2332 = vadd.xlane.f32.xlu1 %v2317_v41 }
 0x6ff   : > { %v2319_v56 = vpop.xlane.xlu0 %2318 }
 0x700   : > { %v2334_v36 = vmul.f32 0.0078125, %v2319_v56 }
 0x701   : > { %v2321_v28 = vpop.xlane.xlu1 %2320 }
 0x702   : > { %v2342_v20 = vadd.f32 1e-06, %v2334_v36  ;;  %v2335_v59 = vmul.f32 0.0078125, %v2321_v28 }
 0x704   : > { %7102 = vrsqrt.f32 %v2342_v20  ;;  %v2343_v23 = vadd.f32 1e-06, %v2335_v59 }
 0x706   : > { %7104 = vrsqrt.f32 %v2343_v23 }
 0x70b   : > { %v2323_v4 = vpop.xlane.xlu0 %2322 }
 0x70c   : > { %v2336_v25 = vmul.f32 0.0078125, %v2323_v4 }
 0x70d   : > { %v2325_v35 = vpop.xlane.xlu1 %2324 }
 0x70e   : > { %v7103_v46 = vpop.eup %7102  ;;  %v2344_v1 = vadd.f32 1e-06, %v2336_v25  ;;  %v2337_v5 = vmul.f32 0.0078125, %v2325_v35 }
 0x70f   : > { %v2358_v8 = vmul.f32 %v7103_v46, %v8346_v42 }
 0x710   : > { %v7105_v14 = vpop.eup %7104  ;;  %7106 = vrsqrt.f32 %v2344_v1  ;;  %v2345_v15 = vadd.f32 1e-06, %v2337_v5 }
 0x711   : > { %v2370_v13 = vmul.f32 %v2369_v54, %v2358_v8  ;;  %v2359_v34 = vmul.f32 %v7105_v14, %v8349_v33  ;;  %v6847_v14 = vld [vmem:[%s9623_s11] sm:$0xff]  }
 0x712   : > { %7108 = vrsqrt.f32 %v2345_v15  ;;  %v6851_v15 = vld [vmem:[%s9623_s11 + $0x10] sm:$0xff]  }
 0x713   : > { %v2371_v11 = vmul.f32 %v2369_v54, %v2359_v34  ;;  %v2382_v51 = vadd.f32 %v2381_v57, %v2370_v13  ;;  %v6852_v13 = vld [vmem:[%s9623_s11 + $0x58] sm:$0xff]  }
 0x714   : > { %v6853_v34 = vld [vmem:[%s9623_s11 + $0x18] sm:$0xff]  }
 0x715   : > { %v2383_v26 = vadd.f32 %v2381_v57, %v2371_v11  ;;  %v6855_v11 = vld [vmem:[%s9623_s11 + $0x20] sm:$0xff]  }
 0x717   : > { %v2390_v30 = vpack.c.bf16 %v2383_v26, %v2382_v51  ;;  %v6856_v51 = vld [vmem:[%s9623_s11 + $0x68] sm:$0xff]  }
 0x718   : > { %v6857_v26 = vld [vmem:[%s9623_s11 + $0x28] sm:$0xff]  }
 0x719   : > { %2535 = vmatmul.mubr.bf16.vlgmr.msra.gmra.mrb[32].mxu1 %v2390_v30  ;;  %v6858_v30 = vld [vmem:[%s9623_s11 + $0x70] sm:$0xff]  }
 0x71a   : > { %v7107_v50 = vpop.eup %7106  ;;  %2544 = vmatprep.mubr.bf16.mxu1 %v9639_v53 }
 0x71b   : > { %v2360_v0 = vmul.f32 %v7107_v50, %v8356_v37  ;;  %v6859_v50 = vld [vmem:[%s9623_s11 + $0x30] sm:$0xff]  }
 0x71c   : > { %v7109_v42 = vpop.eup %7108 }
 0x71d   : > { %v2361_v10 = vmul.f32 %v7109_v42, %v8359_v38  ;;  %v2372_v9 = vmul.f32 %v2369_v54, %v2360_v0  ;;  %v6860_v0 = vld [vmem:[%s9623_s11 + $0x78] sm:$0xff]  }
 0x71e   : > { %v6861_v42 = vld [vmem:[%s9623_s11 + $0x38] sm:$0xff]  }
 0x71f   : > { %v2373_v3 = vmul.f32 %v2369_v54, %v2361_v10  ;;  %v2384_v16 = vadd.f32 %v2381_v57, %v2372_v9  ;;  %v2410_v10 = vld [vmem:[%s9622_s10] sm:$0x3] }
 0x720   : > { %v2327_v52 = vpop.xlane.xlu0 %2326  ;;  %v8491_v9 = vrot.slane %v2410_v10, %v7799_v49 }
 0x721   : > { %v2338_v33 = vmul.f32 0.0078125, %v2327_v52  ;;  %v2385_v43 = vadd.f32 %v2381_v57, %v2373_v3  ;;  %v8494_v3 = vrot.slane %v2410_v10, %v7806_v61 }
 0x722   : > { %v2329_v27 = vpop.xlane.xlu1 %2328 }
 0x723   : > { %v2346_v6 = vadd.f32 1e-06, %v2338_v33  ;;  %v2339_v60 = vmul.f32 0.0078125, %v2329_v27  ;;  %v2391_v2 = vpack.c.bf16 %v2385_v43, %v2384_v16 }
 0x725   : > { %7110 = vrsqrt.f32 %v2346_v6  ;;  %v2347_v44 = vadd.f32 1e-06, %v2339_v60  ;;  %2545 = vmatmul.mubr.bf16.gmra.mrb[36].mxu1 %v2391_v2 }
 0x726   : > { %2554 = vmatprep.mubr.bf16.mxu1 %v9639_v53 }
 0x727   : > { %7112 = vrsqrt.f32 %v2347_v44 }
 0x72b   : > { %v2331_v37 = vpop.xlane.xlu0 %2330 }
 0x72c   : > { %v2340_v40 = vmul.f32 0.0078125, %v2331_v37 }
 0x72d   : > { %v2333_v62 = vpop.xlane.xlu1 %2332 }
 0x72e   : > { %v2348_v38 = vadd.f32 1e-06, %v2340_v40  ;;  %v2341_v18 = vmul.f32 0.0078125, %v2333_v62 }
 0x72f   : > { %v7111_v63 = vpop.eup %7110 }
 0x730   : > { %7114 = vrsqrt.f32 %v2348_v38  ;;  %v2349_v19 = vadd.f32 1e-06, %v2341_v18  ;;  %v2362_v22 = vmul.f32 %v7111_v63, %v8390_v47 }
 0x731   : > { %v7113_v41 = vpop.eup %7112 }
 0x732   : > { %7116 = vrsqrt.f32 %v2349_v19  ;;  %v2363_v56 = vmul.f32 %v7113_v41, %v8396_v7  ;;  %v2374_v36 = vmul.f32 %v2369_v54, %v2362_v22  ;;  %v6846_v7 = vld [vmem:[%s9623_s11 + $0x40] sm:$0xff]  }
 0x733   : > { %6166 = vmatprep.subr.bf16.mxu0 %v6846_v7 }
 0x734   : > { %v2375_v28 = vmul.f32 %v2369_v54, %v2363_v56  ;;  %v2386_v20 = vadd.f32 %v2381_v57, %v2374_v36  ;;  %6167 = vmatpush3.bf16.msra.mxu0 %v6847_v14 }
 0x736   : > { %v2387_v59 = vadd.f32 %v2381_v57, %v2375_v28 }
 0x738   : > { %v2392_v23 = vpack.c.bf16 %v2387_v59, %v2386_v20 }
 0x73a   : > { %v7115_v24 = vpop.eup %7114  ;;  %2555 = vmatmul.mubr.bf16.gmra.mrb[40].mxu1 %v2392_v23 }
 0x73b   : > { %2564 = vmatprep.mubr.bf16.mxu1 %v9639_v53  ;;  %v2364_v4 = vmul.f32 %v7115_v24, %v8414_v21  ;;  %v6848_v21 = vld [vmem:[%s9623_s11 + $0x48] sm:$0xff]  }
 0x73c   : > { %v7117_v25 = vpop.eup %7116  ;;  %6168 = vmatprep.subr.bf16.mxu0 %v6848_v21 }
 0x73d   : > { %v2365_v35 = vmul.f32 %v7117_v25, %v8417_v12  ;;  %v2376_v46 = vmul.f32 %v2369_v54, %v2364_v4  ;;  %v6849_v12 = vld [vmem:[%s9623_s11 + $0x8] sm:$0xff]  }
 0x73e   : > { %6169 = vmatpush3.bf16.msra.mxu0 %v6849_v12 }
 0x73f   : > { %v2377_v47 = vmul.f32 %v2369_v54, %v2365_v35  ;;  %v2388_v1 = vadd.f32 %v2381_v57, %v2376_v46  ;;  %v6850_v54 = vld [vmem:[%s9623_s11 + $0x50] sm:$0xff]  }
 0x740   : > { %6170 = vmatprep.subr.bf16.mxu0 %v6850_v54 }
 0x741   : > { %v2389_v5 = vadd.f32 %v2381_v57, %v2377_v47  ;;  %v6854_v57 = vld [vmem:[%s9623_s11 + $0x60] sm:$0xff]  }
 0x742   : > { %6171 = vmatpush3.bf16.msra.mxu0 %v6851_v15 }
 0x743   : > { %v2393_v8 = vpack.c.bf16 %v2389_v5, %v2388_v1  ;;  %6172 = vmatprep.subr.bf16.mxu0 %v6852_v13 }
 0x745   : > { %2565 = vmatmul.mubr.bf16.gmra.mrb[44].mxu1 %v2393_v8 }
 0x746   : > { %6173 = vmatpush3.bf16.msra.mxu0 %v6853_v34 }
 0x747   : > { %6174 = vmatprep.subr.bf16.mxu0 %v6854_v57 }
 0x74a   : > { %6175 = vmatpush3.bf16.msra.mxu0 %v6855_v11 }
 0x74b   : > { %6176 = vmatprep.subr.bf16.mxu0 %v6856_v51 }
 0x74e   : > { %6177 = vmatpush3.bf16.msra.mxu0 %v6857_v26 }
 0x74f   : > { %6178 = vmatprep.subr.bf16.mxu0 %v6858_v30 }
 0x752   : > { %6179 = vmatpush3.bf16.msra.mxu0 %v6859_v50 }
 0x753   : > { %6180 = vmatprep.subr.bf16.mxu0 %v6860_v0 }
 0x756   : > { %6181 = vmatpush3.bf16.msra.mxu0 %v6861_v42 }
 0x7ec   : > { %v2536_v52 = vpop.f32.mrb[32].mxu1 }
 0x7ed   : > { %v2537_v33 = vadd.f32 %v2536_v52, %v8491_v9  ;;  %v2538_v16 = vpop.f32.mrb[33].mxu1 }
 0x7ee   : > { %v2539_v43 = vadd.f32 %v2538_v16, %v8494_v3  ;;  %v2540_v27 = vpop.f32.mrb[34].mxu1 }
 0x7ef   : > { %v5714_v6 = vmul.f32 -1.442695, %v2537_v33  ;;  %v2541_v60 = vadd.f32 %v2540_v27, %v8491_v9  ;;  %v2542_v2 = vpop.f32.mrb[35].mxu1 }
 0x7f0   : > { %v5715_v44 = vmul.f32 -1.442695, %v2539_v43  ;;  %v2543_v37 = vadd.f32 %v2542_v2, %v8494_v3 }
 0x7f1   : > { %7118 = vpow2.f32 %v5714_v6  ;;  %v5716_v40 = vmul.f32 -1.442695, %v2541_v60 }
 0x7f2   : > { %7120 = vpow2.f32 %v5715_v44  ;;  %v5717_v62 = vmul.f32 -1.442695, %v2543_v37 }
 0x7f3   : > { %7122 = vpow2.f32 %v5716_v40 }
 0x7f4   : > { %7124 = vpow2.f32 %v5717_v62 }
 0x7f8   : > { %v2546_v38 = vpop.f32.mrb[36].mxu1 }
 0x7f9   : > { %v8501_v18 = vadd.f32 %v2546_v38, %v8491_v9  ;;  %v2548_v63 = vpop.f32.mrb[37].mxu1 }
 0x7fa   : > { %v8504_v19 = vadd.f32 %v2548_v63, %v8494_v3  ;;  %v2550_v22 = vpop.f32.mrb[38].mxu1 }
 0x7fb   : > { %v7119_v41 = vpop.eup %7118  ;;  %v5718_v56 = vmul.f32 -1.442695, %v8501_v18  ;;  %v8508_v36 = vadd.f32 %v2550_v22, %v8491_v9  ;;  %v2552_v28 = vpop.f32.mrb[39].mxu1 }
 0x7fc   : > { %v7121_v20 = vpop.eup %7120  ;;  %v2623_v59 = vadd.f32 1.0, %v7119_v41  ;;  %v8511_v23 = vadd.f32 %v2552_v28, %v8494_v3  ;;  %v5719_v46 = vmul.f32 -1.442695, %v8504_v19 }
 0x7fd   : > { %v7123_v24 = vpop.eup %7122  ;;  %v2624_v4 = vadd.f32 1.0, %v7121_v20  ;;  %7126 = vpow2.f32 %v5718_v56  ;;  %v5720_v1 = vmul.f32 -1.442695, %v8508_v36 }
 0x7fe   : > { %v7125_v25 = vpop.eup %7124  ;;  %7128 = vrcp.f32 %v2623_v59  ;;  %v2625_v35 = vadd.f32 1.0, %v7123_v24  ;;  %v5721_v5 = vmul.f32 -1.442695, %v8511_v23 }
 0x7ff   : > { %7130 = vrcp.f32 %v2624_v4  ;;  %v2626_v47 = vadd.f32 1.0, %v7125_v25 }
 0x800   : > { %7132 = vrcp.f32 %v2625_v35 }
 0x801   : > { %7134 = vrcp.f32 %v2626_v47 }
 0x802   : > { %7136 = vpow2.f32 %v5719_v46 }
 0x803   : > { %7138 = vpow2.f32 %v5720_v1 }
 0x804   : > { %7140 = vpow2.f32 %v5721_v5 }
 0x807   : > { %v7127_v8 = vpop.eup %7126 }
 0x808   : > { %v7129_v7 = vpop.eup %7128  ;;  %v2627_v12 = vadd.f32 1.0, %v7127_v8 }
 0x809   : > { %v7131_v14 = vpop.eup %7130  ;;  %v2671_v15 = vmul.f32 %v7129_v7, %v2537_v33 }
 0x80a   : > { %v7133_v21 = vpop.eup %7132  ;;  %v2672_v57 = vmul.f32 %v7131_v14, %v2539_v43  ;;  %7142 = vrcp.f32 %v2627_v12 }
 0x80b   : > { %v7135_v54 = vpop.eup %7134  ;;  %v2673_v13 = vmul.f32 %v7133_v21, %v2541_v60 }
 0x80c   : > { %v7137_v34 = vpop.eup %7136  ;;  %v2674_v11 = vmul.f32 %v7135_v54, %v2543_v37 }
 0x80d   : > { %v7139_v51 = vpop.eup %7138  ;;  %v2687_v26 = vpack.c.bf16 %v2673_v13, %v2671_v15  ;;  %v2628_v30 = vadd.f32 1.0, %v7137_v34  ;;  %v2556_v50 = vpop.f32.mrb[40].mxu1 }
 0x80e   : > { %v7141_v0 = vpop.eup %7140  ;;  %v2629_v42 = vadd.f32 1.0, %v7139_v51  ;;  %v8517_v10 = vadd.f32 %v2556_v50, %v8491_v9  ;;  %v2558_v52 = vpop.f32.mrb[41].mxu1  ;;  %v2688_v16 = vpack.c.bf16 %v2674_v11, %v2672_v57 }
 0x80f   : > { %7144 = vrcp.f32 %v2628_v30  ;;  %v2630_v27 = vadd.f32 1.0, %v7141_v0  ;;  %v8520_v33 = vadd.f32 %v2558_v52, %v8494_v3  ;;  %v2560_v6 = vpop.f32.mrb[42].mxu1 }
 0x810   : > { %7146 = vrcp.f32 %v2629_v42  ;;  %v5722_v43 = vmul.f32 -1.442695, %v8517_v10  ;;  %v2561_v60 = vadd.f32 %v2560_v6, %v8491_v9  ;;  %v2562_v2 = vpop.f32.mrb[43].mxu1  ;;  %2862 = vmatprep.mubr.bf16.mxu0 %v2688_v16 }
 0x811   : > { %7148 = vrcp.f32 %v2630_v27  ;;  %v5723_v44 = vmul.f32 -1.442695, %v8520_v33  ;;  %v2563_v37 = vadd.f32 %v2562_v2, %v8494_v3  ;;  %2863 = vmatmul.mubr.bf16.vlgmr.msra.gmra.mrb[40].mxu0 %v2687_v26 }
 0x812   : > { %7150 = vpow2.f32 %v5722_v43  ;;  %v5724_v40 = vmul.f32 -1.442695, %v2561_v60 }
 0x813   : > { %7152 = vpow2.f32 %v5723_v44  ;;  %v5725_v62 = vmul.f32 -1.442695, %v2563_v37 }
 0x814   : > { %7154 = vpow2.f32 %v5724_v40  ;;  %v7143_v38 = vpop.eup %7142 }
 0x815   : > { %7156 = vpow2.f32 %v5725_v62  ;;  %v2675_v4 = vmul.f32 %v7143_v38, %v8501_v18 }
 0x818   : > { %v2566_v63 = vpop.f32.mrb[44].mxu1 }
 0x819   : > { %v7145_v22 = vpop.eup %7144  ;;  %v8527_v41 = vadd.f32 %v2566_v63, %v8491_v9  ;;  %v2568_v56 = vpop.f32.mrb[45].mxu1 }
 0x81a   : > { %v7147_v28 = vpop.eup %7146  ;;  %v8530_v20 = vadd.f32 %v2568_v56, %v8494_v3  ;;  %v2570_v59 = vpop.f32.mrb[46].mxu1  ;;  %v2676_v5 = vmul.f32 %v7145_v22, %v8504_v19 }
 0x81b   : > { %v7149_v24 = vpop.eup %7148  ;;  %v2677_v25 = vmul.f32 %v7147_v28, %v8508_v36  ;;  %v5726_v35 = vmul.f32 -1.442695, %v8527_v41  ;;  %v2571_v46 = vadd.f32 %v2570_v59, %v8491_v9  ;;  %v2572_v47 = vpop.f32.mrb[47].mxu1 }
 0x81c   : > { %v7151_v1 = vpop.eup %7150  ;;  %v2678_v8 = vmul.f32 %v7149_v24, %v8511_v23  ;;  %v5727_v7 = vmul.f32 -1.442695, %v8530_v20  ;;  %v2573_v14 = vadd.f32 %v2572_v47, %v8494_v3 }
 0x81d   : > { %v7153_v21 = vpop.eup %7152  ;;  %v2631_v12 = vadd.f32 1.0, %v7151_v1  ;;  %7158 = vpow2.f32 %v5726_v35  ;;  %v2689_v18 = vpack.c.bf16 %v2677_v25, %v2675_v4  ;;  %v5728_v34 = vmul.f32 -1.442695, %v2571_v46  ;;  %v5730_v4 = vld [vmem:[%s9624_s12] ss:$0 sm:$0xff] }
 0x81e   : > { %v7155_v54 = vpop.eup %7154  ;;  %v2632_v36 = vadd.f32 1.0, %v7153_v21  ;;  %7160 = vpow2.f32 %v5727_v7  ;;  %v2690_v15 = vpack.c.bf16 %v2678_v8, %v2676_v5  ;;  %v5729_v57 = vmul.f32 -1.442695, %v2573_v14 }
 0x81f   : > { %v7157_v13 = vpop.eup %7156  ;;  %7162 = vrcp.f32 %v2631_v12  ;;  %v2633_v9 = vadd.f32 1.0, %v7155_v54 }
 0x820   : > { %7164 = vrcp.f32 %v2632_v36  ;;  %v2634_v19 = vadd.f32 1.0, %v7157_v13  ;;  %2870 = vmatprep.mubr.bf16.mxu0 %v2690_v15 }
 0x821   : > { %7166 = vrcp.f32 %v2633_v9  ;;  %2871 = vmatmul.mubr.bf16.gmra.mrb[44].mxu0 %v2689_v18 }
 0x822   : > { %7168 = vrcp.f32 %v2634_v19 }
 0x823   : > { %7170 = vpow2.f32 %v5728_v34 }
 0x824   : > { %7172 = vpow2.f32 %v5729_v57 }
 0x827   : > { %v7159_v3 = vpop.eup %7158 }
 0x828   : > { %v7161_v23 = vpop.eup %7160  ;;  %v2635_v26 = vadd.f32 1.0, %v7159_v3 }
 0x829   : > { %v7163_v11 = vpop.eup %7162  ;;  %v2636_v50 = vadd.f32 1.0, %v7161_v23 }
 0x82a   : > { %v7165_v51 = vpop.eup %7164  ;;  %v2679_v42 = vmul.f32 %v7163_v11, %v8517_v10  ;;  %7174 = vrcp.f32 %v2635_v26 }
 0x82b   : > { %v7167_v30 = vpop.eup %7166  ;;  %v2680_v27 = vmul.f32 %v7165_v51, %v8520_v33  ;;  %7176 = vrcp.f32 %v2636_v50 }
 0x82c   : > { %v7169_v0 = vpop.eup %7168  ;;  %v2681_v52 = vmul.f32 %v7167_v30, %v2561_v60 }
 0x82d   : > { %v7171_v16 = vpop.eup %7170  ;;  %v2682_v6 = vmul.f32 %v7169_v0, %v2563_v37 }
 0x82e   : > { %v7173_v43 = vpop.eup %7172  ;;  %v2637_v2 = vadd.f32 1.0, %v7171_v16  ;;  %v2691_v44 = vpack.c.bf16 %v2681_v52, %v2679_v42 }
 0x82f   : > { %v2638_v40 = vadd.f32 1.0, %v7173_v43  ;;  %v2692_v62 = vpack.c.bf16 %v2682_v6, %v2680_v27 }
 0x830   : > { %7178 = vrcp.f32 %v2637_v2 }
 0x831   : > { %7180 = vrcp.f32 %v2638_v40  ;;  %2878 = vmatprep.mubr.bf16.mxu0 %v2692_v62 }
 0x832   : > { %2879 = vmatmul.mubr.bf16.gmra.mrb[48].mxu0 %v2691_v44 }
 0x834   : > { %v7175_v38 = vpop.eup %7174 }
 0x835   : > { %v7177_v63 = vpop.eup %7176  ;;  %v2683_v60 = vmul.f32 %v7175_v38, %v8527_v41 }
 0x836   : > { %v2684_v33 = vmul.f32 %v7177_v63, %v8530_v20 }
 0x83a   : > { %v7179_v22 = vpop.eup %7178 }
 0x83b   : > { %v7181_v10 = vpop.eup %7180  ;;  %v2685_v56 = vmul.f32 %v7179_v22, %v2571_v46 }
 0x83c   : > { %v2686_v37 = vmul.f32 %v7181_v10, %v2573_v14 }
 0x83d   : > { %v2693_v28 = vpack.c.bf16 %v2685_v56, %v2683_v60 }
 0x83e   : > { %v2694_v59 = vpack.c.bf16 %v2686_v37, %v2684_v33  ;;  %v6862_v37 = vld [vmem:[%s9617_s5 + $0x40] sm:$0xff]  }
 0x83f   : > { %6523 = vmatprep.subr.bf16.mxu1 %v6862_v37 }
 0x840   : > { %2886 = vmatprep.mubr.bf16.mxu0 %v2694_v59  ;;  %6524 = vmatpush3.bf16.msra.mxu1 %v6862_v37 }
 0x841   : > { %2887 = vmatmul.mubr.bf16.gmra.mrb[52].mxu0 %v2693_v28  ;;  %v6863_v28 = vld [vmem:[%s9617_s5 + $0x48] sm:$0xff]  }
 0x842   : > { %6525 = vmatprep.subr.bf16.mxu1 %v6863_v28 }
 0x844   : > { %6526 = vmatpush3.bf16.msra.mxu1 %v6863_v28 }
 0x8e4   : > { %v6182_v24 = vpop.f32.mrb[40].mxu0 }
 0x8e5   : > { %v6183_v25 = vpop.f32.mrb[41].mxu0 }
 0x8e6   : > { %v6184_v35 = vadd.f32 %v6183_v25, %v6182_v24  ;;  %v6185_v47 = vpop.f32.mrb[42].mxu0 }
 0x8e7   : > { %v6186_v1 = vpop.f32.mrb[43].mxu0 }
 0x8e8   : > { %v2865_v5 = vadd.f32 %v6184_v35, %v5730_v4  ;;  %v6187_v8 = vadd.f32 %v6186_v1, %v6185_v47  ;;  %v6864_v47 = vld [vmem:[%s9617_s5 + $0x50] sm:$0xff]  }
 0x8e9   : > { %6527 = vmatprep.subr.bf16.mxu1 %v6864_v47 }
 0x8ea   : > { %v2868_v41 = vadd.f32 %v6187_v8, %v5730_v4  ;;  %v8548_v46 = vadd.f32 %v2865_v5, %v8296_v45  ;;  %6528 = vmatpush3.bf16.msra.mxu1 %v6864_v47 }
 0x8ec   : > { %2905 = vadd.xlane.f32.xlu0 %v8548_v46  ;;  %v8552_v20 = vadd.f32 %v2868_v41, %v8300_v48  ;;  %v6865_v41 = vld [vmem:[%s9617_s5 + $0x58] sm:$0xff]  }
 0x8ed   : > { %6529 = vmatprep.subr.bf16.mxu1 %v6865_v41 }
 0x8ee   : > { %2907 = vadd.xlane.f32.xlu1 %v8552_v20  ;;  %6530 = vmatpush3.bf16.msra.mxu1 %v6865_v41 }
 0x8f4   : > { %v6188_v7 = vpop.f32.mrb[44].mxu0 }
 0x8f5   : > { %v6189_v14 = vpop.f32.mrb[45].mxu0 }
 0x8f6   : > { %v6190_v21 = vadd.f32 %v6189_v14, %v6188_v7  ;;  %v6191_v12 = vpop.f32.mrb[46].mxu0  ;;  %v6866_v7 = vld [vmem:[%s9617_s5 + $0x60] sm:$0xff]  }
 0x8f7   : > { %v6192_v18 = vpop.f32.mrb[47].mxu0  ;;  %6531 = vmatprep.subr.bf16.mxu1 %v6866_v7 }
 0x8f8   : > { %v2873_v54 = vadd.f32 %v6190_v21, %v5730_v4  ;;  %v6193_v36 = vadd.f32 %v6192_v18, %v6191_v12  ;;  %6532 = vmatpush3.bf16.msra.mxu1 %v6866_v7  ;;  %v6867_v21 = vld [vmem:[%s9617_s5 + $0x68] sm:$0xff]  }
 0x8f9   : > { %6533 = vmatprep.subr.bf16.mxu1 %v6867_v21 }
 0x8fa   : > { %v2876_v15 = vadd.f32 %v6193_v36, %v5730_v4  ;;  %v8556_v13 = vadd.f32 %v2873_v54, %v8306_v17 }
 0x8fc   : > { %2909 = vadd.xlane.f32.xlu0 %v8556_v13  ;;  %v8560_v45 = vadd.f32 %v2876_v15, %v8310_v58  ;;  %6534 = vmatpush3.bf16.msra.mxu1 %v6867_v21  ;;  %v6868_v15 = vld [vmem:[%s9617_s5 + $0x70] sm:$0xff]  }
 0x8fd   : > { %6535 = vmatprep.subr.bf16.mxu1 %v6868_v15 }
 0x8fe   : > { %2911 = vadd.xlane.f32.xlu1 %v8560_v45 }
 0x900   : > { %6536 = vmatpush3.bf16.msra.mxu1 %v6868_v15 }
 0x905   : > { %v6194_v48 = vpop.f32.mrb[48].mxu0 }
 0x906   : > { %v6195_v9 = vpop.f32.mrb[49].mxu0 }
 0x907   : > { %v6196_v34 = vadd.f32 %v6195_v9, %v6194_v48  ;;  %v6197_v19 = vpop.f32.mrb[50].mxu0 }
 0x908   : > { %v6198_v57 = vpop.f32.mrb[51].mxu0 }
 0x909   : > { %v2881_v3 = vadd.f32 %v6196_v34, %v5730_v4  ;;  %v6199_v23 = vadd.f32 %v6198_v57, %v6197_v19  ;;  %v6869_v19 = vld [vmem:[%s9617_s5 + $0x78] sm:$0xff]   ;;  %v6870_v57 = vld [vmem:[%s7628_s30 + $0x40] sm:$0xff]  }
 0x90a   : > { %6537 = vmatprep.subr.bf16.mxu1 %v6869_v19  ;;  %6711 = vmatprep.subr.msk.bf16.mxu0 %vm1049_vm0, %v6870_v57 }
 0x90b   : > { %v2884_v11 = vadd.f32 %v6199_v23, %v5730_v4  ;;  %v8564_v51 = vadd.f32 %v2881_v3, %v8316_v29  ;;  %6538 = vmatpush3.bf16.msra.mxu1 %v6869_v19  ;;  %v8645_v3 = vld [vmem:[%s7628_s30 + $0x48] sm:$0xff]   ;;  %v3241_v23 = vsel %vm1049_vm0, %v6870_v57, 0 }
 0x90c   : > { %6548 = vmatpush3.bf16.xpose.msra.mxu0 %v3241_v23 }
 0x90d   : > { %2913 = vadd.xlane.f32.xlu0 %v8564_v51  ;;  %v8568_v17 = vadd.f32 %v2884_v11, %v8320_v55  ;;  %v8652_v11 = vld [vmem:[%s7628_s30 + $0x50] sm:$0xff]   ;;  %6712 = vmatprep.subr.msk.bf16.mxu0 %vm1049_vm0, %v8645_v3 }
 0x90f   : > { %2915 = vadd.xlane.f32.xlu1 %v8568_v17 }
 0x914   : > { %v6200_v58 = vpop.f32.mrb[52].mxu0 }
 0x915   : > { %v6201_v26 = vpop.f32.mrb[53].mxu0 }
 0x916   : > { %v6202_v30 = vadd.f32 %v6201_v26, %v6200_v58  ;;  %v6203_v50 = vpop.f32.mrb[54].mxu0  ;;  %v8655_v58 = vld [vmem:[%s7628_s30 + $0x60] sm:$0xff]   ;;  %v8663_v26 = vld [vmem:[%s7628_s30 + $0x58] sm:$0xff]  }
 0x917   : > { %v6204_v0 = vpop.f32.mrb[55].mxu0 }
 0x918   : > { %v2889_v42 = vadd.f32 %v6202_v30, %v5730_v4  ;;  %v6205_v52 = vadd.f32 %v6204_v0, %v6203_v50  ;;  %v8668_v30 = vld [vmem:[%s7628_s30 + $0x70] sm:$0xff]   ;;  %v3244_v50 = vsel %vm1049_vm0, %v8645_v3, 0  ;;  %v8675_v0 = vld [vmem:[%s7628_s30 + $0x68] sm:$0xff]  }
 0x919   : > { %6550 = vmatpush3.bf16.xpose.msra.mxu0 %v3244_v50 }
 0x91a   : > { %v2892_v16 = vadd.f32 %v6205_v52, %v5730_v4  ;;  %v8572_v27 = vadd.f32 %v2889_v42, %v8326_v32  ;;  %6713 = vmatprep.subr.msk.bf16.mxu0 %vm1049_vm0, %v8652_v11  ;;  %v8684_v42 = vld [vmem:[%s7628_s30 + $0x78] sm:$0xff]   ;;  %v3247_v52 = vsel %vm1049_vm0, %v8652_v11, 0 }
 0x91c   : > { %2917 = vadd.xlane.f32.xlu0 %v8572_v27  ;;  %v8576_v29 = vadd.f32 %v2892_v16, %v8330_v31  ;;  %v3250_v16 = vsel %vm1049_vm0, %v8663_v26, 0 }
 0x91e   : > { %2919 = vadd.xlane.f32.xlu1 %v8576_v29 }
 0x921   : > { %6552 = vmatpush3.bf16.xpose.msra.mxu0 %v3247_v52 }
 0x922   : > { %6714 = vmatprep.subr.msk.bf16.mxu0 %vm1049_vm0, %v8663_v26 }
 0x929   : > { %6554 = vmatpush3.bf16.xpose.msra.mxu0 %v3250_v16 }
 0x92a   : > { %6715 = vmatprep.subr.msk.bf16.mxu0 %vm1049_vm0, %v8655_v58 }
 0x979   : > { %v2906_v55 = vpop.xlane.xlu0 %2905 }
 0x97a   : > { %v2921_v6 = vmul.f32 0.0078125, %v2906_v55  ;;  %v3253_v55 = vsel %vm1049_vm0, %v8655_v58, 0 }
 0x97b   : > { %v2908_v43 = vpop.xlane.xlu1 %2907  ;;  %6556 = vmatpush3.bf16.xpose.msra.mxu0 %v3253_v55 }
 0x97c   : > { %v8580_v2 = vsub.f32 %v8548_v46, %v2921_v6  ;;  %v2922_v44 = vmul.f32 0.0078125, %v2908_v43  ;;  %6716 = vmatprep.subr.msk.bf16.mxu0 %vm1049_vm0, %v8675_v0  ;;  %v3256_v6 = vsel %vm1049_vm0, %v8675_v0, 0  ;;  %v3259_v43 = vsel %vm1049_vm0, %v8668_v30, 0 }
 0x97e   : > { %v8583_v40 = vsub.f32 %v8552_v20, %v2922_v44  ;;  %v2937_v32 = vmul.f32 %v8580_v2, %v8580_v2 }
 0x980   : > { %2945 = vadd.xlane.f32.xlu0 %v2937_v32  ;;  %v2938_v31 = vmul.f32 %v8583_v40, %v8583_v40 }
 0x982   : > { %2947 = vadd.xlane.f32.xlu1 %v2938_v31 }
 0x983   : > { %6558 = vmatpush3.bf16.xpose.msra.mxu0 %v3256_v6 }
 0x984   : > { %6717 = vmatprep.subr.msk.bf16.mxu0 %vm1049_vm0, %v8668_v30 }
 0x989   : > { %v2910_v62 = vpop.xlane.xlu0 %2909 }
 0x98a   : > { %v2923_v38 = vmul.f32 0.0078125, %v2910_v62 }
 0x98b   : > { %v2912_v63 = vpop.xlane.xlu1 %2911  ;;  %6560 = vmatpush3.bf16.xpose.msra.mxu0 %v3259_v43 }
 0x98c   : > { %v8590_v22 = vsub.f32 %v8556_v13, %v2923_v38  ;;  %v2924_v10 = vmul.f32 0.0078125, %v2912_v63  ;;  %6718 = vmatprep.subr.msk.bf16.mxu0 %vm1049_vm0, %v8684_v42 }
 0x98e   : > { %v8593_v60 = vsub.f32 %v8560_v45, %v2924_v10  ;;  %v2939_v56 = vmul.f32 %v8590_v22, %v8590_v22  ;;  %v5747_v10 = vld [vmem:[%s9616_s4 + $0x2] sm:$0x3] }
 0x990   : > { %2949 = vadd.xlane.f32.xlu0 %v2939_v56  ;;  %v2940_v33 = vmul.f32 %v8593_v60, %v8593_v60  ;;  %v2996_v56 = vrot.slane %v5747_v10, %v7799_v49 }
 0x992   : > { %2951 = vadd.xlane.f32.xlu1 %v2940_v33 }
 0x99a   : > { %v2914_v59 = vpop.xlane.xlu0 %2913 }
 0x99b   : > { %v2925_v24 = vmul.f32 0.0078125, %v2914_v59 }
 0x99c   : > { %v2916_v4 = vpop.xlane.xlu1 %2915 }
 0x99d   : > { %v8606_v25 = vsub.f32 %v8564_v51, %v2925_v24  ;;  %v2926_v35 = vmul.f32 0.0078125, %v2916_v4 }
 0x99f   : > { %v8612_v1 = vsub.f32 %v8568_v17, %v2926_v35  ;;  %v2941_v5 = vmul.f32 %v8606_v25, %v8606_v25 }
 0x9a1   : > { %2953 = vadd.xlane.f32.xlu0 %v2941_v5  ;;  %v2942_v8 = vmul.f32 %v8612_v1, %v8612_v1  ;;  %v3008_v5 = vrot.slane %v5747_v10, %v7806_v61 }
 0x9a3   : > { %2955 = vadd.xlane.f32.xlu1 %v2942_v8 }
 0x9a9   : > { %v2918_v14 = vpop.xlane.xlu0 %2917 }
 0x9aa   : > { %v2927_v12 = vmul.f32 0.0078125, %v2918_v14 }
 0x9ab   : > { %v2920_v18 = vpop.xlane.xlu1 %2919 }
 0x9ac   : > { %v8628_v54 = vsub.f32 %v8572_v27, %v2927_v12  ;;  %v2928_v36 = vmul.f32 0.0078125, %v2920_v18 }
 0x9ae   : > { %v8634_v48 = vsub.f32 %v8576_v29, %v2928_v36  ;;  %v2943_v9 = vmul.f32 %v8628_v54, %v8628_v54 }
 0x9b0   : > { %2957 = vadd.xlane.f32.xlu0 %v2943_v9  ;;  %v2944_v34 = vmul.f32 %v8634_v48, %v8634_v48 }
 0x9b2   : > { %2959 = vadd.xlane.f32.xlu1 %v2944_v34 }
 0x9c3   : > { %3423 = vrot.lane.b32.xlu1 %v8645_v3, %s9650_s22 }
 0x9c6   : > { %3421 = vrot.lane.b32.xlu0 %v6870_v57, %s9650_s22 }
 0x9c7   : > { %3425 = vrot.lane.b32.xlu1 %v8652_v11, %s9650_s22 }
 0x9ca   : > { %3429 = vrot.lane.b32.xlu0 %v8655_v58, %s9650_s22 }
 0x9cb   : > { %3427 = vrot.lane.b32.xlu1 %v8663_v26, %s9650_s22 }
 0x9ce   : > { %3433 = vrot.lane.b32.xlu0 %v8668_v30, %s9650_s22 }
 0x9cf   : > { %3431 = vrot.lane.b32.xlu1 %v8675_v0, %s9650_s22 }
 0x9d3   : > { %3435 = vrot.lane.b32.xlu1 %v8684_v42, %s9650_s22 }
 0x9d7   : > { %3831 = vrot.lane.b32.xlu1 %v6870_v57, %s9651_s25 }
 0x9db   : > { %3626 = vrot.lane.b32.xlu1 %v6870_v57, %s9652_s28 }
 0x9df   : > { %3628 = vrot.lane.b32.xlu1 %v8645_v3, %s9652_s28 }
 0x9e3   : > { %3630 = vrot.lane.b32.xlu1 %v8652_v11, %s9652_s28 }
 0x9e7   : > { %3632 = vrot.lane.b32.xlu1 %v8663_v26, %s9652_s28 }
 0x9eb   : > { %3634 = vrot.lane.b32.xlu1 %v8655_v58, %s9652_s28 }
 0x9ef   : > { %3636 = vrot.lane.b32.xlu1 %v8675_v0, %s9652_s28 }
 0x9f3   : > { %3638 = vrot.lane.b32.xlu1 %v8668_v30, %s9652_s28 }
 0xa0d   : > { %v2946_v44 = vpop.xlane.xlu0 %2945 }
 0xa0e   : > { %v2961_v32 = vmul.f32 0.0078125, %v2946_v44 }
 0xa0f   : > { %v2948_v31 = vpop.xlane.xlu1 %2947 }
 0xa10   : > { %v2969_v62 = vadd.f32 1e-06, %v2961_v32  ;;  %v2962_v38 = vmul.f32 0.0078125, %v2948_v31 }
 0xa12   : > { %7182 = vrsqrt.f32 %v2969_v62  ;;  %v2970_v63 = vadd.f32 1e-06, %v2962_v38 }
 0xa14   : > { %7184 = vrsqrt.f32 %v2970_v63 }
 0xa1c   : > { %v7183_v33 = vpop.eup %7182 }
 0xa1d   : > { %v2950_v37 = vpop.xlane.xlu0 %2949  ;;  %v2985_v28 = vmul.f32 %v7183_v33, %v8580_v2 }
 0xa1e   : > { %v7185_v59 = vpop.eup %7184  ;;  %v2963_v24 = vmul.f32 0.0078125, %v2950_v37 }
 0xa1f   : > { %v2952_v4 = vpop.xlane.xlu1 %2951  ;;  %v2986_v35 = vmul.f32 %v7185_v59, %v8583_v40  ;;  %v2997_v47 = vmul.f32 %v2996_v56, %v2985_v28 }
 0xa20   : > { %v2971_v8 = vadd.f32 1e-06, %v2963_v24  ;;  %v2964_v41 = vmul.f32 0.0078125, %v2952_v4 }
 0xa21   : > { %v2998_v7 = vmul.f32 %v2996_v56, %v2986_v35  ;;  %v3009_v21 = vadd.f32 %v3008_v5, %v2997_v47 }
 0xa22   : > { %7186 = vrsqrt.f32 %v2971_v8  ;;  %v2972_v14 = vadd.f32 1e-06, %v2964_v41 }
 0xa23   : > { %v3010_v12 = vadd.f32 %v3008_v5, %v2998_v7 }
 0xa24   : > { %7188 = vrsqrt.f32 %v2972_v14 }
 0xa25   : > { %v3017_v18 = vpack.c.bf16 %v3010_v12, %v3009_v21  ;;  %v3262_v12 = vsel %vm1049_vm0, %v8684_v42, 0 }
 0xa26   : > { %6562 = vmatpush3.bf16.xpose.msra.mxu0 %v3262_v12 }
 0xa27   : > { %6539 = vmatprep.mubr.bf16.mxu1 %v3017_v18 }
 0xa2c   : > { %v7187_v36 = vpop.eup %7186 }
 0xa2d   : > { %v2987_v2 = vmul.f32 %v7187_v36, %v8590_v22 }
 0xa2e   : > { %v7189_v15 = vpop.eup %7188  ;;  %v2954_v9 = vpop.xlane.xlu0 %2953 }
 0xa2f   : > { %v2999_v34 = vmul.f32 %v2996_v56, %v2987_v2  ;;  %v2988_v40 = vmul.f32 %v7189_v15, %v8593_v60  ;;  %v2965_v19 = vmul.f32 0.0078125, %v2954_v9 }
 0xa30   : > { %v2956_v57 = vpop.xlane.xlu1 %2955 }
 0xa31   : > { %v3000_v23 = vmul.f32 %v2996_v56, %v2988_v40  ;;  %v2973_v50 = vadd.f32 1e-06, %v2965_v19  ;;  %v2966_v52 = vmul.f32 0.0078125, %v2956_v57  ;;  %v3011_v55 = vadd.f32 %v3008_v5, %v2999_v34 }
 0xa33   : > { %7190 = vrsqrt.f32 %v2973_v50  ;;  %v2974_v16 = vadd.f32 1e-06, %v2966_v52  ;;  %v3012_v6 = vadd.f32 %v3008_v5, %v3000_v23 }
 0xa35   : > { %7192 = vrsqrt.f32 %v2974_v16  ;;  %v3018_v43 = vpack.c.bf16 %v3012_v6, %v3011_v55  ;;  %v5765_v6 = vld [vmem:[%s9618_s6 + $0x1] ss:$0 sm:$0xff] }
 0xa37   : > { %6540 = vmatmul.mubr.bf16.vlgmr.msra.gmra.mrb[48].mxu1 %v3018_v43 }
 0xa3d   : > { %v7191_v44 = vpop.eup %7190  ;;  %v2958_v32 = vpop.xlane.xlu0 %2957 }
 0xa3e   : > { %v2967_v22 = vmul.f32 0.0078125, %v2958_v32  ;;  %v2989_v31 = vmul.f32 %v7191_v44, %v8606_v25 }
 0xa3f   : > { %v7193_v62 = vpop.eup %7192  ;;  %v2960_v38 = vpop.xlane.xlu1 %2959 }
 0xa40   : > { %v2975_v60 = vadd.f32 1e-06, %v2967_v22  ;;  %v2968_v63 = vmul.f32 0.0078125, %v2960_v38  ;;  %v2990_v10 = vmul.f32 %v7193_v62, %v8612_v1  ;;  %v3001_v33 = vmul.f32 %v2996_v56, %v2989_v31 }
 0xa41   : > { %v3422_v18 = vpop.permute.xlu0 %3421 }
 0xa42   : > { %7194 = vrsqrt.f32 %v2975_v60  ;;  %v2976_v37 = vadd.f32 1e-06, %v2968_v63  ;;  %v3002_v28 = vmul.f32 %v2996_v56, %v2990_v10  ;;  %v3013_v59 = vadd.f32 %v3008_v5, %v3001_v33  ;;  %6719 = vmatprep.subr.msk.bf16.mxu1 %vm1049_vm0, %v3422_v18 }
 0xa43   : > { %v3450_v36 = vsel %vm1049_vm0, %v3422_v18, 0 }
 0xa44   : > { %7196 = vrsqrt.f32 %v2976_v37  ;;  %v3014_v24 = vadd.f32 %v3008_v5, %v3002_v28  ;;  %6572 = vmatpush3.bf16.xpose.msra.mxu1 %v3450_v36 }
 0xa45   : > { %v3430_v34 = vpop.permute.xlu0 %3429 }
 0xa46   : > { %v3019_v4 = vpack.c.bf16 %v3014_v24, %v3013_v59  ;;  %v3462_v19 = vsel %vm1049_vm0, %v3430_v34, 0 }
 0xa48   : > { %6543 = vmatprep.mubr.bf16.mxu1 %v3019_v4 }
 0xa49   : > { %v3434_v52 = vpop.permute.xlu0 %3433 }
 0xa4a   : > { %v3468_v16 = vsel %vm1049_vm0, %v3434_v52, 0 }
 0xa4c   : > { %v7195_v35 = vpop.eup %7194 }
 0xa4d   : > { %v2991_v47 = vmul.f32 %v7195_v35, %v8628_v54  ;;  %v3424_v54 = vpop.permute.xlu1 %3423 }
 0xa4e   : > { %v7197_v8 = vpop.eup %7196  ;;  %6720 = vmatprep.subr.msk.bf16.mxu1 %vm1049_vm0, %v3424_v54 }
 0xa4f   : > { %v2992_v25 = vmul.f32 %v7197_v8, %v8634_v48  ;;  %v3003_v41 = vmul.f32 %v2996_v56, %v2991_v47  ;;  %v3453_v48 = vsel %vm1049_vm0, %v3424_v54, 0 }
 0xa50   : > { %6574 = vmatpush3.bf16.xpose.msra.mxu1 %v3453_v48 }
 0xa51   : > { %v3004_v7 = vmul.f32 %v2996_v56, %v2992_v25  ;;  %v3015_v14 = vadd.f32 %v3008_v5, %v3003_v41  ;;  %v3426_v56 = vpop.permute.xlu1 %3425 }
 0xa52   : > { %6721 = vmatprep.subr.msk.bf16.mxu1 %vm1049_vm0, %v3426_v56 }
 0xa53   : > { %v3016_v21 = vadd.f32 %v3008_v5, %v3004_v7  ;;  %v3456_v5 = vsel %vm1049_vm0, %v3426_v56, 0 }
 0xa55   : > { %v3020_v1 = vpack.c.bf16 %v3016_v21, %v3015_v14  ;;  %v3428_v2 = vpop.permute.xlu1 %3427 }
 0xa56   : > { %v3459_v15 = vsel %vm1049_vm0, %v3428_v2, 0 }
 0xa57   : > { %6544 = vmatmul.mubr.bf16.gmra.mrb[52].mxu1 %v3020_v1 }
 0xa58   : > { %6576 = vmatpush3.bf16.xpose.msra.mxu1 %v3456_v5 }
 0xa59   : > { %6722 = vmatprep.subr.msk.bf16.mxu1 %vm1049_vm0, %v3428_v2  ;;  %v3432_v9 = vpop.permute.xlu1 %3431 }
 0xa5a   : > { %v3465_v50 = vsel %vm1049_vm0, %v3432_v9, 0 }
 0xa5d   : > { %v3436_v40 = vpop.permute.xlu1 %3435 }
 0xa5e   : > { %v3471_v55 = vsel %vm1049_vm0, %v3436_v40, 0 }
 0xa60   : > { %6578 = vmatpush3.bf16.xpose.msra.mxu1 %v3459_v15 }
 0xa61   : > { %6723 = vmatprep.subr.msk.bf16.mxu1 %vm1049_vm0, %v3430_v34  ;;  %v8747_v57 = vpop.permute.xlu1 %3831 }
 0xa65   : > { %v3627_v23 = vpop.permute.xlu1 %3626 }
 0xa66   : > { %6727 = vmatprep.subr.msk.bf16.mxu0 %vm1049_vm0, %v3627_v23  ;;  %v3655_v24 = vsel %vm1049_vm0, %v3627_v23, 0 }
 0xa68   : > { %6580 = vmatpush3.bf16.xpose.msra.mxu1 %v3462_v19 }
 0xa69   : > { %6724 = vmatprep.subr.msk.bf16.mxu1 %vm1049_vm0, %v3432_v9  ;;  %v3629_v4 = vpop.permute.xlu1 %3628 }
 0xa6a   : > { %v3658_v35 = vsel %vm1049_vm0, %v3629_v4, 0 }
 0xa6d   : > { %v3631_v47 = vpop.permute.xlu1 %3630 }
 0xa6e   : > { %v3661_v8 = vsel %vm1049_vm0, %v3631_v47, 0 }
 0xa70   : > { %6582 = vmatpush3.bf16.xpose.msra.mxu1 %v3465_v50 }
 0xa71   : > { %6725 = vmatprep.subr.msk.bf16.mxu1 %vm1049_vm0, %v3434_v52  ;;  %v3633_v25 = vpop.permute.xlu1 %3632 }
 0xa72   : > { %v3664_v14 = vsel %vm1049_vm0, %v3633_v25, 0 }
 0xa75   : > { %v3635_v1 = vpop.permute.xlu1 %3634 }
 0xa78   : > { %6584 = vmatpush3.bf16.xpose.msra.mxu1 %v3468_v16 }
 0xa79   : > { %6726 = vmatprep.subr.msk.bf16.mxu1 %vm1049_vm0, %v3436_v40  ;;  %v3637_v2 = vpop.permute.xlu1 %3636  ;;  %v3860_v40 = vsel %vm1049_vm0, %v8747_v57, 0 }
 0xa7d   : > { %v3639_v15 = vpop.permute.xlu1 %3638 }
 0xa7e   : > { %v3673_v9 = vsel %vm1049_vm0, %v3639_v15, 0 }
 0xa80   : > { %6586 = vmatpush3.bf16.xpose.msra.mxu1 %v3471_v55 }
 0xa81   : > { %6735 = vmatprep.subr.msk.bf16.mxu1 %vm1049_vm0, %v8747_v57 }
 0xb0a   : > { %v6541_v43 = vpop.f32.mrb[48].mxu1 }
 0xb0b   : > { %v3137_v44 = vadd.f32 %v6541_v43, %v5765_v6  ;;  %v3128_v32 = vpop.f32.mrb[49].mxu1 }
 0xb0c   : > { %v3129_v22 = vadd.f32 %v5765_v6, %v3128_v32  ;;  %v6542_v31 = vpop.f32.mrb[50].mxu1 }
 0xb0d   : > { %v3140_v62 = vadd.f32 %v6542_v31, %v5765_v6  ;;  %v3131_v38 = vpop.f32.mrb[51].mxu1  ;;  %v3161_v63 = vmul.f32 0.17677669, %v3137_v44 }
 0xb0e   : > { %v3132_v60 = vadd.f32 %v5765_v6, %v3131_v38  ;;  %v3159_v33 = vmul.f32 0.17677669, %v3129_v22 }
 0xb0f   : > { %v3162_v10 = vmul.f32 0.17677669, %v3140_v62 }
 0xb10   : > { %v3160_v37 = vmul.f32 0.17677669, %v3132_v60 }
 0xb11   : > { %v3185_v28 = vpack.c.bf16 %v3162_v10, %v3161_v63 }
 0xb12   : > { %v3184_v59 = vpack.c.bf16 %v3160_v37, %v3159_v33 }
 0xb14   : > { %3413 = vrot.lane.b32.xlu0 %v3184_v59, %s9650_s22  ;;  %6563 = vmatprep.mubr.msk.bf16.mxu0 %vm1049_vm0, %v3184_v59 }
 0xb15   : > { %6564 = vmatmul.mubr.msk.bf16.vlgmr.msra.gmra.mrb[56].mxu0 %vm1049_vm0, %v3185_v28 }
 0xb16   : > { %6596 = vmatpush3.bf16.xpose.msra.mxu0 %v3655_v24 }
 0xb17   : > { %6728 = vmatprep.subr.msk.bf16.mxu0 %vm1049_vm0, %v3629_v4 }
 0xb18   : > { %3415 = vrot.lane.b32.xlu0 %v3185_v28, %s9650_s22 }
 0xb1c   : > { %3833 = vrot.lane.b32.xlu0 %v8645_v3, %s9651_s25 }
 0xb1e   : > { %6598 = vmatpush3.bf16.xpose.msra.mxu0 %v3658_v35 }
 0xb1f   : > { %6729 = vmatprep.subr.msk.bf16.mxu0 %vm1049_vm0, %v3631_v47 }
 0xb20   : > { %3835 = vrot.lane.b32.xlu0 %v8652_v11, %s9651_s25 }
 0xb24   : > { %3837 = vrot.lane.b32.xlu0 %v8663_v26, %s9651_s25 }
 0xb26   : > { %6600 = vmatpush3.bf16.xpose.msra.mxu0 %v3661_v8 }
 0xb27   : > { %6730 = vmatprep.subr.msk.bf16.mxu0 %vm1049_vm0, %v3633_v25 }
 0xb28   : > { %3839 = vrot.lane.b32.xlu0 %v8655_v58, %s9651_s25 }
 0xb2a   : > { %v6545_v3 = vpop.f32.mrb[52].mxu1 }
 0xb2b   : > { %v3153_v41 = vadd.f32 %v6545_v3, %v5765_v6  ;;  %v3144_v7 = vpop.f32.mrb[53].mxu1 }
 0xb2c   : > { %v3145_v21 = vadd.f32 %v5765_v6, %v3144_v7  ;;  %3841 = vrot.lane.b32.xlu0 %v8675_v0, %s9651_s25  ;;  %v6546_v11 = vpop.f32.mrb[54].mxu1  ;;  %v3667_v0 = vsel %vm1049_vm0, %v3635_v1, 0 }
 0xb2d   : > { %v3156_v12 = vadd.f32 %v6546_v11, %v5765_v6  ;;  %v3147_v26 = vpop.f32.mrb[55].mxu1  ;;  %v3165_v36 = vmul.f32 0.17677669, %v3153_v41 }
 0xb2e   : > { %v3148_v18 = vadd.f32 %v5765_v6, %v3147_v26  ;;  %6602 = vmatpush3.bf16.xpose.msra.mxu0 %v3664_v14  ;;  %v3163_v58 = vmul.f32 0.17677669, %v3145_v21 }
 0xb2f   : > { %v3166_v54 = vmul.f32 0.17677669, %v3156_v12  ;;  %6731 = vmatprep.subr.msk.bf16.mxu0 %vm1049_vm0, %v3635_v1 }
 0xb30   : > { %v3164_v48 = vmul.f32 0.17677669, %v3148_v18  ;;  %3843 = vrot.lane.b32.xlu0 %v8668_v30, %s9651_s25  ;;  %v3670_v30 = vsel %vm1049_vm0, %v3637_v2, 0 }
 0xb31   : > { %v3187_v56 = vpack.c.bf16 %v3166_v54, %v3165_v36 }
 0xb32   : > { %v3186_v5 = vpack.c.bf16 %v3164_v48, %v3163_v58 }
 0xb33   : > { %3419 = vrot.lane.b32.xlu1 %v3187_v56, %s9650_s22 }
 0xb34   : > { %3417 = vrot.lane.b32.xlu0 %v3186_v5, %s9650_s22  ;;  %6567 = vmatprep.mubr.msk.bf16.mxu0 %vm1049_vm0, %v3186_v5 }
 0xb35   : > { %6568 = vmatmul.mubr.msk.bf16.gmra.mrb[60].mxu0 %vm1049_vm0, %v3187_v56 }
 0xb36   : > { %6604 = vmatpush3.bf16.xpose.msra.mxu0 %v3667_v0 }
 0xb37   : > { %3640 = vrot.lane.b32.xlu1 %v8684_v42, %s9652_s28  ;;  %6732 = vmatprep.subr.msk.bf16.mxu0 %vm1049_vm0, %v3637_v2 }
 0xb38   : > { %3845 = vrot.lane.b32.xlu0 %v8684_v42, %s9651_s25 }
 0xb3b   : > { %3618 = vrot.lane.b32.xlu1 %v3184_v59, %s9652_s28 }
 0xb3c   : > { %3823 = vrot.lane.b32.xlu0 %v3184_v59, %s9651_s25 }
 0xb3e   : > { %6606 = vmatpush3.bf16.xpose.msra.mxu0 %v3670_v30 }
 0xb3f   : > { %3620 = vrot.lane.b32.xlu1 %v3185_v28, %s9652_s28  ;;  %6733 = vmatprep.subr.msk.bf16.mxu0 %vm1049_vm0, %v3639_v15 }
 0xb40   : > { %3825 = vrot.lane.b32.xlu0 %v3185_v28, %s9651_s25 }
 0xb43   : > { %3622 = vrot.lane.b32.xlu1 %v3186_v5, %s9652_s28 }
 0xb44   : > { %3827 = vrot.lane.b32.xlu0 %v3186_v5, %s9651_s25 }
 0xb46   : > { %6608 = vmatpush3.bf16.xpose.msra.mxu0 %v3673_v9 }
 0xb47   : > { %3624 = vrot.lane.b32.xlu1 %v3187_v56, %s9652_s28 }
 0xb48   : > { %3829 = vrot.lane.b32.xlu0 %v3187_v56, %s9651_s25 }
 0xb86   : > { %v3414_v42 = vpop.permute.xlu0 %3413 }
 0xb87   : > { %6587 = vmatprep.mubr.msk.bf16.mxu1 %vm1049_vm0, %v3414_v42 }
 0xb8a   : > { %v3416_v34 = vpop.permute.xlu0 %3415 }
 0xb8b   : > { %6588 = vmatmul.mubr.msk.bf16.vlgmr.msra.gmra.mrb[56].mxu1 %vm1049_vm0, %v3416_v34 }
 0xb8c   : > { %6620 = vmatpush3.bf16.xpose.msra.mxu1 %v3860_v40 }
 0xb8e   : > { %v3834_v19 = vpop.permute.xlu0 %3833 }
 0xb8f   : > { %6736 = vmatprep.subr.msk.bf16.mxu1 %vm1049_vm0, %v3834_v19  ;;  %v3863_v23 = vsel %vm1049_vm0, %v3834_v19, 0 }
 0xb92   : > { %v3836_v50 = vpop.permute.xlu0 %3835 }
 0xb93   : > { %v3866_v16 = vsel %vm1049_vm0, %v3836_v50, 0 }
 0xb94   : > { %6622 = vmatpush3.bf16.xpose.msra.mxu1 %v3863_v23 }
 0xb95   : > { %6737 = vmatprep.subr.msk.bf16.mxu1 %vm1049_vm0, %v3836_v50 }
 0xb96   : > { %v3838_v52 = vpop.permute.xlu0 %3837 }
 0xb97   : > { %v3869_v57 = vsel %vm1049_vm0, %v3838_v52, 0 }
 0xb9a   : > { %v3840_v55 = vpop.permute.xlu0 %3839 }
 0xb9b   : > { %v3872_v31 = vsel %vm1049_vm0, %v3840_v55, 0 }
 0xb9c   : > { %6624 = vmatpush3.bf16.xpose.msra.mxu1 %v3866_v16 }
 0xb9d   : > { %6738 = vmatprep.subr.msk.bf16.mxu1 %vm1049_vm0, %v3838_v52 }
 0xb9e   : > { %v3842_v6 = vpop.permute.xlu0 %3841 }
 0xb9f   : > { %v3875_v33 = vsel %vm1049_vm0, %v3842_v6, 0 }
 0xba2   : > { %v3844_v43 = vpop.permute.xlu0 %3843 }
 0xba3   : > { %v3878_v59 = vsel %vm1049_vm0, %v3844_v43, 0 }
 0xba4   : > { %6626 = vmatpush3.bf16.xpose.msra.mxu1 %v3869_v57 }
 0xba5   : > { %v3420_v44 = vpop.permute.xlu1 %3419  ;;  %6739 = vmatprep.subr.msk.bf16.mxu1 %vm1049_vm0, %v3840_v55 }
 0xba6   : > { %v3418_v32 = vpop.permute.xlu0 %3417 }
 0xba7   : > { %6591 = vmatprep.mubr.msk.bf16.mxu1 %vm1049_vm0, %v3418_v32 }
 0xba8   : > { %6592 = vmatmul.mubr.msk.bf16.gmra.mrb[60].mxu1 %vm1049_vm0, %v3420_v44 }
 0xba9   : > { %v3641_v22 = vpop.permute.xlu1 %3640 }
 0xbaa   : > { %6734 = vmatprep.subr.msk.bf16.mxu0 %vm1049_vm0, %v3641_v22  ;;  %v3846_v62 = vpop.permute.xlu0 %3845  ;;  %v3676_v38 = vsel %vm1049_vm0, %v3641_v22, 0 }
 0xbab   : > { %6610 = vmatpush3.bf16.xpose.msra.mxu0 %v3676_v38  ;;  %v3881_v24 = vsel %vm1049_vm0, %v3846_v62, 0 }
 0xbac   : > { %6628 = vmatpush3.bf16.xpose.msra.mxu1 %v3872_v31 }
 0xbad   : > { %v3619_v60 = vpop.permute.xlu1 %3618  ;;  %6740 = vmatprep.subr.msk.bf16.mxu1 %vm1049_vm0, %v3842_v6 }
 0xbae   : > { %6611 = vmatprep.mubr.msk.bf16.mxu0 %vm1049_vm0, %v3619_v60  ;;  %v3824_v63 = vpop.permute.xlu0 %3823 }
 0xbaf   : > { %6635 = vmatprep.mubr.msk.bf16.mxu1 %vm1049_vm0, %v3824_v63 }
 0xbb1   : > { %v3621_v10 = vpop.permute.xlu1 %3620 }
 0xbb2   : > { %6612 = vmatmul.mubr.msk.bf16.vlgmr.msra.gmra.mrb[64].mxu0 %vm1049_vm0, %v3621_v10  ;;  %v3826_v4 = vpop.permute.xlu0 %3825 }
 0xbb4   : > { %6630 = vmatpush3.bf16.xpose.msra.mxu1 %v3875_v33 }
 0xbb5   : > { %v3623_v37 = vpop.permute.xlu1 %3622  ;;  %6741 = vmatprep.subr.msk.bf16.mxu1 %vm1049_vm0, %v3844_v43 }
 0xbb6   : > { %6615 = vmatprep.mubr.msk.bf16.mxu0 %vm1049_vm0, %v3623_v37  ;;  %v3828_v35 = vpop.permute.xlu0 %3827 }
 0xbb9   : > { %v3625_v28 = vpop.permute.xlu1 %3624 }
 0xbba   : > { %6616 = vmatmul.mubr.msk.bf16.gmra.mrb[68].mxu0 %vm1049_vm0, %v3625_v28  ;;  %v3830_v47 = vpop.permute.xlu0 %3829 }
 0xbbc   : > { %6632 = vmatpush3.bf16.xpose.msra.mxu1 %v3878_v59 }
 0xbbd   : > { %6742 = vmatprep.subr.msk.bf16.mxu1 %vm1049_vm0, %v3846_v62 }
 0xbc4   : > { %6634 = vmatpush3.bf16.xpose.msra.mxu1 %v3881_v24 }
 0xbcb   : > { %6636 = vmatmul.mubr.msk.bf16.vlgmr.msra.gmra.mrb[64].mxu1 %vm1049_vm0, %v3826_v4 }
 0xbcc   : > { %6639 = vmatprep.mubr.msk.bf16.mxu1 %vm1049_vm0, %v3828_v35 }
 0xbd3   : > { %6640 = vmatmul.mubr.msk.bf16.gmra.mrb[68].mxu1 %vm1049_vm0, %v3830_v47 }
 0xbe8   : > { %v6565_v8 = vpop.f32.mrb[56].mxu0 }
 0xbe9   : > { %v8838_v25 = vsel %vm726_vm1, %v6565_v8, -1e+30  ;;  %v3298_v3 = vpop.f32.mrb[57].mxu0 }
 0xbea   : > { %v6566_v41 = vpop.f32.mrb[58].mxu0  ;;  %3341 = vmax.xlane.f32.xlu0 %v8838_v25  ;;  %v8848_v21 = vsel %vm726_vm1, %v3298_v3, -1e+30 }
 0xbeb   : > { %v8843_v7 = vsel %vm726_vm1, %v6566_v41, -1e+30  ;;  %v3301_v14 = vpop.f32.mrb[59].mxu0 }
 0xbec   : > { %3343 = vmax.xlane.f32.xlu1 %v8843_v7  ;;  %v8853_v11 = vsel %vm726_vm1, %v3301_v14, -1e+30 }
 0xbee   : > { %3337 = vmax.xlane.f32.xlu0 %v8848_v21 }
 0xbf0   : > { %3339 = vmax.xlane.f32.xlu1 %v8853_v11 }
 0xc08   : > { %v8856_v1 = vpop.f32.mrb[60].mxu0 }
 0xc09   : > { %v3314_v12 = vpop.f32.mrb[61].mxu0 }
 0xc0a   : > { %v8858_v26 = vpop.f32.mrb[62].mxu0  ;;  %v8944_v3 = vsel %vm726_vm1, %v3314_v12, -1e+30 }
 0xc0b   : > { %v3317_v18 = vpop.f32.mrb[63].mxu0 }
 0xc0c   : > { %v8929_v37 = vsel %vm726_vm1, %v3317_v18, -1e+30 }
 0xc5e   : > { %v6589_v36 = vpop.f32.mrb[56].mxu1 }
 0xc5f   : > { %v8862_v54 = vsel %vm726_vm1, %v6589_v36, -1e+30  ;;  %v3507_v58 = vpop.f32.mrb[57].mxu1 }
 0xc60   : > { %3550 = vmax.xlane.f32.xlu0 %v8862_v54  ;;  %v6590_v48 = vpop.f32.mrb[58].mxu1  ;;  %v8882_v50 = vsel %vm726_vm1, %v3507_v58, -1e+30 }
 0xc61   : > { %v8867_v56 = vsel %vm726_vm1, %v6590_v48, -1e+30  ;;  %v3510_v5 = vpop.f32.mrb[59].mxu1 }
 0xc62   : > { %3552 = vmax.xlane.f32.xlu1 %v8867_v56  ;;  %v8887_v52 = vsel %vm726_vm1, %v3510_v5, -1e+30 }
 0xc77   : > { %v3342_v41 = vpop.xlane.xlu0 %3341 }
 0xc79   : > { %v3344_v28 = vpop.xlane.xlu1 %3343 }
 0xc7a   : > { %v3356_v5 = vsub.f32 %v8843_v7, %v3344_v28 }
 0xc7b   : > { %v6593_v0 = vpop.f32.mrb[60].mxu1  ;;  %v3338_v48 = vpop.xlane.xlu0 %3337 }
 0xc7c   : > { %v3523_v2 = vpop.f32.mrb[61].mxu1 }
 0xc7d   : > { %v6594_v30 = vpop.f32.mrb[62].mxu1  ;;  %v8904_v32 = vsel %vm726_vm1, %v3523_v2, -1e+30  ;;  %v3340_v14 = vpop.xlane.xlu1 %3339  ;;  %v8966_v2 = vsel %vm726_vm1, %v6593_v0, -1e+30 }
 0xc7e   : > { %v3526_v15 = vpop.f32.mrb[63].mxu1  ;;  %v8949_v18 = vsel %vm726_vm1, %v6594_v30, -1e+30  ;;  %v3354_v36 = vsub.f32 %v8853_v11, %v3340_v14  ;;  %v3353_v30 = vsub.f32 %v8848_v21, %v3338_v48  ;;  %v8983_v0 = vsel %vm726_vm1, %v8858_v26, -1e+30 }
 0xc7f   : > { %v8909_v22 = vsel %vm726_vm1, %v3526_v15, -1e+30  ;;  %v3355_v21 = vsub.f32 %v8838_v25, %v3342_v41  ;;  %v9000_v25 = vsel %vm726_vm1, %v8856_v1, -1e+30  ;;  %v6881_v41 = vld [vmem:[%s7645_s29 + $0x108] sm:$0xff]  }
 0xc80   : > { %v3363_v11 = vmul.f32 1.442695, %v3354_v36  ;;  %v6883_v36 = vld [vmem:[%s7645_s29 + $0x110] sm:$0xff]  }
 0xc82   : > { %7198 = vpow2.f32 %v3363_v11 }
 0xc85   : > { %v6613_v9 = vpop.f32.mrb[64].mxu0 }
 0xc86   : > { %v8872_v42 = vsel %vm726_vm1, %v6613_v9, -1e+30  ;;  %v3712_v34 = vpop.f32.mrb[65].mxu0  ;;  %v3367_v9 = vmul.f32 1.442695, %v3356_v5 }
 0xc87   : > { %v6614_v40 = vpop.f32.mrb[66].mxu0  ;;  %3755 = vmax.xlane.f32.xlu0 %v8872_v42  ;;  %v8894_v55 = vsel %vm726_vm1, %v3712_v34, -1e+30  ;;  %v3361_v34 = vmul.f32 1.442695, %v3353_v30 }
 0xc88   : > { %v8877_v19 = vsel %vm726_vm1, %v6614_v40, -1e+30  ;;  %v3715_v23 = vpop.f32.mrb[67].mxu0  ;;  %7200 = vpow2.f32 %v3367_v9 }
 0xc89   : > { %3757 = vmax.xlane.f32.xlu1 %v8877_v19  ;;  %v8899_v43 = vsel %vm726_vm1, %v3715_v23, -1e+30  ;;  %v3365_v23 = vmul.f32 1.442695, %v3355_v21  ;;  %7202 = vpow2.f32 %v3361_v34 }
 0xc8b   : > { %3546 = vmax.xlane.f32.xlu0 %v8882_v50  ;;  %7204 = vpow2.f32 %v3365_v23 }
 0xc8c   : > { %v9003_v26 = vpop.eup %7198 }
 0xc8d   : > { %v8889_v16 = vpop.f32.mrb[68].mxu0  ;;  %3548 = vmax.xlane.f32.xlu1 %v8887_v52 }
 0xc8e   : > { %v3728_v6 = vpop.f32.mrb[69].mxu0 }
 0xc8f   : > { %v6618_v57 = vpop.f32.mrb[70].mxu0  ;;  %3751 = vmax.xlane.f32.xlu0 %v8894_v55  ;;  %v8955_v58 = vsel %vm726_vm1, %v3728_v6, -1e+30 }
 0xc90   : > { %v3731_v44 = vpop.f32.mrb[71].mxu0  ;;  %v8994_v6 = vsel %vm726_vm1, %v6618_v57, -1e+30 }
 0xc91   : > { %3753 = vmax.xlane.f32.xlu1 %v8899_v43  ;;  %v8939_v47 = vsel %vm726_vm1, %v3731_v44, -1e+30  ;;  %v9009_v44 = vsel %vm726_vm1, %v8889_v16, -1e+30 }
 0xc92   : > { %v9012_v57 = vpop.eup %7200 }
 0xc93   : > { %3554 = vmax.xlane.f32.xlu0 %v8904_v32  ;;  %v9015_v1 = vpop.eup %7202 }
 0xc95   : > { %3556 = vmax.xlane.f32.xlu1 %v8909_v22 }
 0xc9e   : > { %v6637_v31 = vpop.f32.mrb[64].mxu1 }
 0xc9f   : > { %v8914_v62 = vsel %vm726_vm1, %v6637_v31, -1e+30  ;;  %v3917_v38 = vpop.f32.mrb[65].mxu1  ;;  %v9018_v31 = vpop.eup %7204 }
 0xca0   : > { %3960 = vmax.xlane.f32.xlu0 %v8914_v62  ;;  %v6638_v60 = vpop.f32.mrb[66].mxu1  ;;  %v8924_v33 = vsel %vm726_vm1, %v3917_v38, -1e+30 }
 0xca1   : > { %v8919_v63 = vsel %vm726_vm1, %v6638_v60, -1e+30  ;;  %v3920_v10 = vpop.f32.mrb[67].mxu1 }
 0xca2   : > { %3962 = vmax.xlane.f32.xlu1 %v8919_v63  ;;  %v8934_v24 = vsel %vm726_vm1, %v3920_v10, -1e+30 }
 0xca4   : > { %3956 = vmax.xlane.f32.xlu0 %v8924_v33 }
 0xca6   : > { %3347 = vmax.xlane.f32.xlu1 %v8929_v37  ;;  %v6641_v59 = vpop.f32.mrb[68].mxu1 }
 0xca7   : > { %v3933_v4 = vpop.f32.mrb[69].mxu1  ;;  %v8989_v40 = vsel %vm726_vm1, %v6641_v59, -1e+30 }
 0xca8   : > { %3958 = vmax.xlane.f32.xlu0 %v8934_v24  ;;  %v6642_v35 = vpop.f32.mrb[70].mxu1  ;;  %v8977_v7 = vsel %vm726_vm1, %v3933_v4, -1e+30 }
 0xca9   : > { %v3936_v8 = vpop.f32.mrb[71].mxu1  ;;  %v8972_v15 = vsel %vm726_vm1, %v6642_v35, -1e+30  ;;  %v6878_v35 = vld [vmem:[%s7645_s29 + $0x140] sm:$0xff]  }
 0xcaa   : > { %3761 = vmax.xlane.f32.xlu1 %v8939_v47  ;;  %v8960_v12 = vsel %vm726_vm1, %v3936_v8, -1e+30  ;;  %v6880_v8 = vld [vmem:[%s7645_s29 + $0x148] sm:$0xff]   ;;  %6266 = vmatprep.subr.bf16.mxu0 %v6878_v35 }
 0xcac   : > { %3345 = vmax.xlane.f32.xlu0 %v8944_v3 }
 0xcae   : > { %3560 = vmax.xlane.f32.xlu1 %v8949_v18 }
 0xcb0   : > { %3759 = vmax.xlane.f32.xlu0 %v8955_v58 }
 0xcb2   : > { %3966 = vmax.xlane.f32.xlu1 %v8960_v12 }
 0xcb4   : > { %3558 = vmax.xlane.f32.xlu0 %v8966_v2 }
 0xcb6   : > { %3970 = vmax.xlane.f32.xlu1 %v8972_v15 }
 0xcb8   : > { %3964 = vmax.xlane.f32.xlu0 %v8977_v7 }
 0xcba   : > { %3351 = vmax.xlane.f32.xlu1 %v8983_v0 }
 0xcbc   : > { %3968 = vmax.xlane.f32.xlu0 %v8989_v40 }
 0xcbe   : > { %3765 = vmax.xlane.f32.xlu1 %v8994_v6 }
 0xcc0   : > { %3349 = vmax.xlane.f32.xlu0 %v9000_v25 }
 0xcc2   : > { %3379 = vadd.xlane.f32.xlu1 %v9003_v26 }
 0xcc4   : > { %3763 = vmax.xlane.f32.xlu0 %v9009_v44 }
 0xcc6   : > { %3383 = vadd.xlane.f32.xlu1 %v9012_v57 }
 0xcc8   : > { %3377 = vadd.xlane.f32.xlu0 %v9015_v1 }
 0xccc   : > { %3381 = vadd.xlane.f32.xlu0 %v9018_v31 }
 0xced   : > { %v3551_v39 = vpop.xlane.xlu0 %3550 }
 0xcee   : > { %v3564_v16 = vsub.f32 %v8862_v54, %v3551_v39  ;;  %v6879_v54 = vld [vmem:[%s7645_s29 + $0x100] sm:$0xff]  }
 0xcef   : > { %v3553_v38 = vpop.xlane.xlu1 %3552  ;;  %6267 = vmatpush3.bf16.msra.mxu0 %v6879_v54 }
 0xcf0   : > { %v3574_v60 = vmul.f32 1.442695, %v3564_v16  ;;  %v3565_v10 = vsub.f32 %v8867_v56, %v3553_v38  ;;  %6268 = vmatprep.subr.bf16.mxu0 %v6880_v8  ;;  %v6882_v56 = vld [vmem:[%s7645_s29 + $0x150] sm:$0xff]  }
 0xcf2   : > { %7206 = vpow2.f32 %v3574_v60  ;;  %v3576_v28 = vmul.f32 1.442695, %v3565_v10 }
 0xcf3   : > { %6269 = vmatpush3.bf16.msra.mxu0 %v6881_v41 }
 0xcf4   : > { %7208 = vpow2.f32 %v3576_v28  ;;  %6270 = vmatprep.subr.bf16.mxu0 %v6882_v56 }
 0xcf7   : > { %6271 = vmatpush3.bf16.msra.mxu0 %v6883_v36 }
 0xcfc   : > { %v9023_v59 = vpop.eup %7206 }
 0xcfd   : > { %3590 = vadd.xlane.f32.xlu0 %v9023_v59 }
 0xcfe   : > { %v9026_v4 = vpop.eup %7208 }
 0xcff   : > { %3592 = vadd.xlane.f32.xlu1 %v9026_v4 }
 0xd14   : > { %v3756_v14 = vpop.xlane.xlu0 %3755 }
 0xd15   : > { %v3769_v48 = vsub.f32 %v8872_v42, %v3756_v14 }
 0xd16   : > { %v3758_v5 = vpop.xlane.xlu1 %3757 }
 0xd17   : > { %v3779_v11 = vmul.f32 1.442695, %v3769_v48  ;;  %v3770_v30 = vsub.f32 %v8877_v19, %v3758_v5 }
 0xd18   : > { %v3547_v9 = vpop.xlane.xlu0 %3546 }
 0xd19   : > { %7210 = vpow2.f32 %v3779_v11  ;;  %v3781_v21 = vmul.f32 1.442695, %v3770_v30  ;;  %v3562_v34 = vsub.f32 %v8882_v50, %v3547_v9 }
 0xd1a   : > { %v3549_v23 = vpop.xlane.xlu1 %3548 }
 0xd1b   : > { %7212 = vpow2.f32 %v3781_v21  ;;  %v3570_v39 = vmul.f32 1.442695, %v3562_v34  ;;  %v3563_v16 = vsub.f32 %v8887_v52, %v3549_v23 }
 0xd1c   : > { %v3752_v38 = vpop.xlane.xlu0 %3751 }
 0xd1d   : > { %7214 = vpow2.f32 %v3570_v39  ;;  %v3572_v60 = vmul.f32 1.442695, %v3563_v16  ;;  %v3767_v42 = vsub.f32 %v8894_v55, %v3752_v38 }
 0xd1e   : > { %v3754_v10 = vpop.xlane.xlu1 %3753 }
 0xd1f   : > { %7216 = vpow2.f32 %v3572_v60  ;;  %v3775_v28 = vmul.f32 1.442695, %v3767_v42  ;;  %v3768_v19 = vsub.f32 %v8899_v43, %v3754_v10  ;;  %v6884_v60 = vld [vmem:[%s7645_s29 + $0x158] sm:$0xff]  }
 0xd20   : > { %v3555_v35 = vpop.xlane.xlu0 %3554  ;;  %v6885_v42 = vld [vmem:[%s7645_s29 + $0x118] sm:$0xff]   ;;  %6272 = vmatprep.subr.bf16.mxu0 %v6884_v60 }
 0xd21   : > { %7218 = vpow2.f32 %v3775_v28  ;;  %v3777_v54 = vmul.f32 1.442695, %v3768_v19  ;;  %v3566_v50 = vsub.f32 %v8904_v32, %v3555_v35  ;;  %6273 = vmatpush3.bf16.msra.mxu0 %v6885_v42 }
 0xd22   : > { %v3557_v8 = vpop.xlane.xlu1 %3556 }
 0xd23   : > { %v9042_v41 = vpop.eup %7210  ;;  %7220 = vpow2.f32 %v3777_v54  ;;  %v3578_v52 = vmul.f32 1.442695, %v3566_v50  ;;  %v3567_v56 = vsub.f32 %v8909_v22, %v3557_v8  ;;  %v6887_v54 = vld [vmem:[%s7645_s29 + $0x120] sm:$0xff]  }
 0xd24   : > { %3795 = vadd.xlane.f32.xlu0 %v9042_v41 }
 0xd25   : > { %v9046_v55 = vpop.eup %7212  ;;  %7222 = vpow2.f32 %v3578_v52  ;;  %v3580_v14 = vmul.f32 1.442695, %v3567_v56 }
 0xd26   : > { %3797 = vadd.xlane.f32.xlu1 %v9046_v55 }
 0xd27   : > { %v9049_v43 = vpop.eup %7214  ;;  %7224 = vpow2.f32 %v3580_v14 }
 0xd28   : > { %3586 = vadd.xlane.f32.xlu0 %v9049_v43 }
 0xd29   : > { %v9052_v32 = vpop.eup %7216 }
 0xd2a   : > { %3588 = vadd.xlane.f32.xlu1 %v9052_v32 }
 0xd2b   : > { %v9055_v36 = vpop.eup %7218 }
 0xd2c   : > { %3791 = vadd.xlane.f32.xlu0 %v9055_v36 }
 0xd2d   : > { %v9058_v22 = vpop.eup %7220  ;;  %v3961_v48 = vpop.xlane.xlu0 %3960 }
 0xd2e   : > { %v3974_v5 = vsub.f32 %v8914_v62, %v3961_v48  ;;  %3793 = vadd.xlane.f32.xlu1 %v9058_v22  ;;  %v6888_v48 = vld [vmem:[%s7645_s29 + $0x168] sm:$0xff]  }
 0xd2f   : > { %v9062_v11 = vpop.eup %7222  ;;  %v3963_v30 = vpop.xlane.xlu1 %3962 }
 0xd30   : > { %v3984_v9 = vmul.f32 1.442695, %v3974_v5  ;;  %v3975_v21 = vsub.f32 %v8919_v63, %v3963_v30  ;;  %3594 = vadd.xlane.f32.xlu0 %v9062_v11 }
 0xd31   : > { %v9066_v34 = vpop.eup %7224  ;;  %v3957_v23 = vpop.xlane.xlu0 %3956 }
 0xd32   : > { %7226 = vpow2.f32 %v3984_v9  ;;  %v3986_v39 = vmul.f32 1.442695, %v3975_v21  ;;  %v3972_v62 = vsub.f32 %v8924_v33, %v3957_v23  ;;  %3596 = vadd.xlane.f32.xlu1 %v9066_v34  ;;  %v6886_v33 = vld [vmem:[%s7645_s29 + $0x160] sm:$0xff]  }
 0xd33   : > { %v3348_v16 = vpop.xlane.xlu1 %3347  ;;  %6274 = vmatprep.subr.bf16.mxu0 %v6886_v33 }
 0xd34   : > { %7228 = vpow2.f32 %v3986_v39  ;;  %v3980_v38 = vmul.f32 1.442695, %v3972_v62  ;;  %v3358_v63 = vsub.f32 %v8929_v37, %v3348_v16  ;;  %6275 = vmatpush3.bf16.msra.mxu0 %v6887_v54  ;;  %v6890_v62 = vld [vmem:[%s7645_s29 + $0x170] sm:$0xff]  }
 0xd35   : > { %v3959_v10 = vpop.xlane.xlu0 %3958  ;;  %6276 = vmatprep.subr.bf16.mxu0 %v6888_v48 }
 0xd36   : > { %7230 = vpow2.f32 %v3980_v38  ;;  %v3973_v28 = vsub.f32 %v8934_v24, %v3959_v10  ;;  %v3371_v50 = vmul.f32 1.442695, %v3358_v63  ;;  %v6892_v63 = vld [vmem:[%s7645_s29 + $0x1c0] sm:$0xff]  }
 0xd37   : > { %v3762_v19 = vpop.xlane.xlu1 %3761  ;;  %6306 = vmatprep.subr.bf16.mxu1 %v6892_v63  ;;  %v6901_v63 = vld [vmem:[%s7645_s29 + $0x198] sm:$0xff]  }
 0xd38   : > { %v3982_v35 = vmul.f32 1.442695, %v3973_v28  ;;  %v3772_v8 = vsub.f32 %v8939_v47, %v3762_v19  ;;  %v6889_v47 = vld [vmem:[%s7645_s29 + $0x128] sm:$0xff]   ;;  %v6893_v28 = vld [vmem:[%s7645_s29 + $0x180] sm:$0xff]  }
 0xd39   : > { %v3346_v52 = vpop.xlane.xlu0 %3345  ;;  %6277 = vmatpush3.bf16.msra.mxu0 %v6889_v47  ;;  %6307 = vmatpush3.bf16.msra.mxu1 %v6893_v28  ;;  %v6898_v47 = vld [vmem:[%s7645_s29 + $0x1d0] sm:$0xff]  }
 0xd3a   : > { %7232 = vpow2.f32 %v3982_v35  ;;  %v3357_v56 = vsub.f32 %v8944_v3, %v3346_v52  ;;  %v3785_v5 = vmul.f32 1.442695, %v3772_v8  ;;  %6278 = vmatprep.subr.bf16.mxu0 %v6890_v62  ;;  %v6896_v52 = vld [vmem:[%s7645_s29 + $0x1c8] sm:$0xff]  }
 0xd3b   : > { %v3561_v37 = vpop.xlane.xlu1 %3560  ;;  %7234 = vpow2.f32 %v3371_v50  ;;  %v6895_v50 = vld [vmem:[%s7645_s29 + $0x138] sm:$0xff]   ;;  %6308 = vmatprep.subr.bf16.mxu1 %v6896_v52  ;;  %v6905_v52 = vld [vmem:[%s7645_s29 + $0x1a8] sm:$0xff]  }
 0xd3c   : > { %v9078_v14 = vpop.eup %7226  ;;  %v3369_v24 = vmul.f32 1.442695, %v3357_v56  ;;  %v3569_v30 = vsub.f32 %v8949_v18, %v3561_v37 }
 0xd3d   : > { %4000 = vadd.xlane.f32.xlu0 %v9078_v14  ;;  %v3760_v9 = vpop.xlane.xlu0 %3759 }
 0xd3e   : > { %v9084_v21 = vpop.eup %7228  ;;  %7236 = vpow2.f32 %v3369_v24  ;;  %v3771_v3 = vsub.f32 %v8955_v58, %v3760_v9  ;;  %v3584_v16 = vmul.f32 1.442695, %v3569_v30  ;;  %v6891_v58 = vld [vmem:[%s7645_s29 + $0x130] sm:$0xff]   ;;  %v6897_v24 = vld [vmem:[%s7645_s29 + $0x188] sm:$0xff]  }
 0xd3f   : > { %4002 = vadd.xlane.f32.xlu1 %v9084_v21  ;;  %v3967_v23 = vpop.xlane.xlu1 %3966  ;;  %7238 = vpow2.f32 %v3785_v5  ;;  %6279 = vmatpush3.bf16.msra.mxu0 %v6891_v58  ;;  %v6900_v58 = vld [vmem:[%s7645_s29 + $0x1d8] sm:$0xff]  }
 0xd40   : > { %v9088_v39 = vpop.eup %7230  ;;  %v3783_v18 = vmul.f32 1.442695, %v3771_v3  ;;  %v3977_v38 = vsub.f32 %v8960_v12, %v3967_v23  ;;  %v6894_v12 = vld [vmem:[%s7645_s29 + $0x178] sm:$0xff]   ;;  %6309 = vmatpush3.bf16.msra.mxu1 %v6897_v24  ;;  %v6906_v24 = vld [vmem:[%s7645_s29 + $0x1f0] sm:$0xff]  }
 0xd41   : > { %3996 = vadd.xlane.f32.xlu0 %v9088_v39  ;;  %v3559_v60 = vpop.xlane.xlu0 %3558  ;;  %6280 = vmatprep.subr.bf16.mxu0 %v6894_v12  ;;  %v6902_v12 = vld [vmem:[%s7645_s29 + $0x1e0] sm:$0xff]  }
 0xd42   : > { %7240 = vpow2.f32 %v3783_v18  ;;  %v3568_v42 = vsub.f32 %v8966_v2, %v3559_v60  ;;  %v3990_v33 = vmul.f32 1.442695, %v3977_v38  ;;  %v6899_v18 = vld [vmem:[%s7645_s29 + $0x190] sm:$0xff]   ;;  %6310 = vmatprep.subr.bf16.mxu1 %v6898_v47  ;;  %v6909_v47 = vld [vmem:[%s7645_s29 + $0x1b8] sm:$0xff]  }
 0xd43   : > { %v3971_v10 = vpop.xlane.xlu1 %3970  ;;  %7242 = vpow2.f32 %v3584_v16  ;;  %6281 = vmatpush3.bf16.msra.mxu0 %v6895_v50 }
 0xd44   : > { %v9097_v19 = vpop.eup %7232  ;;  %v3582_v35 = vmul.f32 1.442695, %v3568_v42  ;;  %v3979_v54 = vsub.f32 %v8972_v15, %v3971_v10  ;;  %6311 = vmatpush3.bf16.msra.mxu1 %v6899_v18 }
 0xd45   : > { %3998 = vadd.xlane.f32.xlu1 %v9097_v19  ;;  %v3965_v2 = vpop.xlane.xlu0 %3964  ;;  %v9105_v56 = vpop.eup %7234  ;;  %6312 = vmatprep.subr.bf16.mxu1 %v6900_v58 }
 0xd46   : > { %7244 = vpow2.f32 %v3582_v35  ;;  %v3976_v8 = vsub.f32 %v8977_v7, %v3965_v2  ;;  %v3994_v5 = vmul.f32 1.442695, %v3979_v54  ;;  %v6903_v54 = vld [vmem:[%s7645_s29 + $0x1a0] sm:$0xff]  }
 0xd47   : > { %v3352_v37 = vpop.xlane.xlu1 %3351  ;;  %7246 = vpow2.f32 %v3990_v33 }
 0xd48   : > { %v9108_v48 = vpop.eup %7236  ;;  %v3988_v15 = vmul.f32 1.442695, %v3976_v8  ;;  %v3360_v30 = vsub.f32 %v8983_v0, %v3352_v37  ;;  %6313 = vmatpush3.bf16.msra.mxu1 %v6901_v63  ;;  %v6904_v8 = vld [vmem:[%s7645_s29 + $0x1e8] sm:$0xff]  }
 0xd49   : > { %3387 = vadd.xlane.f32.xlu1 %v9105_v56  ;;  %3385 = vadd.xlane.f32.xlu0 %v9108_v48  ;;  %v3969_v7 = vpop.xlane.xlu0 %3968  ;;  %v9115_v3 = vpop.eup %7238 }
 0xd4a   : > { %7248 = vpow2.f32 %v3988_v15  ;;  %v3978_v9 = vsub.f32 %v8989_v40, %v3969_v7  ;;  %v3375_v0 = vmul.f32 1.442695, %v3360_v30  ;;  %6314 = vmatprep.subr.bf16.mxu1 %v6902_v12  ;;  %v6908_v7 = vld [vmem:[%s7645_s29 + $0x1f8] sm:$0xff]  }
 0xd4b   : > { %v3766_v23 = vpop.xlane.xlu1 %3765  ;;  %7250 = vpow2.f32 %v3994_v5  ;;  %v6907_v5 = vld [vmem:[%s7645_s29 + $0x1b0] sm:$0xff]  }
 0xd4c   : > { %v9118_v62 = vpop.eup %7240  ;;  %v3992_v16 = vmul.f32 1.442695, %v3978_v9  ;;  %v3774_v38 = vsub.f32 %v8994_v6, %v3766_v23  ;;  %6315 = vmatpush3.bf16.msra.mxu1 %v6903_v54 }
 0xd4d   : > { %3801 = vadd.xlane.f32.xlu1 %v9115_v3  ;;  %3799 = vadd.xlane.f32.xlu0 %v9118_v62  ;;  %v3350_v40 = vpop.xlane.xlu0 %3349  ;;  %v9125_v42 = vpop.eup %7242 }
 0xd4e   : > { %7252 = vpow2.f32 %v3992_v16  ;;  %v3359_v60 = vsub.f32 %v9000_v25, %v3350_v40  ;;  %v3789_v6 = vmul.f32 1.442695, %v3774_v38  ;;  %6316 = vmatprep.subr.bf16.mxu1 %v6904_v8 }
 0xd4f   : > { %7254 = vpow2.f32 %v3375_v0  ;;  %v3380_v16 = vpop.xlane.xlu1 %3379 }
 0xd50   : > { %v9128_v10 = vpop.eup %7244  ;;  %v3373_v28 = vmul.f32 1.442695, %v3359_v60  ;;  %6317 = vmatpush3.bf16.msra.mxu1 %v6905_v52 }
 0xd51   : > { %3600 = vadd.xlane.f32.xlu1 %v9125_v42  ;;  %3598 = vadd.xlane.f32.xlu0 %v9128_v10  ;;  %v3764_v35 = vpop.xlane.xlu0 %3763  ;;  %v9134_v33 = vpop.eup %7246 }
 0xd52   : > { %7256 = vpow2.f32 %v3373_v28  ;;  %v3773_v25 = vsub.f32 %v9009_v44, %v3764_v35  ;;  %6318 = vmatprep.subr.bf16.mxu1 %v6906_v24 }
 0xd53   : > { %7258 = vpow2.f32 %v3789_v6  ;;  %v3384_v38 = vpop.xlane.xlu1 %3383 }
 0xd54   : > { %v9137_v2 = vpop.eup %7248  ;;  %v3787_v50 = vmul.f32 1.442695, %v3773_v25  ;;  %6319 = vmatpush3.bf16.msra.mxu1 %v6907_v5 }
 0xd55   : > { %4006 = vadd.xlane.f32.xlu1 %v9134_v33  ;;  %4004 = vadd.xlane.f32.xlu0 %v9137_v2  ;;  %v9142_v44 = vpop.eup %7250  ;;  %v3378_v18 = vpop.xlane.xlu0 %3377 }
 0xd56   : > { %7260 = vpow2.f32 %v3787_v50  ;;  %6320 = vmatprep.subr.bf16.mxu1 %v6908_v7 }
 0xd57   : > { %7262 = vrcp.f32 %v3380_v16 }
 0xd58   : > { %v9145_v37 = vpop.eup %7252  ;;  %6321 = vmatpush3.bf16.msra.mxu1 %v6909_v47  ;;  %7264 = vrcp.f32 %v3378_v18 }
 0xd59   : > { %4010 = vadd.xlane.f32.xlu1 %v9142_v44  ;;  %4008 = vadd.xlane.f32.xlu0 %v9145_v37  ;;  %v9150_v15 = vpop.eup %7254  ;;  %v3382_v0 = vpop.xlane.xlu0 %3381 }
 0xd5c   : > { %v9153_v30 = vpop.eup %7256 }
 0xd5d   : > { %3391 = vadd.xlane.f32.xlu1 %v9150_v15  ;;  %3389 = vadd.xlane.f32.xlu0 %v9153_v30  ;;  %v9158_v9 = vpop.eup %7258 }
 0xd60   : > { %v9161_v23 = vpop.eup %7260 }
 0xd61   : > { %3805 = vadd.xlane.f32.xlu1 %v9158_v9  ;;  %3803 = vadd.xlane.f32.xlu0 %v9161_v23  ;;  %v7263_v12 = vpop.eup %7262 }
 0xd62   : > { %v7265_v50 = vpop.eup %7264 }
 0xd63   : > { %v3401_v47 = vmul.f32 %v7265_v50, %v9015_v1 }
 0xd8a   : > { %v3591_v40 = vpop.xlane.xlu0 %3590 }
 0xd8c   : > { %v3593_v60 = vpop.xlane.xlu1 %3592 }
 0xd8d   : > { %7266 = vrcp.f32 %v3593_v60 }
 0xd97   : > { %v7267_v8 = vpop.eup %7266 }
 0xdb1   : > { %v9165_v58 = vpop.xlane.xlu0 %3795 }
 0xdb3   : > { %v3798_v63 = vpop.xlane.xlu1 %3797 }
 0xdb5   : > { %v3587_v28 = vpop.xlane.xlu0 %3586 }
 0xdb6   : > { %7268 = vrcp.f32 %v3587_v28 }
 0xdb7   : > { %7270 = vrcp.f32 %v3591_v40  ;;  %v3589_v6 = vpop.xlane.xlu1 %3588  ;;  %v3613_v40 = vmul.f32 %v7267_v8, %v9026_v4 }
 0xdb8   : > { %7272 = vrcp.f32 %v3589_v6 }
 0xdb9   : > { %v3792_v35 = vpop.xlane.xlu0 %3791  ;;  %7274 = vrcp.f32 %v3382_v0  ;;  %v3402_v0 = vmul.f32 %v7263_v12, %v9003_v26 }
 0xdba   : > { %7276 = vrcp.f32 %v3384_v38 }
 0xdbb   : > { %v3794_v25 = vpop.xlane.xlu1 %3793  ;;  %v4028_v28 = vpack.c.bf16 %v3402_v0, %v3401_v47 }
 0xdbd   : > { %v3595_v54 = vpop.xlane.xlu0 %3594 }
 0xdbe   : > { %7278 = vrcp.f32 %v3595_v54 }
 0xdbf   : > { %v3597_v52 = vpop.xlane.xlu1 %3596 }
 0xdc0   : > { %v7269_v24 = vpop.eup %7268  ;;  %7280 = vrcp.f32 %v3597_v52 }
 0xdc1   : > { %v7271_v5 = vpop.eup %7270  ;;  %v3610_v18 = vmul.f32 %v7269_v24, %v9049_v43  ;;  %7282 = vrcp.f32 %v3792_v35 }
 0xdc2   : > { %v7273_v7 = vpop.eup %7272  ;;  %v3612_v38 = vmul.f32 %v7271_v5, %v9023_v59  ;;  %7284 = vrcp.f32 %v3794_v25 }
 0xdc3   : > { %v3611_v16 = vmul.f32 %v7273_v7, %v9052_v32  ;;  %v7275_v6 = vpop.eup %7274 }
 0xdc4   : > { %v4033_v54 = vpack.c.bf16 %v3613_v40, %v3612_v38  ;;  %v7277_v52 = vpop.eup %7276  ;;  %v3403_v43 = vmul.f32 %v7275_v6, %v9018_v31 }
 0xdc5   : > { %v4029_v60 = vpack.c.bf16 %v3611_v16, %v3610_v18  ;;  %v3404_v4 = vmul.f32 %v7277_v52, %v9012_v57 }
 0xdc7   : > { %4333 = vmatprep.mubr.bf16.mxu0 %v4029_v60  ;;  %v4032_v8 = vpack.c.bf16 %v3404_v4, %v3403_v43 }
 0xdc8   : > { %4334 = vmatmul.mubr.bf16.vlgmr.msra.gmra.mrb[72].mxu0 %v4028_v28  ;;  %v7279_v53 = vpop.eup %7278 }
 0xdc9   : > { %4341 = vmatprep.mubr.bf16.mxu0 %v4033_v54  ;;  %v3614_v12 = vmul.f32 %v7279_v53, %v9062_v11 }
 0xdca   : > { %v7281_v1 = vpop.eup %7280  ;;  %v4001_v50 = vpop.xlane.xlu0 %4000 }
 0xdcb   : > { %v3615_v32 = vmul.f32 %v7281_v1, %v9066_v34  ;;  %v7283_v57 = vpop.eup %7282 }
 0xdcc   : > { %v4003_v26 = vpop.xlane.xlu1 %4002  ;;  %v7285_v7 = vpop.eup %7284  ;;  %v3815_v28 = vmul.f32 %v7283_v57, %v9055_v36 }
 0xdcd   : > { %v4037_v24 = vpack.c.bf16 %v3615_v32, %v3614_v12  ;;  %7286 = vrcp.f32 %v4003_v26  ;;  %v3816_v16 = vmul.f32 %v7285_v7, %v9058_v22 }
 0xdce   : > { %v3997_v59 = vpop.xlane.xlu0 %3996 }
 0xdcf   : > { %7288 = vrcp.f32 %v3997_v59  ;;  %v4030_v22 = vpack.c.bf16 %v3816_v16, %v3815_v28 }
 0xdd0   : > { %4342 = vmatmul.mubr.bf16.gmra.mrb[76].mxu0 %v4032_v8  ;;  %7290 = vrcp.f32 %v4001_v50 }
 0xdd1   : > { %4349 = vmatprep.mubr.bf16.mxu0 %v4037_v24 }
 0xdd2   : > { %v3999_v5 = vpop.xlane.xlu1 %3998 }
 0xdd3   : > { %7292 = vrcp.f32 %v3999_v5 }
 0xdd4   : > { %7294 = vrcp.f32 %v3798_v63 }
 0xdd6   : > { %v3388_v31 = vpop.xlane.xlu1 %3387  ;;  %v3386_v34 = vpop.xlane.xlu0 %3385 }
 0xdd7   : > { %7296 = vrcp.f32 %v3388_v31  ;;  %v7287_v53 = vpop.eup %7286 }
 0xdd8   : > { %7298 = vrcp.f32 %v3386_v34  ;;  %v4023_v38 = vmul.f32 %v7287_v53, %v9084_v21 }
 0xdd9   : > { %7300 = vrcp.f32 %v9165_v58  ;;  %v7289_v25 = vpop.eup %7288 }
 0xdda   : > { %v3802_v11 = vpop.xlane.xlu1 %3801  ;;  %v3800_v35 = vpop.xlane.xlu0 %3799  ;;  %v4020_v63 = vmul.f32 %v7289_v25, %v9088_v39 }
 0xddb   : > { %v7291_v47 = vpop.eup %7290  ;;  %7302 = vrcp.f32 %v3802_v11 }
 0xddc   : > { %v4022_v54 = vmul.f32 %v7291_v47, %v9078_v14 }
 0xddd   : > { %v7293_v18 = vpop.eup %7292 }
 0xdde   : > { %v3601_v40 = vpop.xlane.xlu1 %3600  ;;  %v3599_v0 = vpop.xlane.xlu0 %3598  ;;  %v4021_v60 = vmul.f32 %v7293_v18, %v9097_v19  ;;  %v4035_v39 = vpack.c.bf16 %v4023_v38, %v4022_v54  ;;  %v9653_v54 = vmov 0  }
 0xddf   : > { %7304 = vrcp.f32 %v3601_v40  ;;  %v7295_v58 = vpop.eup %7294 }
 0xde0   : > { %7306 = vrcp.f32 %v3599_v0  ;;  %v4031_v6 = vpack.c.bf16 %v4021_v60, %v4020_v63  ;;  %v3818_v14 = vmul.f32 %v7295_v58, %v9046_v55 }
 0xde1   : > { %v7297_v52 = vpop.eup %7296  ;;  %7308 = vrcp.f32 %v3800_v35 }
 0xde2   : > { %v7299_v1 = vpop.eup %7298  ;;  %v4007_v50 = vpop.xlane.xlu1 %4006  ;;  %4398 = vmatprep.mubr.bf16.mxu1 %v4031_v6  ;;  %v3406_v19 = vmul.f32 %v7297_v52, %v9105_v56 }
 0xde3   : > { %v4005_v43 = vpop.xlane.xlu0 %4004  ;;  %7310 = vrcp.f32 %v4007_v50  ;;  %4399 = vmatmul.mubr.bf16.vlgmr.msra.gmra.mrb[72].mxu1 %v4030_v22  ;;  %v3405_v36 = vmul.f32 %v7299_v1, %v9108_v48  ;;  %v7301_v21 = vpop.eup %7300 }
 0xde4   : > { %7312 = vrcp.f32 %v4005_v43  ;;  %4406 = vmatprep.mubr.bf16.mxu1 %v4035_v39  ;;  %v3817_v12 = vmul.f32 %v7301_v21, %v9042_v41 }
 0xde5   : > { %v4036_v32 = vpack.c.bf16 %v3406_v19, %v3405_v36  ;;  %v7303_v59 = vpop.eup %7302 }
 0xde6   : > { %v4011_v4 = vpop.xlane.xlu1 %4010  ;;  %v4034_v56 = vpack.c.bf16 %v3818_v14, %v3817_v12  ;;  %v3820_v47 = vmul.f32 %v7303_v59, %v9115_v3 }
 0xde7   : > { %v4009_v26 = vpop.xlane.xlu0 %4008  ;;  %7314 = vrcp.f32 %v4011_v4  ;;  %4350 = vmatmul.mubr.bf16.gmra.mrb[80].mxu0 %v4036_v32 }
 0xde8   : > { %7316 = vrcp.f32 %v4009_v26 }
 0xde9   : > { %v7305_v8 = vpop.eup %7304 }
 0xdea   : > { %v7307_v24 = vpop.eup %7306  ;;  %v3392_v5 = vpop.xlane.xlu1 %3391  ;;  %v3617_v48 = vmul.f32 %v7305_v8, %v9125_v42 }
 0xdeb   : > { %v3390_v31 = vpop.xlane.xlu0 %3389  ;;  %v7309_v34 = vpop.eup %7308  ;;  %7318 = vrcp.f32 %v3392_v5  ;;  %4407 = vmatmul.mubr.bf16.gmra.mrb[76].mxu1 %v4034_v56  ;;  %v3616_v55 = vmul.f32 %v7307_v24, %v9128_v10  ;;  %v5911_v24 = vld [vmem:[%s9619_s7 + $0x1] ss:$0 sm:$0xff] }
 0xdec   : > { %7320 = vrcp.f32 %v3390_v31  ;;  %v3819_v25 = vmul.f32 %v7309_v34, %v9118_v62 }
 0xded   : > { %v7311_v57 = vpop.eup %7310  ;;  %v4041_v7 = vpack.c.bf16 %v3617_v48, %v3616_v55 }
 0xdee   : > { %v7313_v53 = vpop.eup %7312  ;;  %v3806_v11 = vpop.xlane.xlu1 %3805  ;;  %v4025_v35 = vmul.f32 %v7311_v57, %v9134_v33  ;;  %v4038_v40 = vpack.c.bf16 %v3820_v47, %v3819_v25 }
 0xdef   : > { %v3804_v41 = vpop.xlane.xlu0 %3803  ;;  %7322 = vrcp.f32 %v3806_v11  ;;  %4357 = vmatprep.mubr.bf16.mxu0 %v4041_v7  ;;  %v4024_v42 = vmul.f32 %v7313_v53, %v9137_v2 }
 0xdf0   : > { %7324 = vrcp.f32 %v3804_v41 }
 0xdf1   : > { %v7315_v18 = vpop.eup %7314  ;;  %v4039_v16 = vpack.c.bf16 %v4025_v35, %v4024_v42 }
 0xdf2   : > { %v7317_v10 = vpop.eup %7316  ;;  %v4027_v0 = vmul.f32 %v7315_v18, %v9142_v44 }
 0xdf3   : > { %4414 = vmatprep.mubr.bf16.mxu1 %v4039_v16  ;;  %v4026_v63 = vmul.f32 %v7317_v10, %v9145_v37 }
 0xdf4   : > { %4415 = vmatmul.mubr.bf16.gmra.mrb[80].mxu1 %v4038_v40 }
 0xdf5   : > { %v7319_v33 = vpop.eup %7318  ;;  %v4043_v60 = vpack.c.bf16 %v4027_v0, %v4026_v63 }
 0xdf6   : > { %v7321_v62 = vpop.eup %7320  ;;  %v3408_v3 = vmul.f32 %v7319_v33, %v9150_v15 }
 0xdf7   : > { %4422 = vmatprep.mubr.bf16.mxu1 %v4043_v60  ;;  %v3407_v38 = vmul.f32 %v7321_v62, %v9153_v30 }
 0xdf9   : > { %v7323_v2 = vpop.eup %7322  ;;  %v4040_v28 = vpack.c.bf16 %v3408_v3, %v3407_v38 }
 0xdfa   : > { %v7325_v58 = vpop.eup %7324  ;;  %v3822_v6 = vmul.f32 %v7323_v2, %v9158_v9 }
 0xdfb   : > { %4358 = vmatmul.mubr.bf16.gmra.mrb[84].mxu0 %v4040_v28  ;;  %v3821_v44 = vmul.f32 %v7325_v58, %v9161_v23 }
 0xdfc   : > { %4715 = vmatprep.mubr.bf16.mxu0 %v9653_v54 }
 0xdfd   : > { %v4042_v37 = vpack.c.bf16 %v3822_v6, %v3821_v44 }
 0xdff   : > { %4423 = vmatmul.mubr.bf16.gmra.mrb[84].mxu1 %v4042_v37 }
 0xe9b   : > { %v6282_v52 = vpop.f32.mrb[72].mxu0 }
 0xe9c   : > { %v6283_v22 = vpop.f32.mrb[73].mxu0 }
 0xe9d   : > { %v6284_v1 = vadd.f32 %v6283_v22, %v6282_v52  ;;  %v6285_v50 = vpop.f32.mrb[74].mxu0 }
 0xe9e   : > { %v6286_v15 = vpop.f32.mrb[75].mxu0 }
 0xe9f   : > { %v6287_v43 = vadd.f32 %v6286_v15, %v6285_v50 }
 0xea3   : > { %v6288_v39 = vpop.f32.mrb[76].mxu0 }
 0xea4   : > { %v6289_v30 = vpop.f32.mrb[77].mxu0 }
 0xea5   : > { %v6290_v19 = vadd.f32 %v6289_v30, %v6288_v39  ;;  %v6291_v36 = vpop.f32.mrb[78].mxu0 }
 0xea6   : > { %v6292_v21 = vpop.f32.mrb[79].mxu0 }
 0xea7   : > { %v6293_v32 = vadd.f32 %v6292_v21, %v6291_v36 }
 0xeb6   : > { %v6322_v9 = vpop.f32.mrb[72].mxu1 }
 0xeb7   : > { %v6323_v14 = vpop.f32.mrb[73].mxu1 }
 0xeb8   : > { %v6324_v4 = vadd.f32 %v6323_v14, %v6322_v9  ;;  %v6325_v23 = vpop.f32.mrb[74].mxu1 }
 0xeb9   : > { %v6326_v26 = vpop.f32.mrb[75].mxu1 }
 0xeba   : > { %v4401_v12 = vadd.f32 %v6324_v4, %v6284_v1  ;;  %v6294_v59 = vpop.f32.mrb[80].mxu0  ;;  %v6327_v8 = vadd.f32 %v6326_v26, %v6325_v23  ;;  %v6910_v4 = vld [vmem:[%s9621_s9 + $0x80] ss:$8 sps:$4 sm:$0xff]   ;;  %v6912_v23 = vld [vmem:[%s9621_s9 + $0x84] ss:$8 sps:$4 sm:$0xff]  }
 0xebb   : > { %v6295_v56 = vpop.f32.mrb[81].mxu0  ;;  %4683 = vmatprep.subr.bf16.mxu0 %v6912_v23 }
 0xebc   : > { %v4431_v5 = vadd.f32 %v4401_v12, %v8548_v46  ;;  %v4404_v31 = vadd.f32 %v6327_v8, %v6287_v43  ;;  %v6296_v48 = vadd.f32 %v6295_v56, %v6294_v59  ;;  %v6297_v34 = vpop.f32.mrb[82].mxu0  ;;  %4684 = vmatpush1.bf16.msra.mxu0 %v6910_v4 }
 0xebd   : > { %v6298_v55 = vpop.f32.mrb[83].mxu0 }
 0xebe   : > { %v4432_v57 = vadd.f32 %v4404_v31, %v8552_v20  ;;  %v6299_v7 = vadd.f32 %v6298_v55, %v6297_v34  ;;  %v6328_v53 = vpop.f32.mrb[76].mxu1  ;;  %v9206_v11 = vadd.f32 %v5911_v24, %v4431_v5 }
 0xebf   : > { %v6329_v41 = vpop.f32.mrb[77].mxu1 }
 0xec0   : > { %v6330_v35 = vadd.f32 %v6329_v41, %v6328_v53  ;;  %v6331_v25 = vpop.f32.mrb[78].mxu1  ;;  %4457 = vadd.xlane.f32.xlu0 %v9206_v11  ;;  %v9209_v47 = vadd.f32 %v5911_v24, %v4432_v57 }
 0xec1   : > { %v6332_v42 = vpop.f32.mrb[79].mxu1 }
 0xec2   : > { %v4409_v18 = vadd.f32 %v6330_v35, %v6290_v19  ;;  %v6333_v46 = vadd.f32 %v6332_v42, %v6331_v25  ;;  %4459 = vadd.xlane.f32.xlu1 %v9209_v47 }
 0xec4   : > { %v4433_v16 = vadd.f32 %v4409_v18, %v8556_v13  ;;  %v4412_v10 = vadd.f32 %v6333_v46, %v6293_v32 }
 0xec6   : > { %v4434_v20 = vadd.f32 %v4412_v10, %v8560_v45  ;;  %v9214_v40 = vadd.f32 %v5911_v24, %v4433_v16  ;;  %v6918_v10 = vld [vmem:[%s9621_s9 + $0xa4] ss:$8 sps:$4 sm:$0xff]  }
 0xec7   : > { %v6334_v0 = vpop.f32.mrb[80].mxu1 }
 0xec8   : > { %v6335_v63 = vpop.f32.mrb[81].mxu1  ;;  %4461 = vadd.xlane.f32.xlu0 %v9214_v40  ;;  %v9217_v33 = vadd.f32 %v5911_v24, %v4434_v20 }
 0xec9   : > { %v6336_v60 = vadd.f32 %v6335_v63, %v6334_v0  ;;  %v6337_v62 = vpop.f32.mrb[82].mxu1  ;;  %v6916_v63 = vld [vmem:[%s9621_s9 + $0xa0] ss:$8 sps:$4 sm:$0xff]  }
 0xeca   : > { %v6338_v3 = vpop.f32.mrb[83].mxu1  ;;  %4463 = vadd.xlane.f32.xlu1 %v9217_v33 }
 0xecb   : > { %v4417_v38 = vadd.f32 %v6336_v60, %v6296_v48  ;;  %v6339_v2 = vadd.f32 %v6338_v3, %v6337_v62  ;;  %v6921_v62 = vld [vmem:[%s9621_s9 + $0xb4] ss:$8 sps:$4 sm:$0xff]   ;;  %v6919_v3 = vld [vmem:[%s9621_s9 + $0xb0] ss:$8 sps:$4 sm:$0xff]  }
 0xecd   : > { %v4435_v13 = vadd.f32 %v4417_v38, %v8564_v51  ;;  %v4420_v28 = vadd.f32 %v6339_v2, %v6299_v7 }
 0xece   : > { %v6300_v58 = vpop.f32.mrb[84].mxu0 }
 0xecf   : > { %v4436_v45 = vadd.f32 %v4420_v28, %v8568_v17  ;;  %v6301_v6 = vpop.f32.mrb[85].mxu0  ;;  %v9222_v44 = vadd.f32 %v5911_v24, %v4435_v13  ;;  %v6924_v13 = vld [vmem:[%s9621_s9 + $0xc4] ss:$8 sps:$4 sm:$0xff]  }
 0xed0   : > { %v6302_v37 = vadd.f32 %v6301_v6, %v6300_v58  ;;  %v6303_v52 = vpop.f32.mrb[86].mxu0  ;;  %v6922_v58 = vld [vmem:[%s9621_s9 + $0xc0] ss:$8 sps:$4 sm:$0xff]  }
 0xed1   : > { %4465 = vadd.xlane.f32.xlu0 %v9222_v44  ;;  %v6304_v22 = vpop.f32.mrb[87].mxu0  ;;  %v9225_v1 = vadd.f32 %v5911_v24, %v4436_v45 }
 0xed2   : > { %v6305_v50 = vadd.f32 %v6304_v22, %v6303_v52  ;;  %v6340_v15 = vpop.f32.mrb[84].mxu1  ;;  %v6927_v22 = vld [vmem:[%s9621_s9 + $0xd4] ss:$8 sps:$4 sm:$0xff]  }
 0xed3   : > { %4467 = vadd.xlane.f32.xlu1 %v9225_v1  ;;  %v6341_v43 = vpop.f32.mrb[85].mxu1 }
 0xed4   : > { %v6342_v51 = vadd.f32 %v6341_v43, %v6340_v15  ;;  %v6343_v39 = vpop.f32.mrb[86].mxu1  ;;  %v6930_v43 = vld [vmem:[%s9621_s9 + $0xe4] ss:$8 sps:$4 sm:$0xff]  }
 0xed5   : > { %v6344_v30 = vpop.f32.mrb[87].mxu1 }
 0xed6   : > { %v4425_v19 = vadd.f32 %v6342_v51, %v6302_v37  ;;  %v6345_v17 = vadd.f32 %v6344_v30, %v6343_v39  ;;  %v6928_v51 = vld [vmem:[%s9621_s9 + $0xe0] ss:$8 sps:$4 sm:$0xff]   ;;  %v6933_v39 = vld [vmem:[%s9621_s9 + $0xf4] ss:$8 sps:$4 sm:$0xff]   ;;  %v6931_v30 = vld [vmem:[%s9621_s9 + $0xf0] ss:$8 sps:$4 sm:$0xff]  }
 0xed8   : > { %v4437_v36 = vadd.f32 %v4425_v19, %v8572_v27  ;;  %v4428_v21 = vadd.f32 %v6345_v17, %v6305_v50  ;;  %v6915_v27 = vld [vmem:[%s9621_s9 + $0x94] ss:$8 sps:$4 sm:$0xff]   ;;  %v6925_v50 = vld [vmem:[%s9621_s9 + $0xd0] ss:$8 sps:$4 sm:$0xff]  }
 0xed9   : > { %4685 = vmatprep.subr.bf16.mxu0 %v6915_v27 }
 0xeda   : > { %v4438_v32 = vadd.f32 %v4428_v21, %v8576_v29  ;;  %v9230_v9 = vadd.f32 %v5911_v24, %v4437_v36  ;;  %v6913_v29 = vld [vmem:[%s9621_s9 + $0x90] ss:$8 sps:$4 sm:$0xff]  }
 0xedb   : > { %4686 = vmatpush1.bf16.msra.mxu0 %v6913_v29 }
 0xedc   : > { %4469 = vadd.xlane.f32.xlu0 %v9230_v9  ;;  %v9233_v14 = vadd.f32 %v5911_v24, %v4438_v32  ;;  %4687 = vmatprep.subr.bf16.mxu0 %v6918_v10 }
 0xede   : > { %4471 = vadd.xlane.f32.xlu1 %v9233_v14 }
 0xedf   : > { %4688 = vmatpush1.bf16.msra.mxu0 %v6916_v63 }
 0xee0   : > { %4689 = vmatprep.subr.bf16.mxu0 %v6921_v62 }
 0xee3   : > { %4690 = vmatpush1.bf16.msra.mxu0 %v6919_v3 }
 0xee4   : > { %4691 = vmatprep.subr.bf16.mxu0 %v6924_v13 }
 0xee7   : > { %4692 = vmatpush1.bf16.msra.mxu0 %v6922_v58 }
 0xee8   : > { %4693 = vmatprep.subr.bf16.mxu0 %v6927_v22 }
 0xeeb   : > { %4694 = vmatpush1.bf16.msra.mxu0 %v6925_v50 }
 0xeec   : > { %4695 = vmatprep.subr.bf16.mxu0 %v6930_v43 }
 0xeef   : > { %4696 = vmatpush1.bf16.msra.mxu0 %v6928_v51 }
 0xef0   : > { %4697 = vmatprep.subr.bf16.mxu0 %v6933_v39 }
 0xef3   : > { %4698 = vmatpush1.bf16.msra.mxu0 %v6931_v30 }
 0xf4d   : > { %v4458_v26 = vpop.xlane.xlu0 %4457 }
 0xf4e   : > { %v4473_v12 = vmul.f32 0.0078125, %v4458_v26  ;;  %v5912_v26 = vld [vmem:[%s9620_s8 + $0x2] sm:$0x3] }
 0xf4f   : > { %v4460_v59 = vpop.xlane.xlu1 %4459 }
 0xf50   : > { %v9249_v8 = vsub.f32 %v9206_v11, %v4473_v12  ;;  %v4474_v56 = vmul.f32 0.0078125, %v4460_v59 }
 0xf52   : > { %v9252_v24 = vsub.f32 %v9209_v47, %v4474_v56  ;;  %v4489_v5 = vmul.f32 %v9249_v8, %v9249_v8 }
 0xf54   : > { %4497 = vadd.xlane.f32.xlu0 %v4489_v5  ;;  %v4490_v31 = vmul.f32 %v9252_v24, %v9252_v24  ;;  %v4548_v5 = vrot.slane %v5912_v26, %v7799_v49 }
 0xf55   : > { %v4462_v48 = vpop.xlane.xlu0 %4461 }
 0xf56   : > { %v4475_v34 = vmul.f32 0.0078125, %v4462_v48  ;;  %4499 = vadd.xlane.f32.xlu1 %v4490_v31 }
 0xf57   : > { %v4464_v55 = vpop.xlane.xlu1 %4463 }
 0xf58   : > { %v9259_v57 = vsub.f32 %v9214_v40, %v4475_v34  ;;  %v4476_v7 = vmul.f32 0.0078125, %v4464_v55 }
 0xf5a   : > { %v9262_v53 = vsub.f32 %v9217_v33, %v4476_v7  ;;  %v4491_v41 = vmul.f32 %v9259_v57, %v9259_v57 }
 0xf5c   : > { %4501 = vadd.xlane.f32.xlu0 %v4491_v41  ;;  %v4492_v35 = vmul.f32 %v9262_v53, %v9262_v53 }
 0xf5e   : > { %v4466_v25 = vpop.xlane.xlu0 %4465  ;;  %4503 = vadd.xlane.f32.xlu1 %v4492_v35 }
 0xf5f   : > { %v4477_v42 = vmul.f32 0.0078125, %v4466_v25  ;;  %v4560_v25 = vrot.slane %v5912_v26, %v7806_v61 }
 0xf60   : > { %v4468_v18 = vpop.xlane.xlu1 %4467 }
 0xf61   : > { %v9269_v46 = vsub.f32 %v9222_v44, %v4477_v42  ;;  %v4478_v16 = vmul.f32 0.0078125, %v4468_v18 }
 0xf63   : > { %v9275_v20 = vsub.f32 %v9225_v1, %v4478_v16  ;;  %v4493_v0 = vmul.f32 %v9269_v46, %v9269_v46 }
 0xf65   : > { %4505 = vadd.xlane.f32.xlu0 %v4493_v0  ;;  %v4494_v60 = vmul.f32 %v9275_v20, %v9275_v20 }
 0xf67   : > { %4507 = vadd.xlane.f32.xlu1 %v4494_v60 }
 0xf69   : > { %v4470_v38 = vpop.xlane.xlu0 %4469 }
 0xf6a   : > { %v4479_v2 = vmul.f32 0.0078125, %v4470_v38 }
 0xf6b   : > { %v4472_v28 = vpop.xlane.xlu1 %4471 }
 0xf6c   : > { %v9297_v45 = vsub.f32 %v9230_v9, %v4479_v2  ;;  %v4480_v6 = vmul.f32 0.0078125, %v4472_v28 }
 0xf6e   : > { %v9300_v37 = vsub.f32 %v9233_v14, %v4480_v6  ;;  %v4495_v52 = vmul.f32 %v9297_v45, %v9297_v45 }
 0xf70   : > { %4509 = vadd.xlane.f32.xlu0 %v4495_v52  ;;  %v4496_v15 = vmul.f32 %v9300_v37, %v9300_v37 }
 0xf72   : > { %4511 = vadd.xlane.f32.xlu1 %v4496_v15 }
 0xfe1   : > { %v4498_v19 = vpop.xlane.xlu0 %4497 }
 0xfe2   : > { %v4513_v17 = vmul.f32 0.0078125, %v4498_v19 }
 0xfe3   : > { %v4500_v36 = vpop.xlane.xlu1 %4499 }
 0xfe4   : > { %v4521_v21 = vadd.f32 1e-06, %v4513_v17  ;;  %v4514_v32 = vmul.f32 0.0078125, %v4500_v36 }
 0xfe6   : > { %7326 = vrsqrt.f32 %v4521_v21  ;;  %v4522_v4 = vadd.f32 1e-06, %v4514_v32 }
 0xfe8   : > { %7328 = vrsqrt.f32 %v4522_v4 }
 0xfe9   : > { %v4502_v23 = vpop.xlane.xlu0 %4501 }
 0xfea   : > { %v4515_v27 = vmul.f32 0.0078125, %v4502_v23 }
 0xfeb   : > { %v4504_v29 = vpop.xlane.xlu1 %4503 }
 0xfec   : > { %v4523_v12 = vadd.f32 1e-06, %v4515_v27  ;;  %v4516_v59 = vmul.f32 0.0078125, %v4504_v29 }
 0xfee   : > { %7330 = vrsqrt.f32 %v4523_v12  ;;  %v4524_v56 = vadd.f32 1e-06, %v4516_v59 }
 0xff0   : > { %v7327_v31 = vpop.eup %7326  ;;  %7332 = vrsqrt.f32 %v4524_v56 }
 0xff1   : > { %v4537_v48 = vmul.f32 %v7327_v31, %v9249_v8  ;;  %v6935_v31 = vld [vmem:[%s9623_s11 + $0x80] sm:$0xff]  }
 0xff2   : > { %v7329_v34 = vpop.eup %7328  ;;  %v4506_v55 = vpop.xlane.xlu0 %4505 }
 0xff3   : > { %v4549_v7 = vmul.f32 %v4548_v5, %v4537_v48  ;;  %v4538_v41 = vmul.f32 %v7329_v34, %v9252_v24  ;;  %v4517_v35 = vmul.f32 0.0078125, %v4506_v55  ;;  %v6940_v48 = vld [vmem:[%s9623_s11 + $0xd8] sm:$0xff]   ;;  %v6942_v55 = vld [vmem:[%s9623_s11 + $0xe0] sm:$0xff]  }
 0xff4   : > { %v4508_v42 = vpop.xlane.xlu1 %4507  ;;  %v6941_v34 = vld [vmem:[%s9623_s11 + $0x98] sm:$0xff]  }
 0xff5   : > { %v4550_v18 = vmul.f32 %v4548_v5, %v4538_v41  ;;  %v4525_v16 = vadd.f32 1e-06, %v4517_v35  ;;  %v4518_v10 = vmul.f32 0.0078125, %v4508_v42  ;;  %v4561_v63 = vadd.f32 %v4560_v25, %v4549_v7  ;;  %v6943_v7 = vld [vmem:[%s9623_s11 + $0xa0] sm:$0xff]   ;;  %v6944_v41 = vld [vmem:[%s9623_s11 + $0xe8] sm:$0xff]   ;;  %v6947_v42 = vld [vmem:[%s9623_s11 + $0xb0] sm:$0xff]  }
 0xff6   : > { %v6945_v35 = vld [vmem:[%s9623_s11 + $0xa8] sm:$0xff]  }
 0xff7   : > { %7334 = vrsqrt.f32 %v4525_v16  ;;  %v4526_v0 = vadd.f32 1e-06, %v4518_v10  ;;  %v4562_v60 = vadd.f32 %v4560_v25, %v4550_v18  ;;  %v6948_v18 = vld [vmem:[%s9623_s11 + $0xf8] sm:$0xff]   ;;  %v5929_v10 = vld [vmem:[%s9622_s10 + $0x2] sm:$0x3] }
 0xff8   : > { %v7331_v62 = vpop.eup %7330  ;;  %v6949_v16 = vld [vmem:[%s9623_s11 + $0xb8] sm:$0xff]  }
 0xff9   : > { %7336 = vrsqrt.f32 %v4526_v0  ;;  %v4569_v3 = vpack.c.bf16 %v4562_v60, %v4561_v63  ;;  %v4539_v8 = vmul.f32 %v7331_v62, %v9259_v57  ;;  %v9392_v0 = vrot.slane %v5929_v10, %v7799_v49 }
 0xffa   : > { %v7333_v38 = vpop.eup %7332  ;;  %v9395_v63 = vrot.slane %v5929_v10, %v7806_v61 }
 0xffb   : > { %4716 = vmatmul.mubr.bf16.vlgmr.msra.gmra.mrb[88].mxu0 %v4569_v3  ;;  %v4540_v24 = vmul.f32 %v7333_v38, %v9262_v53  ;;  %v4551_v2 = vmul.f32 %v4548_v5, %v4539_v8 }
 0xffc   : > { %4725 = vmatprep.mubr.bf16.mxu0 %v9653_v54 }
 0xffd   : > { %v4510_v13 = vpop.xlane.xlu0 %4509  ;;  %v4552_v28 = vmul.f32 %v4548_v5, %v4540_v24  ;;  %v4563_v52 = vadd.f32 %v4560_v25, %v4551_v2 }
 0xffe   : > { %v4519_v58 = vmul.f32 0.0078125, %v4510_v13 }
 0xfff   : > { %v4512_v6 = vpop.xlane.xlu1 %4511  ;;  %v4564_v22 = vadd.f32 %v4560_v25, %v4552_v28 }
0x1000   : > { %v4527_v50 = vadd.f32 1e-06, %v4519_v58  ;;  %v4520_v15 = vmul.f32 0.0078125, %v4512_v6 }
0x1001   : > { %v7335_v43 = vpop.eup %7334  ;;  %v4570_v51 = vpack.c.bf16 %v4564_v22, %v4563_v52 }
0x1002   : > { %7338 = vrsqrt.f32 %v4527_v50  ;;  %v4528_v39 = vadd.f32 1e-06, %v4520_v15  ;;  %v4541_v57 = vmul.f32 %v7335_v43, %v9269_v46 }
0x1003   : > { %v7337_v30 = vpop.eup %7336  ;;  %4726 = vmatmul.mubr.bf16.gmra.mrb[92].mxu0 %v4570_v51 }
0x1004   : > { %7340 = vrsqrt.f32 %v4528_v39  ;;  %4735 = vmatprep.mubr.bf16.mxu0 %v9653_v54  ;;  %v4542_v53 = vmul.f32 %v7337_v30, %v9275_v20  ;;  %v4553_v19 = vmul.f32 %v4548_v5, %v4541_v57  ;;  %v6934_v20 = vld [vmem:[%s9623_s11 + $0xc0] sm:$0xff]  }
0x1005   : > { %6346 = vmatprep.subr.bf16.mxu1 %v6934_v20 }
0x1006   : > { %v4554_v17 = vmul.f32 %v4548_v5, %v4542_v53  ;;  %v4565_v36 = vadd.f32 %v4560_v25, %v4553_v19  ;;  %6347 = vmatpush3.bf16.msra.mxu1 %v6935_v31 }
0x1008   : > { %v4566_v21 = vadd.f32 %v4560_v25, %v4554_v17 }
0x100a   : > { %v4571_v32 = vpack.c.bf16 %v4566_v21, %v4565_v36 }
0x100c   : > { %v7339_v4 = vpop.eup %7338  ;;  %4736 = vmatmul.mubr.bf16.gmra.mrb[96].mxu0 %v4571_v32 }
0x100d   : > { %4745 = vmatprep.mubr.bf16.mxu0 %v9653_v54  ;;  %v4543_v23 = vmul.f32 %v7339_v4, %v9297_v45  ;;  %v6936_v54 = vld [vmem:[%s9623_s11 + $0xc8] sm:$0xff]  }
0x100e   : > { %v7341_v27 = vpop.eup %7340  ;;  %v6937_v45 = vld [vmem:[%s9623_s11 + $0x88] sm:$0xff]   ;;  %6348 = vmatprep.subr.bf16.mxu1 %v6936_v54 }
0x100f   : > { %v4544_v46 = vmul.f32 %v7341_v27, %v9300_v37  ;;  %v4555_v29 = vmul.f32 %v4548_v5, %v4543_v23  ;;  %6349 = vmatpush3.bf16.msra.mxu1 %v6937_v45  ;;  %v6938_v37 = vld [vmem:[%s9623_s11 + $0xd0] sm:$0xff]  }
0x1010   : > { %6350 = vmatprep.subr.bf16.mxu1 %v6938_v37 }
0x1011   : > { %v4556_v26 = vmul.f32 %v4548_v5, %v4544_v46  ;;  %v4567_v12 = vadd.f32 %v4560_v25, %v4555_v29  ;;  %v6939_v5 = vld [vmem:[%s9623_s11 + $0x90] sm:$0xff]  }
0x1013   : > { %v4568_v59 = vadd.f32 %v4560_v25, %v4556_v26  ;;  %6351 = vmatpush3.bf16.msra.mxu1 %v6939_v5  ;;  %v6946_v25 = vld [vmem:[%s9623_s11 + $0xf0] sm:$0xff]  }
0x1014   : > { %6352 = vmatprep.subr.bf16.mxu1 %v6940_v48 }
0x1015   : > { %v4572_v56 = vpack.c.bf16 %v4568_v59, %v4567_v12 }
0x1017   : > { %4746 = vmatmul.mubr.bf16.gmra.mrb[100].mxu0 %v4572_v56  ;;  %6353 = vmatpush3.bf16.msra.mxu1 %v6941_v34 }
0x1018   : > { %6354 = vmatprep.subr.bf16.mxu1 %v6942_v55 }
0x101b   : > { %6355 = vmatpush3.bf16.msra.mxu1 %v6943_v7 }
0x101c   : > { %6356 = vmatprep.subr.bf16.mxu1 %v6944_v41 }
0x101f   : > { %6357 = vmatpush3.bf16.msra.mxu1 %v6945_v35 }
0x1020   : > { %6358 = vmatprep.subr.bf16.mxu1 %v6946_v25 }
0x1023   : > { %6359 = vmatpush3.bf16.msra.mxu1 %v6947_v42 }
0x1024   : > { %6360 = vmatprep.subr.bf16.mxu1 %v6948_v18 }
0x1027   : > { %6361 = vmatpush3.bf16.msra.mxu1 %v6949_v16 }
0x10ce   : > { %v4717_v60 = vpop.f32.mrb[88].mxu0 }
0x10cf   : > { %v9398_v62 = vadd.f32 %v4717_v60, %v9392_v0  ;;  %v4719_v3 = vpop.f32.mrb[89].mxu0 }
0x10d0   : > { %v9401_v8 = vadd.f32 %v4719_v3, %v9395_v63  ;;  %v4721_v38 = vpop.f32.mrb[90].mxu0 }
0x10d1   : > { %v5946_v24 = vmul.f32 -1.442695, %v9398_v62  ;;  %v9405_v2 = vadd.f32 %v4721_v38, %v9392_v0  ;;  %v4723_v13 = vpop.f32.mrb[91].mxu0 }
0x10d2   : > { %v5947_v28 = vmul.f32 -1.442695, %v9401_v8  ;;  %v9409_v58 = vadd.f32 %v4723_v13, %v9395_v63 }
0x10d3   : > { %7342 = vpow2.f32 %v5946_v24  ;;  %v5948_v6 = vmul.f32 -1.442695, %v9405_v2 }
0x10d4   : > { %7344 = vpow2.f32 %v5947_v28  ;;  %v5949_v52 = vmul.f32 -1.442695, %v9409_v58 }
0x10d5   : > { %7346 = vpow2.f32 %v5948_v6 }
0x10d6   : > { %7348 = vpow2.f32 %v5949_v52  ;;  %v4727_v22 = vpop.f32.mrb[92].mxu0 }
0x10d7   : > { %v9414_v50 = vadd.f32 %v4727_v22, %v9392_v0  ;;  %v4729_v15 = vpop.f32.mrb[93].mxu0 }
0x10d8   : > { %v9417_v43 = vadd.f32 %v4729_v15, %v9395_v63  ;;  %v4731_v51 = vpop.f32.mrb[94].mxu0 }
0x10d9   : > { %v5950_v39 = vmul.f32 -1.442695, %v9414_v50  ;;  %v9421_v57 = vadd.f32 %v4731_v51, %v9392_v0  ;;  %v4733_v30 = vpop.f32.mrb[95].mxu0 }
0x10da   : > { %v5951_v53 = vmul.f32 -1.442695, %v9417_v43  ;;  %v9425_v19 = vadd.f32 %v4733_v30, %v9395_v63 }
0x10db   : > { %7350 = vpow2.f32 %v5950_v39  ;;  %v5952_v17 = vmul.f32 -1.442695, %v9421_v57 }
0x10dc   : > { %7352 = vpow2.f32 %v5951_v53  ;;  %v5953_v36 = vmul.f32 -1.442695, %v9425_v19 }
0x10dd   : > { %v7343_v21 = vpop.eup %7342  ;;  %7354 = vpow2.f32 %v5952_v17 }
0x10de   : > { %v7345_v32 = vpop.eup %7344  ;;  %v4804_v4 = vadd.f32 1.0, %v7343_v21  ;;  %7356 = vpow2.f32 %v5953_v36 }
0x10df   : > { %v7347_v23 = vpop.eup %7346  ;;  %v4805_v27 = vadd.f32 1.0, %v7345_v32  ;;  %v4737_v46 = vpop.f32.mrb[96].mxu0 }
0x10e0   : > { %v7349_v29 = vpop.eup %7348  ;;  %7358 = vrcp.f32 %v4804_v4  ;;  %v4806_v26 = vadd.f32 1.0, %v7347_v23  ;;  %v9430_v12 = vadd.f32 %v4737_v46, %v9392_v0  ;;  %v4739_v59 = vpop.f32.mrb[97].mxu0 }
0x10e1   : > { %7360 = vrcp.f32 %v4805_v27  ;;  %v4807_v56 = vadd.f32 1.0, %v7349_v29  ;;  %v9433_v20 = vadd.f32 %v4739_v59, %v9395_v63  ;;  %v4741_v31 = vpop.f32.mrb[98].mxu0 }
0x10e2   : > { %7362 = vrcp.f32 %v4806_v26  ;;  %v5954_v54 = vmul.f32 -1.442695, %v9430_v12  ;;  %v9437_v45 = vadd.f32 %v4741_v31, %v9392_v0  ;;  %v4743_v37 = vpop.f32.mrb[99].mxu0 }
0x10e3   : > { %7364 = vrcp.f32 %v4807_v56  ;;  %v5955_v5 = vmul.f32 -1.442695, %v9433_v20  ;;  %v9441_v48 = vadd.f32 %v4743_v37, %v9395_v63 }
0x10e4   : > { %7366 = vpow2.f32 %v5954_v54  ;;  %v5956_v34 = vmul.f32 -1.442695, %v9437_v45 }
0x10e5   : > { %v7351_v55 = vpop.eup %7350  ;;  %7368 = vpow2.f32 %v5955_v5  ;;  %v5957_v7 = vmul.f32 -1.442695, %v9441_v48 }
0x10e6   : > { %v7353_v41 = vpop.eup %7352  ;;  %v4808_v35 = vadd.f32 1.0, %v7351_v55  ;;  %7370 = vpow2.f32 %v5956_v34 }
0x10e7   : > { %v7355_v25 = vpop.eup %7354  ;;  %v4809_v42 = vadd.f32 1.0, %v7353_v41  ;;  %7372 = vpow2.f32 %v5957_v7 }
0x10e8   : > { %v7357_v18 = vpop.eup %7356  ;;  %7374 = vrcp.f32 %v4808_v35  ;;  %v4810_v16 = vadd.f32 1.0, %v7355_v25 }
0x10e9   : > { %7376 = vrcp.f32 %v4809_v42  ;;  %v4811_v10 = vadd.f32 1.0, %v7357_v18 }
0x10ea   : > { %v7359_v60 = vpop.eup %7358  ;;  %7378 = vrcp.f32 %v4810_v16  ;;  %v4747_v3 = vpop.f32.mrb[100].mxu0 }
0x10eb   : > { %v7361_v38 = vpop.eup %7360  ;;  %7380 = vrcp.f32 %v4811_v10  ;;  %v9446_v24 = vadd.f32 %v4747_v3, %v9392_v0  ;;  %v4749_v13 = vpop.f32.mrb[101].mxu0  ;;  %v4852_v15 = vmul.f32 %v7359_v60, %v9398_v62 }
0x10ec   : > { %v7363_v28 = vpop.eup %7362  ;;  %v9449_v6 = vadd.f32 %v4749_v13, %v9395_v63  ;;  %v4751_v52 = vpop.f32.mrb[102].mxu0  ;;  %v4853_v36 = vmul.f32 %v7361_v38, %v9401_v8 }
0x10ed   : > { %v7365_v22 = vpop.eup %7364  ;;  %v4854_v51 = vmul.f32 %v7363_v28, %v9405_v2  ;;  %v5958_v39 = vmul.f32 -1.442695, %v9446_v24  ;;  %v9455_v30 = vadd.f32 %v4751_v52, %v9392_v0  ;;  %v4753_v53 = vpop.f32.mrb[103].mxu0 }
0x10ee   : > { %v7367_v17 = vpop.eup %7366  ;;  %v4855_v21 = vmul.f32 %v7365_v22, %v9409_v58  ;;  %v5959_v32 = vmul.f32 -1.442695, %v9449_v6  ;;  %v9461_v4 = vadd.f32 %v4753_v53, %v9395_v63 }
0x10ef   : > { %v7369_v23 = vpop.eup %7368  ;;  %v4868_v62 = vpack.c.bf16 %v4854_v51, %v4852_v15  ;;  %v4812_v27 = vadd.f32 1.0, %v7367_v17  ;;  %7382 = vpow2.f32 %v5958_v39  ;;  %v5960_v8 = vmul.f32 -1.442695, %v9455_v30 }
0x10f0   : > { %v7371_v2 = vpop.eup %7370  ;;  %v4813_v46 = vadd.f32 1.0, %v7369_v23  ;;  %7384 = vpow2.f32 %v5959_v32  ;;  %v4869_v0 = vpack.c.bf16 %v4855_v21, %v4853_v36  ;;  %v5961_v56 = vmul.f32 -1.442695, %v9461_v4  ;;  %v5995_v23 = vld [vmem:[%s9624_s12 + $0x1] ss:$0 sm:$0xff] }
0x10f1   : > { %v7373_v29 = vpop.eup %7372  ;;  %7386 = vrcp.f32 %v4812_v27  ;;  %v4814_v26 = vadd.f32 1.0, %v7371_v2 }
0x10f2   : > { %v7375_v59 = vpop.eup %7374  ;;  %7388 = vrcp.f32 %v4813_v46  ;;  %v4815_v58 = vadd.f32 1.0, %v7373_v29  ;;  %5045 = vmatprep.mubr.bf16.mxu1 %v4869_v0 }
0x10f3   : > { %v7377_v63 = vpop.eup %7376  ;;  %7390 = vrcp.f32 %v4814_v26  ;;  %5046 = vmatmul.mubr.bf16.vlgmr.msra.gmra.mrb[88].mxu1 %v4868_v62  ;;  %v4856_v37 = vmul.f32 %v7375_v59, %v9414_v50 }
0x10f4   : > { %v7379_v31 = vpop.eup %7378  ;;  %7392 = vrcp.f32 %v4815_v58  ;;  %v4857_v34 = vmul.f32 %v7377_v63, %v9417_v43 }
0x10f5   : > { %v7381_v54 = vpop.eup %7380  ;;  %v4858_v5 = vmul.f32 %v7379_v31, %v9421_v57  ;;  %7394 = vpow2.f32 %v5960_v8 }
0x10f6   : > { %v4859_v55 = vmul.f32 %v7381_v54, %v9425_v19  ;;  %7396 = vpow2.f32 %v5961_v56 }
0x10f7   : > { %v4870_v7 = vpack.c.bf16 %v4858_v5, %v4856_v37 }
0x10f8   : > { %v4871_v41 = vpack.c.bf16 %v4859_v55, %v4857_v34 }
0x10f9   : > { %v7383_v35 = vpop.eup %7382 }
0x10fa   : > { %v7385_v25 = vpop.eup %7384  ;;  %5053 = vmatprep.mubr.bf16.mxu1 %v4871_v41  ;;  %v4816_v16 = vadd.f32 1.0, %v7383_v35 }
0x10fb   : > { %v7387_v42 = vpop.eup %7386  ;;  %5054 = vmatmul.mubr.bf16.gmra.mrb[92].mxu1 %v4870_v7  ;;  %v4817_v60 = vadd.f32 1.0, %v7385_v25 }
0x10fc   : > { %v7389_v18 = vpop.eup %7388  ;;  %v4860_v57 = vmul.f32 %v7387_v42, %v9430_v12  ;;  %7398 = vrcp.f32 %v4816_v16 }
0x10fd   : > { %v7391_v10 = vpop.eup %7390  ;;  %v4861_v19 = vmul.f32 %v7389_v18, %v9433_v20  ;;  %7400 = vrcp.f32 %v4817_v60 }
0x10fe   : > { %v7393_v50 = vpop.eup %7392  ;;  %v4862_v3 = vmul.f32 %v7391_v10, %v9437_v45 }
0x10ff   : > { %v7395_v43 = vpop.eup %7394  ;;  %v4863_v38 = vmul.f32 %v7393_v50, %v9441_v48 }
0x1100   : > { %v7397_v13 = vpop.eup %7396  ;;  %v4818_v28 = vadd.f32 1.0, %v7395_v43  ;;  %v4872_v52 = vpack.c.bf16 %v4862_v3, %v4860_v57 }
0x1101   : > { %v4819_v22 = vadd.f32 1.0, %v7397_v13  ;;  %v4873_v15 = vpack.c.bf16 %v4863_v38, %v4861_v19 }
0x1102   : > { %7402 = vrcp.f32 %v4818_v28 }
0x1103   : > { %7404 = vrcp.f32 %v4819_v22  ;;  %5061 = vmatprep.mubr.bf16.mxu1 %v4873_v15 }
0x1104   : > { %5062 = vmatmul.mubr.bf16.gmra.mrb[96].mxu1 %v4872_v52 }
0x1106   : > { %v7399_v51 = vpop.eup %7398 }
0x1107   : > { %v7401_v12 = vpop.eup %7400  ;;  %v4864_v53 = vmul.f32 %v7399_v51, %v9446_v24 }
0x1108   : > { %v4865_v48 = vmul.f32 %v7401_v12, %v9449_v6 }
0x110c   : > { %v7403_v39 = vpop.eup %7402 }
0x110d   : > { %v7405_v45 = vpop.eup %7404  ;;  %v4866_v20 = vmul.f32 %v7403_v39, %v9455_v30 }
0x110e   : > { %v4867_v17 = vmul.f32 %v7405_v45, %v9461_v4 }
0x110f   : > { %v4874_v36 = vpack.c.bf16 %v4866_v20, %v4864_v53 }
0x1110   : > { %v4875_v21 = vpack.c.bf16 %v4867_v17, %v4865_v48 }
0x1112   : > { %5069 = vmatprep.mubr.bf16.mxu1 %v4875_v21 }
0x1113   : > { %5070 = vmatmul.mubr.bf16.gmra.mrb[100].mxu1 %v4874_v36 }
0x11c6   : > { %v6362_v32 = vpop.f32.mrb[88].mxu1 }
0x11c7   : > { %v6363_v62 = vpop.f32.mrb[89].mxu1 }
0x11c8   : > { %v6364_v27 = vadd.f32 %v6363_v62, %v6362_v32  ;;  %v6365_v2 = vpop.f32.mrb[90].mxu1 }
0x11c9   : > { %v6366_v46 = vpop.f32.mrb[91].mxu1 }
0x11ca   : > { %v5048_v24 = vadd.f32 %v6364_v27, %v5995_v23  ;;  %v6367_v0 = vadd.f32 %v6366_v46, %v6365_v2  ;;  %v6950_v27 = vld [vmem:[%s9626_s14] sm:$0xff]   ;;  %v6951_v2 = vld [vmem:[%s9626_s14 + $0x8] sm:$0xff]  }
0x11cb   : > { %6643 = vmatprep.subr.bf16.mxu0 %v6950_v27 }
0x11cc   : > { %v5051_v30 = vadd.f32 %v6367_v0, %v5995_v23  ;;  %v5078_v6 = vadd.f32 %v5048_v24, %v9206_v11  ;;  %6644 = vmatpush3.bf16.msra.mxu0 %v6950_v27  ;;  %v6952_v0 = vld [vmem:[%s9626_s14 + $0x10] sm:$0xff]  }
0x11cd   : > { %6645 = vmatprep.subr.bf16.mxu0 %v6951_v2 }
0x11ce   : > { %5087 = vadd.xlane.f32.xlu0 %v5078_v6  ;;  %v6368_v4 = vpop.f32.mrb[92].mxu1  ;;  %v5079_v29 = vadd.f32 %v5051_v30, %v9209_v47 }
0x11cf   : > { %v6369_v26 = vpop.f32.mrb[93].mxu1 }
0x11d0   : > { %v6370_v8 = vadd.f32 %v6369_v26, %v6368_v4  ;;  %5089 = vadd.xlane.f32.xlu1 %v5079_v29  ;;  %v6371_v59 = vpop.f32.mrb[94].mxu1  ;;  %6646 = vmatpush3.bf16.msra.mxu0 %v6951_v2 }
0x11d1   : > { %v6372_v58 = vpop.f32.mrb[95].mxu1  ;;  %6647 = vmatprep.subr.bf16.mxu0 %v6952_v0 }
0x11d2   : > { %v5056_v56 = vadd.f32 %v6370_v8, %v5995_v23  ;;  %v6373_v63 = vadd.f32 %v6372_v58, %v6371_v59  ;;  %v6953_v8 = vld [vmem:[%s9626_s14 + $0x18] sm:$0xff]   ;;  %v6954_v58 = vld [vmem:[%s9626_s14 + $0x20] sm:$0xff]  }
0x11d4   : > { %v5059_v31 = vadd.f32 %v6373_v63, %v5995_v23  ;;  %v5080_v54 = vadd.f32 %v5056_v56, %v9214_v40  ;;  %6648 = vmatpush3.bf16.msra.mxu0 %v6952_v0  ;;  %v6955_v56 = vld [vmem:[%s9626_s14 + $0x28] sm:$0xff]   ;;  %v6956_v63 = vld [vmem:[%s9626_s14 + $0x30] sm:$0xff]  }
0x11d5   : > { %6649 = vmatprep.subr.bf16.mxu0 %v6953_v8 }
0x11d6   : > { %5091 = vadd.xlane.f32.xlu0 %v5080_v54  ;;  %v5081_v37 = vadd.f32 %v5059_v31, %v9217_v33  ;;  %v6957_v31 = vld [vmem:[%s9626_s14 + $0x38] sm:$0xff]  }
0x11d7   : > { %v6374_v5 = vpop.f32.mrb[96].mxu1 }
0x11d8   : > { %v6375_v34 = vpop.f32.mrb[97].mxu1  ;;  %5093 = vadd.xlane.f32.xlu1 %v5081_v37  ;;  %6650 = vmatpush3.bf16.msra.mxu0 %v6953_v8 }
0x11d9   : > { %v6376_v11 = vadd.f32 %v6375_v34, %v6374_v5  ;;  %v6377_v55 = vpop.f32.mrb[98].mxu1  ;;  %6651 = vmatprep.subr.bf16.mxu0 %v6954_v58 }
0x11da   : > { %v6378_v7 = vpop.f32.mrb[99].mxu1 }
0x11db   : > { %v5064_v47 = vadd.f32 %v6376_v11, %v5995_v23  ;;  %v6379_v41 = vadd.f32 %v6378_v7, %v6377_v55 }
0x11dc   : > { %6652 = vmatpush3.bf16.msra.mxu0 %v6954_v58 }
0x11dd   : > { %v5067_v35 = vadd.f32 %v6379_v41, %v5995_v23  ;;  %v5082_v25 = vadd.f32 %v5064_v47, %v9222_v44  ;;  %6653 = vmatprep.subr.bf16.mxu0 %v6955_v56 }
0x11df   : > { %5095 = vadd.xlane.f32.xlu0 %v5082_v25  ;;  %v5083_v42 = vadd.f32 %v5067_v35, %v9225_v1  ;;  %v5086_v35 = vld [vmem:[%s9625_s13] sm:$0x3] }
0x11e0   : > { %6654 = vmatpush3.bf16.msra.mxu0 %v6955_v56 }
0x11e1   : > { %5097 = vadd.xlane.f32.xlu1 %v5083_v42  ;;  %6655 = vmatprep.subr.bf16.mxu0 %v6956_v63 }
0x11e4   : > { %6656 = vmatpush3.bf16.msra.mxu0 %v6956_v63 }
0x11e5   : > { %6657 = vmatprep.subr.bf16.mxu0 %v6957_v31 }
0x11e6   : > { %v6380_v18 = vpop.f32.mrb[100].mxu1 }
0x11e7   : > { %v6381_v40 = vpop.f32.mrb[101].mxu1 }
0x11e8   : > { %v6382_v16 = vadd.f32 %v6381_v40, %v6380_v18  ;;  %v6383_v10 = vpop.f32.mrb[102].mxu1  ;;  %6658 = vmatpush3.bf16.msra.mxu0 %v6957_v31  ;;  %v5178_v40 = vrot.slane %v5086_v35, %v7799_v49 }
0x11e9   : > { %v6384_v33 = vpop.f32.mrb[103].mxu1 }
0x11ea   : > { %v5072_v60 = vadd.f32 %v6382_v16, %v5995_v23  ;;  %v6385_v50 = vadd.f32 %v6384_v33, %v6383_v10 }
0x11ec   : > { %v5075_v57 = vadd.f32 %v6385_v50, %v5995_v23  ;;  %v5084_v3 = vadd.f32 %v5072_v60, %v9230_v9 }
0x11ee   : > { %5099 = vadd.xlane.f32.xlu0 %v5084_v3  ;;  %v5085_v43 = vadd.f32 %v5075_v57, %v9233_v14 }
0x11f0   : > { %5101 = vadd.xlane.f32.xlu1 %v5085_v43 }
0x125b   : > { %v5088_v19 = vpop.xlane.xlu0 %5087 }
0x125c   : > { %v5103_v44 = vmul.f32 0.0078125, %v5088_v19 }
0x125d   : > { %v5090_v38 = vpop.xlane.xlu1 %5089 }
0x125e   : > { %v9488_v13 = vsub.f32 %v5078_v6, %v5103_v44  ;;  %v5104_v1 = vmul.f32 0.0078125, %v5090_v38 }
0x1260   : > { %v9490_v28 = vsub.f32 %v5079_v29, %v5104_v1  ;;  %v5119_v52 = vmul.f32 %v9488_v13, %v9488_v13 }
0x1262   : > { %5127 = vadd.xlane.f32.xlu0 %v5119_v52  ;;  %v5120_v22 = vmul.f32 %v9490_v28, %v9490_v28 }
0x1263   : > { %v5092_v9 = vpop.xlane.xlu0 %5091 }
0x1264   : > { %v5105_v15 = vmul.f32 0.0078125, %v5092_v9  ;;  %5129 = vadd.xlane.f32.xlu1 %v5120_v22 }
0x1265   : > { %v5094_v14 = vpop.xlane.xlu1 %5093 }
0x1266   : > { %v9496_v51 = vsub.f32 %v5080_v54, %v5105_v15  ;;  %v5106_v12 = vmul.f32 0.0078125, %v5094_v14 }
0x1268   : > { %v9498_v39 = vsub.f32 %v5081_v37, %v5106_v12  ;;  %v5121_v45 = vmul.f32 %v9496_v51, %v9496_v51 }
0x126a   : > { %5131 = vadd.xlane.f32.xlu0 %v5121_v45  ;;  %v5122_v53 = vmul.f32 %v9498_v39, %v9498_v39 }
0x126c   : > { %v5096_v20 = vpop.xlane.xlu0 %5095  ;;  %5133 = vadd.xlane.f32.xlu1 %v5122_v53 }
0x126d   : > { %v5107_v48 = vmul.f32 0.0078125, %v5096_v20 }
0x126e   : > { %v5098_v17 = vpop.xlane.xlu1 %5097 }
0x126f   : > { %v9504_v36 = vsub.f32 %v5082_v25, %v5107_v48  ;;  %v5108_v21 = vmul.f32 0.0078125, %v5098_v17 }
0x1271   : > { %v9506_v32 = vsub.f32 %v5083_v42, %v5108_v21  ;;  %v5123_v23 = vmul.f32 %v9504_v36, %v9504_v36 }
0x1273   : > { %5135 = vadd.xlane.f32.xlu0 %v5123_v23  ;;  %v5124_v62 = vmul.f32 %v9506_v32, %v9506_v32 }
0x1275   : > { %5137 = vadd.xlane.f32.xlu1 %v5124_v62 }
0x127b   : > { %v5100_v46 = vpop.xlane.xlu0 %5099 }
0x127c   : > { %v5109_v24 = vmul.f32 0.0078125, %v5100_v46 }
0x127d   : > { %v5102_v30 = vpop.xlane.xlu1 %5101 }
0x127e   : > { %v9521_v6 = vsub.f32 %v5084_v3, %v5109_v24  ;;  %v5110_v4 = vmul.f32 0.0078125, %v5102_v30 }
0x1280   : > { %v9523_v29 = vsub.f32 %v5085_v43, %v5110_v4  ;;  %v5125_v26 = vmul.f32 %v9521_v6, %v9521_v6  ;;  %v5190_v43 = vrot.slane %v5086_v35, %v7806_v61 }
0x1282   : > { %5139 = vadd.xlane.f32.xlu0 %v5125_v26  ;;  %v5126_v59 = vmul.f32 %v9523_v29, %v9523_v29 }
0x1284   : > { %5141 = vadd.xlane.f32.xlu1 %v5126_v59 }
0x12ef   : > { %v5128_v54 = vpop.xlane.xlu0 %5127 }
0x12f0   : > { %v5143_v37 = vmul.f32 0.0078125, %v5128_v54 }
0x12f1   : > { %v5130_v5 = vpop.xlane.xlu1 %5129 }
0x12f2   : > { %v5151_v34 = vadd.f32 1e-06, %v5143_v37  ;;  %v5144_v11 = vmul.f32 0.0078125, %v5130_v5 }
0x12f4   : > { %7406 = vrsqrt.f32 %v5151_v34  ;;  %v5152_v55 = vadd.f32 1e-06, %v5144_v11  ;;  %v6012_v34 = vld [vmem:[%s9627_s15] ss:$0 sm:$0xff] }
0x12f6   : > { %7408 = vrsqrt.f32 %v5152_v55 }
0x12f7   : > { %v5132_v7 = vpop.xlane.xlu0 %5131 }
0x12f8   : > { %v5145_v47 = vmul.f32 0.0078125, %v5132_v7 }
0x12f9   : > { %v5134_v41 = vpop.xlane.xlu1 %5133 }
0x12fa   : > { %v5153_v25 = vadd.f32 1e-06, %v5145_v47  ;;  %v5146_v42 = vmul.f32 0.0078125, %v5134_v41 }
0x12fc   : > { %7410 = vrsqrt.f32 %v5153_v25  ;;  %v5154_v18 = vadd.f32 1e-06, %v5146_v42 }
0x12fe   : > { %v7407_v16 = vpop.eup %7406  ;;  %7412 = vrsqrt.f32 %v5154_v18 }
0x12ff   : > { %v5167_v10 = vmul.f32 %v7407_v16, %v9488_v13 }
0x1300   : > { %v7409_v33 = vpop.eup %7408  ;;  %v5136_v60 = vpop.xlane.xlu0 %5135 }
0x1301   : > { %v5147_v50 = vmul.f32 0.0078125, %v5136_v60  ;;  %v5168_v57 = vmul.f32 %v7409_v33, %v9490_v28  ;;  %v5179_v3 = vmul.f32 %v5178_v40, %v5167_v10 }
0x1302   : > { %v5138_v19 = vpop.xlane.xlu1 %5137 }
0x1303   : > { %v5155_v44 = vadd.f32 1e-06, %v5147_v50  ;;  %v5148_v38 = vmul.f32 0.0078125, %v5138_v19  ;;  %v5180_v1 = vmul.f32 %v5178_v40, %v5168_v57  ;;  %v5191_v22 = vadd.f32 %v5190_v43, %v5179_v3 }
0x1305   : > { %7414 = vrsqrt.f32 %v5155_v44  ;;  %v5156_v52 = vadd.f32 1e-06, %v5148_v38  ;;  %v5192_v9 = vadd.f32 %v5190_v43, %v5180_v1 }
0x1306   : > { %v7411_v15 = vpop.eup %7410 }
0x1307   : > { %v5169_v14 = vmul.f32 %v7411_v15, %v9496_v51  ;;  %7416 = vrsqrt.f32 %v5156_v52  ;;  %v5199_v13 = vpack.c.bf16 %v5192_v9, %v5191_v22 }
0x1308   : > { %v7413_v12 = vpop.eup %7412 }
0x1309   : > { %v5181_v45 = vmul.f32 %v5178_v40, %v5169_v14  ;;  %v5170_v28 = vmul.f32 %v7413_v12, %v9498_v39  ;;  %6659 = vmatprep.mubr.bf16.mxu0 %v5199_v13 }
0x130b   : > { %v5182_v53 = vmul.f32 %v5178_v40, %v5170_v28  ;;  %v5193_v20 = vadd.f32 %v5190_v43, %v5181_v45 }
0x130d   : > { %v5194_v48 = vadd.f32 %v5190_v43, %v5182_v53 }
0x130f   : > { %v7415_v17 = vpop.eup %7414  ;;  %v5140_v21 = vpop.xlane.xlu0 %5139  ;;  %v5200_v23 = vpack.c.bf16 %v5194_v48, %v5193_v20 }
0x1310   : > { %v5149_v62 = vmul.f32 0.0078125, %v5140_v21  ;;  %v5171_v27 = vmul.f32 %v7415_v17, %v9504_v36 }
0x1311   : > { %v7417_v2 = vpop.eup %7416  ;;  %v5142_v46 = vpop.xlane.xlu1 %5141  ;;  %6660 = vmatmul.mubr.bf16.vlgmr.msra.gmra.mrb[104].mxu0 %v5200_v23 }
0x1312   : > { %v5157_v51 = vadd.f32 1e-06, %v5149_v62  ;;  %v5150_v24 = vmul.f32 0.0078125, %v5142_v46  ;;  %v5172_v0 = vmul.f32 %v7417_v2, %v9506_v32  ;;  %v5183_v30 = vmul.f32 %v5178_v40, %v5171_v27 }
0x1314   : > { %7418 = vrsqrt.f32 %v5157_v51  ;;  %v5158_v39 = vadd.f32 1e-06, %v5150_v24  ;;  %v5184_v4 = vmul.f32 %v5178_v40, %v5172_v0  ;;  %v5195_v26 = vadd.f32 %v5190_v43, %v5183_v30 }
0x1316   : > { %7420 = vrsqrt.f32 %v5158_v39  ;;  %v5196_v8 = vadd.f32 %v5190_v43, %v5184_v4  ;;  %v7466_v4 = vmov 0.0  }
0x1317   : > { %6667 = vmatprep.subr.bf16.mxu1 %v7466_v4  ;;  %6675 = vmatprep.mubr.msk.bf16.mxu1 %vm7467_vm2, %v7466_v4 }
0x1318   : > { %v5201_v59 = vpack.c.bf16 %v5196_v8, %v5195_v26  ;;  %v5457_v26 = vld [vmem:[#allocation2] sm:$0x1] }
0x131a   : > { %6663 = vmatprep.mubr.bf16.mxu0 %v5201_v59 }
0x131e   : > { %v7419_v58 = vpop.eup %7418 }
0x131f   : > { %v5173_v56 = vmul.f32 %v7419_v58, %v9521_v6 }
0x1320   : > { %v7421_v36 = vpop.eup %7420 }
0x1321   : > { %v5174_v63 = vmul.f32 %v7421_v36, %v9523_v29  ;;  %v5185_v31 = vmul.f32 %v5178_v40, %v5173_v56 }
0x1323   : > { %v5186_v54 = vmul.f32 %v5178_v40, %v5174_v63  ;;  %v5197_v37 = vadd.f32 %v5190_v43, %v5185_v31 }
0x1325   : > { %v5198_v5 = vadd.f32 %v5190_v43, %v5186_v54 }
0x1327   : > { %v5202_v32 = vpack.c.bf16 %v5198_v5, %v5197_v37 }
0x1329   : > { %6664 = vmatmul.mubr.bf16.gmra.mrb[108].mxu0 %v5202_v32 }
0x13e4   : > { %v6661_v11 = vpop.f32.mrb[104].mxu0 }
0x13e5   : > { %v5308_v55 = vpop.f32.mrb[105].mxu0  ;;  %v5317_v6 = vadd.f32 %v6661_v11, %v6012_v34  ;;  %v5339_v11 = vld [vmem:[%s9628_s16] sm:$0x3] }
0x13e6   : > { %v5309_v7 = vadd.f32 %v6012_v34, %v5308_v55  ;;  %v6662_v47 = vpop.f32.mrb[106].mxu0  ;;  %v5431_v55 = vrot.slane %v5339_v11, %v7799_v49 }
0x13e7   : > { %v5311_v41 = vpop.f32.mrb[107].mxu0  ;;  %v5320_v29 = vadd.f32 %v6662_v47, %v6012_v34 }
0x13e8   : > { %v5312_v35 = vadd.f32 %v6012_v34, %v5311_v41  ;;  %5340 = vadd.xlane.f32.xlu0 %v5309_v7 }
0x13ea   : > { %5342 = vadd.xlane.f32.xlu1 %v5312_v35 }
0x13ec   : > { %5344 = vadd.xlane.f32.xlu0 %v5317_v6 }
0x13ee   : > { %5346 = vadd.xlane.f32.xlu1 %v5320_v29 }
0x13fc   : > { %v6665_v25 = vpop.f32.mrb[108].mxu0 }
0x13fd   : > { %v5324_v42 = vpop.f32.mrb[109].mxu0  ;;  %v5333_v33 = vadd.f32 %v6665_v25, %v6012_v34 }
0x13fe   : > { %v5325_v18 = vadd.f32 %v6012_v34, %v5324_v42  ;;  %v6666_v40 = vpop.f32.mrb[110].mxu0 }
0x13ff   : > { %v5327_v16 = vpop.f32.mrb[111].mxu0  ;;  %v5336_v60 = vadd.f32 %v6666_v40, %v6012_v34 }
0x1400   : > { %v5328_v10 = vadd.f32 %v6012_v34, %v5327_v16  ;;  %5348 = vadd.xlane.f32.xlu0 %v5325_v18 }
0x1402   : > { %5350 = vadd.xlane.f32.xlu1 %v5328_v10 }
0x1404   : > { %5352 = vadd.xlane.f32.xlu0 %v5333_v33 }
0x1406   : > { %5354 = vadd.xlane.f32.xlu1 %v5336_v60 }
0x1475   : > { %v5341_v50 = vpop.xlane.xlu0 %5340 }
0x1476   : > { %v5356_v57 = vmul.f32 0.0078125, %v5341_v50 }
0x1477   : > { %v5343_v3 = vpop.xlane.xlu1 %5342 }
0x1478   : > { %v5364_v43 = vsub.f32 %v5309_v7, %v5356_v57  ;;  %v5357_v19 = vmul.f32 0.0078125, %v5343_v3 }
0x1479   : > { %v5345_v44 = vpop.xlane.xlu0 %5344 }
0x147a   : > { %v5365_v38 = vsub.f32 %v5312_v35, %v5357_v19  ;;  %v5358_v1 = vmul.f32 0.0078125, %v5345_v44  ;;  %v5372_v52 = vmul.f32 %v5364_v43, %v5364_v43 }
0x147b   : > { %v5347_v22 = vpop.xlane.xlu1 %5346 }
0x147c   : > { %v9560_v9 = vsub.f32 %v5317_v6, %v5358_v1  ;;  %v5359_v15 = vmul.f32 0.0078125, %v5347_v22  ;;  %5380 = vadd.xlane.f32.xlu0 %v5372_v52  ;;  %v5373_v14 = vmul.f32 %v5365_v38, %v5365_v38 }
0x147e   : > { %v5367_v13 = vsub.f32 %v5320_v29, %v5359_v15  ;;  %5382 = vadd.xlane.f32.xlu1 %v5373_v14  ;;  %v5374_v12 = vmul.f32 %v9560_v9, %v9560_v9  ;;  %v5443_v29 = vrot.slane %v5339_v11, %v7806_v61 }
0x1480   : > { %5384 = vadd.xlane.f32.xlu0 %v5374_v12  ;;  %v5375_v45 = vmul.f32 %v5367_v13, %v5367_v13 }
0x1482   : > { %5386 = vadd.xlane.f32.xlu1 %v5375_v45 }
0x148d   : > { %v5349_v28 = vpop.xlane.xlu0 %5348 }
0x148e   : > { %v5360_v53 = vmul.f32 0.0078125, %v5349_v28 }
0x148f   : > { %v5351_v20 = vpop.xlane.xlu1 %5350 }
0x1490   : > { %v9564_v48 = vsub.f32 %v5325_v18, %v5360_v53  ;;  %v5361_v17 = vmul.f32 0.0078125, %v5351_v20 }
0x1491   : > { %v5353_v21 = vpop.xlane.xlu0 %5352 }
0x1492   : > { %v9566_v23 = vsub.f32 %v5328_v10, %v5361_v17  ;;  %v5362_v62 = vmul.f32 0.0078125, %v5353_v21  ;;  %v5376_v27 = vmul.f32 %v9564_v48, %v9564_v48 }
0x1493   : > { %v5355_v2 = vpop.xlane.xlu1 %5354 }
0x1494   : > { %v9570_v46 = vsub.f32 %v5333_v33, %v5362_v62  ;;  %v5363_v51 = vmul.f32 0.0078125, %v5355_v2  ;;  %5388 = vadd.xlane.f32.xlu0 %v5376_v27  ;;  %v5377_v24 = vmul.f32 %v9566_v23, %v9566_v23 }
0x1496   : > { %v9574_v0 = vsub.f32 %v5336_v60, %v5363_v51  ;;  %5390 = vadd.xlane.f32.xlu1 %v5377_v24  ;;  %v5378_v30 = vmul.f32 %v9570_v46, %v9570_v46 }
0x1498   : > { %5392 = vadd.xlane.f32.xlu0 %v5378_v30  ;;  %v5379_v39 = vmul.f32 %v9574_v0, %v9574_v0 }
0x149a   : > { %5394 = vadd.xlane.f32.xlu1 %v5379_v39 }
0x14ae   : > { %5460 = vperm.xlu0 %6773, %v5457_v26  }
0x1509   : > { %v5381_v8 = vpop.xlane.xlu0 %5380 }
0x150a   : > { %v5396_v59 = vmul.f32 0.0078125, %v5381_v8 }
0x150b   : > { %v5383_v58 = vpop.xlane.xlu1 %5382 }
0x150c   : > { %v5404_v56 = vadd.f32 1e-06, %v5396_v59  ;;  %v5397_v36 = vmul.f32 0.0078125, %v5383_v58 }
0x150d   : > { %v5385_v63 = vpop.xlane.xlu0 %5384 }
0x150e   : > { %7422 = vrsqrt.f32 %v5404_v56  ;;  %v5405_v31 = vadd.f32 1e-06, %v5397_v36  ;;  %v5398_v54 = vmul.f32 0.0078125, %v5385_v63  ;;  %v5452_v56 = vld [vmem:[%s9629_s17] sm:$0x1] }
0x150f   : > { %v5387_v37 = vpop.xlane.xlu1 %5386 }
0x1510   : > { %7424 = vrsqrt.f32 %v5405_v31  ;;  %v5406_v5 = vadd.f32 1e-06, %v5398_v54  ;;  %v5399_v32 = vmul.f32 0.0078125, %v5387_v37 }
0x1512   : > { %7426 = vrsqrt.f32 %v5406_v5  ;;  %v5407_v34 = vadd.f32 1e-06, %v5399_v32 }
0x1514   : > { %7428 = vrsqrt.f32 %v5407_v34 }
0x1518   : > { %v7423_v7 = vpop.eup %7422 }
0x1519   : > { %v5420_v47 = vmul.f32 %v7423_v7, %v5364_v43 }
0x151a   : > { %v7425_v41 = vpop.eup %7424 }
0x151b   : > { %v5421_v35 = vmul.f32 %v7425_v41, %v5365_v38  ;;  %v5432_v6 = vmul.f32 %v5431_v55, %v5420_v47 }
0x151c   : > { %v7427_v25 = vpop.eup %7426 }
0x151d   : > { %v5433_v42 = vmul.f32 %v5431_v55, %v5421_v35  ;;  %v5422_v40 = vmul.f32 %v7427_v25, %v9560_v9  ;;  %v5444_v10 = vadd.f32 %v5443_v29, %v5432_v6 }
0x151e   : > { %v7429_v18 = vpop.eup %7428 }
0x151f   : > { %v5423_v16 = vmul.f32 %v7429_v18, %v5367_v13  ;;  %v5445_v33 = vadd.f32 %v5443_v29, %v5433_v42  ;;  %v5434_v43 = vmul.f32 %v5431_v55, %v5422_v40 }
0x1521   : > { %v5389_v60 = vpop.xlane.xlu0 %5388  ;;  %v5453_v50 = vpack.c.bf16 %v5445_v33, %v5444_v10  ;;  %v5435_v57 = vmul.f32 %v5431_v55, %v5423_v16  ;;  %v5446_v15 = vadd.f32 %v5443_v29, %v5434_v43 }
0x1522   : > { %v5400_v3 = vmul.f32 0.0078125, %v5389_v60 }
0x1523   : > { %v5391_v19 = vpop.xlane.xlu1 %5390  ;;  %6668 = vmatpush3.bf16.xpose.msra.mxu1 %v5453_v50  ;;  %v5447_v1 = vadd.f32 %v5443_v29, %v5435_v57 }
0x1524   : > { %v5408_v44 = vadd.f32 1e-06, %v5400_v3  ;;  %v5401_v38 = vmul.f32 0.0078125, %v5391_v19  ;;  %6669 = vmatprep.subr.bf16.mxu1 %v7466_v4 }
0x1525   : > { %v5393_v61 = vpop.xlane.xlu0 %5392  ;;  %v5454_v12 = vpack.c.bf16 %v5447_v1, %v5446_v15 }
0x1526   : > { %7430 = vrsqrt.f32 %v5408_v44  ;;  %v5409_v52 = vadd.f32 1e-06, %v5401_v38  ;;  %v5402_v22 = vmul.f32 0.0078125, %v5393_v61 }
0x1527   : > { %v5395_v9 = vpop.xlane.xlu1 %5394 }
0x1528   : > { %7432 = vrsqrt.f32 %v5409_v52  ;;  %v5410_v14 = vadd.f32 1e-06, %v5402_v22  ;;  %v5403_v13 = vmul.f32 0.0078125, %v5395_v9 }
0x152a   : > { %7434 = vrsqrt.f32 %v5410_v14  ;;  %v5411_v45 = vadd.f32 1e-06, %v5403_v13 }
0x152b   : > { %6670 = vmatpush3.bf16.xpose.msra.mxu1 %v5454_v12 }
0x152c   : > { %7436 = vrsqrt.f32 %v5411_v45  ;;  %6671 = vmatprep.subr.bf16.mxu1 %v7466_v4 }
0x1530   : > { %v7431_v28 = vpop.eup %7430 }
0x1531   : > { %v5424_v53 = vmul.f32 %v7431_v28, %v9564_v48 }
0x1532   : > { %v7433_v20 = vpop.eup %7432 }
0x1533   : > { %v5425_v17 = vmul.f32 %v7433_v20, %v9566_v23  ;;  %v5436_v21 = vmul.f32 %v5431_v55, %v5424_v53 }
0x1534   : > { %v7435_v62 = vpop.eup %7434 }
0x1535   : > { %v5437_v27 = vmul.f32 %v5431_v55, %v5425_v17  ;;  %v5426_v51 = vmul.f32 %v7435_v62, %v9570_v46  ;;  %v5448_v30 = vadd.f32 %v5443_v29, %v5436_v21  ;;  %v5461_v46 = vpop.permute.xlu0 %5460 }
0x1536   : > { %v7437_v2 = vpop.eup %7436 }
0x1537   : > { %v5427_v24 = vmul.f32 %v7437_v2, %v9574_v0  ;;  %v5449_v39 = vadd.f32 %v5443_v29, %v5437_v27  ;;  %v5438_v59 = vmul.f32 %v5431_v55, %v5426_v51  ;;  %v5466_v0 = vrot.slane %v5461_v46, %v7799_v49 }
0x1539   : > { %v5455_v26 = vpack.c.bf16 %v5449_v39, %v5448_v30  ;;  %v5439_v8 = vmul.f32 %v5431_v55, %v5427_v24  ;;  %v5450_v58 = vadd.f32 %v5443_v29, %v5438_v59 }
0x153b   : > { %6672 = vmatpush3.bf16.xpose.msra.mxu1 %v5455_v26  ;;  %v5451_v48 = vadd.f32 %v5443_v29, %v5439_v8 }
0x153c   : > { %6673 = vmatprep.subr.bf16.mxu1 %v7466_v4 }
0x153d   : > { %v5456_v23 = vpack.c.bf16 %v5451_v48, %v5450_v58 }
0x1543   : > { %6674 = vmatpush3.bf16.xpose.msra.mxu1 %v5456_v23 }
0x154a   : > { %6676 = vmatmul.mubr.bf16.vlgmr.msra.gmra.mrb[104].mxu1 %v5452_v56 }
0x161d   : > { %v5501_v36 = vpop.f32.mrb[104].mxu1 }
0x161e   : > { %v5502_v63 = vadd.f32 %v5501_v36, %v5466_v0  ;;  %v6677_v4 = vpop.f32.mrb[105].mxu1 }
0x161f   : > { %v5504_v31 = vpop.f32.mrb[106].mxu1 }
0x1620   : > { %5508 = vst.msk [vmem:[%s698_s24] sm:$0x1] %vm5507_vm3, %v5502_v63  ;;  %v6678_v54 = vpop.f32.mrb[107].mxu1 }
0x1621 PF: > { %s31_s1 = sadd.s32 1, %s7460_s1   ;;  %s9654_s27 = sld [smem:[#allocation3_spill]] }
0x1622   : > { %p28_p5 = scmp.ge.s32.totalorder %s31_s1, 4   ;;  %s9655_s20 = smov %s7456_s21 }
0x1624   :  { %30 = sbr.rel (!%p28_p5) target bundleno = 5 (0x5), region = 146 }
0x1627   : > { %s9656_s21 = smov %s9654_s27 }

</bundles_post_ra>
